<compile_context>
chip_gen: v7x
topology: tpu7x:2x2x1
jax: 0.10.0
libtpu: 0.0.40
codegen_flags: <defaults>
</compile_context>

<pallas_src>
import numpy as np
import jax
import jax.numpy as jnp
from jax.experimental import pallas as pl
from jax.experimental.pallas import tpu as pltpu

# ---------------- config (FocalWindowAttention semantics, small shapes) ----------------
DIM = 32             # dim
NUM_HEADS = 4        # num_heads (dim % num_heads == 0)
WINDOW_SIZE = 7      # window_size
EXPAND_SIZE = 3      # expand_size (>0, focal_level>0 -> rolled-neighbor keys active)
FOCAL_LEVEL = 2
POOL_METHOD = 'none'  # default -> pooled focal levels disabled
SHIFT_SIZE = 0        # default -> no shift, no attention mask
HEAD_DIM = DIM // NUM_HEADS
SCALE = HEAD_DIM ** -0.5
B = 2
H = W = 14           # default forward(H=14, W=14); divisible by window_size -> no padding

WA = WINDOW_SIZE * WINDOW_SIZE                                  # 49 query tokens / window
WA_P = 56                                                       # padded to sublane multiple of 8
N_ROLLED = 4 * WA - 4 * (WINDOW_SIZE - EXPAND_SIZE) ** 2        # 132 rolled-neighbor keys
NK = WA + N_ROLLED                                              # 181 keys / window
NK_P = 192                                                      # padded key count
NW = B * (H // WINDOW_SIZE) * (W // WINDOW_SIZE)                # 8 windows total
WIN_PER_BLOCK = 4
GRID_STEPS = NW // WIN_PER_BLOCK                                # 2 grid steps (feeds 2 TCs on v7x)
NEG_BIAS = -1e30                                                # exp() underflows to exactly 0


# ---------------- the fused Pallas kernel ----------------
def fused_focal_attn_kernel(xq_ref, xk_ref, wq_ref, bq_ref, wkv_ref, bkv_ref,
                            bias_ref, pw_ref, pb_ref, o_ref):
    # hoisted (tiny) parameter loads -- shared by every window in the block
    wq = wq_ref[...]      # (C, C)   -- attention scale pre-folded
    bq = bq_ref[...]      # (1, C)   -- scale pre-folded
    wkv = wkv_ref[...]    # (C, 2C)
    bkv = bkv_ref[...]    # (1, 2C)
    pw = pw_ref[...]      # (C, C)
    pb = pb_ref[...]      # (1, C)

    @pl.loop(0, WIN_PER_BLOCK)
    def _(w):
        xq = xq_ref[w]    # (WA_P, C)  gathered query-position features
        xk = xk_ref[w]    # (NK_P, C)  gathered key-position features

        # fused QKV projection (MXU); q already carries the attention scale
        q = jnp.dot(xq, wq, preferred_element_type=jnp.float32) + bq       # (WA_P, C)
        kv = jnp.dot(xk, wkv, preferred_element_type=jnp.float32) + bkv    # (NK_P, 2C)

        o_parts = []
        for h in range(NUM_HEADS):
            qh = q[:, h * HEAD_DIM:(h + 1) * HEAD_DIM]                      # (WA_P, hd)
            kh = kv[:, h * HEAD_DIM:(h + 1) * HEAD_DIM]                     # (NK_P, hd)
            vh = kv[:, DIM + h * HEAD_DIM:DIM + (h + 1) * HEAD_DIM]         # (NK_P, hd)

            # scores: (WA_P, NK_P), contraction over head_dim of both operands
            s = jax.lax.dot_general(qh, kh, (((1,), (1,)), ((), ())),
                                    preferred_element_type=jnp.float32)
            s = s + bias_ref[h]                                             # rel-pos + neighbor bias
            s = s - jnp.max(s, axis=-1, keepdims=True)                      # XLU (free slot)
            p = jnp.exp(s)                                                  # EUP
            denom = jnp.sum(p, axis=-1, keepdims=True)                      # (WA_P, 1)
            oh = jnp.dot(p, vh, preferred_element_type=jnp.float32)         # (WA_P, hd)
            o_parts.append(oh * pl.reciprocal(denom, approx=True))          # normalize after PV

        o = jnp.concatenate(o_parts, axis=-1)                               # (WA_P, C)
        # fused output projection + bias, lane-dense (WA_P, C) store
        o_ref[w] = (jnp.dot(o, pw, preferred_element_type=jnp.float32) + pb).astype(o_ref.dtype)


def focal_window_attention_pallas(x, fused_params, q_idx, k_idx, out_idx):
    """x: (B, H*W, C). Returns (B, H*W, C)."""
    w_q, b_q, w_kv, b_kv, p_w, p_b, bias = fused_params
    C = x.shape[-1]
    x_flat = x.reshape(-1, C)                        # (B*H*W, C)

    # static-index gathers replace: 4 rolls + 12 window partitions + 2 concats + valid_ind gather
    x_q = jnp.take(x_flat, q_idx, axis=0)            # (NW, WA_P, C)
    x_k = jnp.take(x_flat, k_idx, axis=0)            # (NW, NK_P, C)

    out = pl.pallas_call(
        fused_focal_attn_kernel,
        out_shape=jax.ShapeDtypeStruct((NW, WA_P, C), jnp.float32),
        grid=(GRID_STEPS,),
        in_specs=[
            pl.BlockSpec((WIN_PER_BLOCK, WA_P, C), lambda i: (i, 0, 0)),
            pl.BlockSpec((WIN_PER_BLOCK, NK_P, C), lambda i: (i, 0, 0)),
            pl.BlockSpec((C, C), lambda i: (0, 0)),
            pl.BlockSpec((1, C), lambda i: (0, 0)),
            pl.BlockSpec((C, 2 * C), lambda i: (0, 0)),
            pl.BlockSpec((1, 2 * C), lambda i: (0, 0)),
            pl.BlockSpec((NUM_HEADS, WA_P, NK_P), lambda i: (0, 0, 0)),
            pl.BlockSpec((C, C), lambda i: (0, 0)),
            pl.BlockSpec((1, C), lambda i: (0, 0)),
        ],
        out_specs=pl.BlockSpec((WIN_PER_BLOCK, WA_P, C), lambda i: (i, 0, 0)),
        compiler_params=pltpu.CompilerParams(dimension_semantics=("parallel",)),
    )(x_q, x_k, w_q, b_q, w_kv, b_kv, bias, p_w, p_b)

    # window_reverse + padding-row drop as a single gather
    y = jnp.take(out.reshape(NW * WA_P, C), out_idx, axis=0)
    return y.reshape(B, H * W, C)


# ---------------- static index tables (numpy; same math as the torch __init__/forward) --------
def build_relative_position_index():
    ws = WINDOW_SIZE
    coords = np.stack(np.meshgrid(np.arange(ws), np.arange(ws), indexing='ij'))
    cf = coords.reshape(2, -1)
    rel = (cf[:, :, None] - cf[:, None, :]).transpose(1, 2, 0).copy()
    rel[:, :, 0] += ws - 1
    rel[:, :, 1] += ws - 1
    rel[:, :, 0] *= 2 * ws - 1
    return jnp.asarray(rel.sum(-1))                                   # (49, 49)


def build_index_tables():
    ws, e = WINDOW_SIZE, EXPAND_SIZE
    nwh, nww = H // ws, W // ws
    wa = ws * ws

    wh = np.repeat(np.arange(nwh), nww)                               # window grid (row-major)
    ww = np.tile(np.arange(nww), nwh)
    rr = np.repeat(np.arange(ws), ws)                                 # token within window
    cc = np.tile(np.arange(ws), ws)
    gh = wh[:, None] * ws + rr[None, :]                               # (nw_img, wa) global rows
    gw = ww[:, None] * ws + cc[None, :]
    q_img = gh * W + gw                                               # flat index within image

    # rolled-neighbor keys: torch.roll(k, (sh, sw)) then window_partition
    # rolled[i, j] = k[(i - sh) % H, (j - sw) % W]
    shifts = [(-e, -e), (-e, e), (e, -e), (e, e)]                     # tl, tr, bl, br
    rolled = [((gh - sh) % H) * W + ((gw - sw) % W) for sh, sw in shifts]
    rolled = np.concatenate(rolled, axis=1)                           # (nw_img, 4*wa)

    mask_tl = np.ones((ws, ws)); mask_tl[:-e, :-e] = 0
    mask_tr = np.ones((ws, ws)); mask_tr[:-e, e:] = 0
    mask_bl = np.ones((ws, ws)); mask_bl[e:, :-e] = 0
    mask_br = np.ones((ws, ws)); mask_br[e:, e:] = 0
    valid = np.nonzero(np.stack([mask_tl, mask_tr, mask_bl, mask_br], 0).reshape(-1))[0]  # (132,)

    k_img = np.concatenate([q_img, rolled[:, valid]], axis=1)         # (nw_img, 181)

    offs = (np.arange(B) * (H * W))[:, None, None]
    q_full = (q_img[None] + offs).reshape(-1, wa).astype(np.int32)    # (NW, 49)
    k_full = (k_img[None] + offs).reshape(-1, NK).astype(np.int32)    # (NW, 181)

    q_pad = np.zeros((NW, WA_P), np.int32); q_pad[:, :wa] = q_full
    k_pad = np.zeros((NW, NK_P), np.int32); k_pad[:, :NK] = k_full

    # output reassembly (inverse of the query gather) = window_reverse + drop of padded rows
    out_idx = np.zeros(B * H * W, np.int32)
    rows = np.arange(NW)[:, None] * WA_P + np.arange(wa)[None, :]
    out_idx[q_full.reshape(-1)] = rows.reshape(-1).astype(np.int32)

    return (jnp.asarray(q_pad), jnp.asarray(k_pad), jnp.asarray(out_idx), jnp.asarray(valid))


def prepare_fused_params(qkv_w, qkv_b, proj_w, proj_b, rpb_table, rpb_neighbors, rel_idx):
    # fold attention scale into the Q projection (static weight fold)
    w_q = qkv_w[:, :DIM] * SCALE
    b_q = (qkv_b[:DIM] * SCALE).reshape(1, DIM)
    w_kv = qkv_w[:, DIM:]
    b_kv = qkv_b[DIM:].reshape(1, 2 * DIM)

    # fused bias tensor: window rel-pos bias (49x49) ++ neighbor bias (49x132), padded to (56,192)
    rpb = rpb_table[rel_idx.reshape(-1)].reshape(WA, WA, NUM_HEADS).transpose(2, 0, 1)
    bias = jnp.concatenate([rpb, rpb_neighbors], axis=-1)             # (heads, 49, 181)
    bias = jnp.pad(bias, ((0, 0), (0, WA_P - WA), (0, 0)))            # pad query rows with 0
    bias = jnp.pad(bias, ((0, 0), (0, 0), (0, NK_P - NK)),
                   constant_values=NEG_BIAS)                          # pad key cols with -1e30
    return (w_q, b_q, w_kv, b_kv, proj_w, proj_b.reshape(1, DIM), bias)


# ---------------- pure-JAX reference (mirrors the torch forward; validation only) -------------
def window_partition(x, ws):
    Bx, Hx, Wx, C = x.shape
    x = x.reshape(Bx, Hx // ws, ws, Wx // ws, ws, C)
    return x.transpose(0, 1, 3, 2, 4, 5).reshape(-1, ws, ws, C)


def window_reverse(windows, ws, Hx, Wx):
    Bx = windows.shape[0] // (Hx * Wx // ws // ws)
    x = windows.reshape(Bx, Hx // ws, Wx // ws, ws, ws, -1)
    return x.transpose(0, 1, 3, 2, 4, 5).reshape(Bx, Hx, Wx, -1)


def focal_window_attention_ref(x, params, rel_idx, valid_ind_rolled):
    qkv_w, qkv_b, proj_w, proj_b, rpb_table, rpb_neighbors = params
    ws, e, heads, hd = WINDOW_SIZE, EXPAND_SIZE, NUM_HEADS, HEAD_DIM
    wa = ws * ws
    Bx, L, C = x.shape
    qkv = (x.reshape(-1, C) @ qkv_w + qkv_b).reshape(Bx, H, W, 3, C)
    q, k, v = qkv[..., 0, :], qkv[..., 1, :], qkv[..., 2, :]

    def to_head_windows(t):
        return window_partition(t, ws).reshape(-1, wa, heads, hd)

    q_windows = to_head_windows(q).transpose(0, 2, 1, 3)
    k_windows = to_head_windows(k).transpose(0, 2, 1, 3)
    v_windows = to_head_windows(v).transpose(0, 2, 1, 3)

    shifts = [(-e, -e), (-e, e), (e, -e), (e, e)]
    k_roll = jnp.concatenate([to_head_windows(jnp.roll(k, sh, axis=(1, 2))) for sh in shifts], axis=1)
    v_roll = jnp.concatenate([to_head_windows(jnp.roll(v, sh, axis=(1, 2))) for sh in shifts], axis=1)
    k_roll = k_roll.transpose(0, 2, 1, 3)[:, :, valid_ind_rolled]
    v_roll = v_roll.transpose(0, 2, 1, 3)[:, :, valid_ind_rolled]
    k_all = jnp.concatenate([k_windows, k_roll], axis=2)
    v_all = jnp.concatenate([v_windows, v_roll], axis=2)

    rpb = rpb_table[rel_idx.reshape(-1)].reshape(wa, wa, heads).transpose(2, 0, 1)
    bias = jnp.concatenate([rpb, rpb_neighbors], axis=-1)

    s = jnp.einsum('nhqd,nhkd->nhqk', q_windows * SCALE, k_all) + bias[None]
    p = jax.nn.softmax(s, axis=-1)
    out = jnp.einsum('nhqk,nhkd->nhqd', p, v_all)
    nw = out.shape[0]
    out = out.transpose(0, 2, 1, 3).reshape(nw, wa, C)
    out = (out.reshape(-1, C) @ proj_w + proj_b).reshape(nw, ws, ws, C)
    out = window_reverse(out, ws, H, W)
    return out.reshape(Bx, H * W, C)


if __name__ == "__main__":
    key = jax.random.PRNGKey(0)
    ks = jax.random.split(key, 7)
    x = jax.random.normal(ks[0], (B, H * W, DIM), dtype=jnp.float32)

    # deterministic synthetic parameters (shapes follow the module's __init__)
    qkv_w = (jax.random.normal(ks[1], (DIM, 3 * DIM)) * 0.02).astype(jnp.float32)
    qkv_b = (jax.random.normal(ks[2], (3 * DIM,)) * 0.02).astype(jnp.float32)
    proj_w = (jax.random.normal(ks[3], (DIM, DIM)) * 0.02).astype(jnp.float32)
    proj_b = (jax.random.normal(ks[4], (DIM,)) * 0.02).astype(jnp.float32)
    rpb_table = (jax.random.normal(ks[5], ((2 * WINDOW_SIZE - 1) ** 2, NUM_HEADS)) * 0.02).astype(jnp.float32)
    rpb_neighbors = (jax.random.normal(ks[6], (NUM_HEADS, WA, N_ROLLED)) * 0.02).astype(jnp.float32)

    rel_idx = build_relative_position_index()
    q_idx, k_idx, out_idx, valid_ind_rolled = build_index_tables()

    params = (qkv_w, qkv_b, proj_w, proj_b, rpb_table, rpb_neighbors)
    fused_params = prepare_fused_params(qkv_w, qkv_b, proj_w, proj_b,
                                        rpb_table, rpb_neighbors, rel_idx)

    fwd = jax.jit(lambda xx: focal_window_attention_pallas(xx, fused_params, q_idx, k_idx, out_idx))
    out = jax.block_until_ready(fwd(x))

    out_ref = jax.block_until_ready(focal_window_attention_ref(x, params, rel_idx, valid_ind_rolled))

    assert out.shape == (B, H * W, DIM)
    np.testing.assert_allclose(np.asarray(out), np.asarray(out_ref), atol=2e-3, rtol=2e-3)
    print("KERNEL_OK")
</pallas_src>

<mosaic_0001>
module attributes {stable_mosaic.version = 11 : i64} {
  func.func @fused_focal_attn_kernel(%arg0: i32, %arg1: memref<4x56x32xf32, #tpu.memory_space<vmem>>, %arg2: memref<4x192x32xf32, #tpu.memory_space<vmem>>, %arg3: memref<32x32xf32, #tpu.memory_space<vmem>>, %arg4: memref<1x32xf32, #tpu.memory_space<vmem>>, %arg5: memref<32x64xf32, #tpu.memory_space<vmem>>, %arg6: memref<1x64xf32, #tpu.memory_space<vmem>>, %arg7: memref<4x56x192xf32, #tpu.memory_space<vmem>>, %arg8: memref<32x32xf32, #tpu.memory_space<vmem>>, %arg9: memref<1x32xf32, #tpu.memory_space<vmem>>, %arg10: memref<4x56x32xf32, #tpu.memory_space<vmem>>) attributes {dimension_semantics = [#tpu.dimension_semantics<parallel>], iteration_bounds = array<i64: 2>, scalar_prefetch = 0 : i64, scratch_operands = 0 : i64, tpu.core_type = #tpu.core_type<tc>, window_params = [{transform_indices = @transform_0, window_bounds = array<i64: 4, 56, 32>}, {transform_indices = @transform_1, window_bounds = array<i64: 4, 192, 32>}, {pipeline_mode = #tpu.pipeline_mode<synchronous>, transform_indices = @transform_2, window_bounds = array<i64: 32, 32>}, {pipeline_mode = #tpu.pipeline_mode<synchronous>, transform_indices = @transform_3, window_bounds = array<i64: 1, 32>}, {pipeline_mode = #tpu.pipeline_mode<synchronous>, transform_indices = @transform_4, window_bounds = array<i64: 32, 64>}, {pipeline_mode = #tpu.pipeline_mode<synchronous>, transform_indices = @transform_5, window_bounds = array<i64: 1, 64>}, {pipeline_mode = #tpu.pipeline_mode<synchronous>, transform_indices = @transform_6, window_bounds = array<i64: 4, 56, 192>}, {pipeline_mode = #tpu.pipeline_mode<synchronous>, transform_indices = @transform_7, window_bounds = array<i64: 32, 32>}, {pipeline_mode = #tpu.pipeline_mode<synchronous>, transform_indices = @transform_8, window_bounds = array<i64: 1, 32>}, {transform_indices = @transform_9, window_bounds = array<i64: 4, 56, 32>}]} {
    %c0 = arith.constant 0 : index
    %c0_0 = arith.constant 0 : index
    %0 = vector.load %arg3[%c0, %c0_0] : memref<32x32xf32, #tpu.memory_space<vmem>>, vector<32x32xf32>
    %c0_1 = arith.constant 0 : index
    %c0_2 = arith.constant 0 : index
    %1 = vector.load %arg4[%c0_1, %c0_2] : memref<1x32xf32, #tpu.memory_space<vmem>>, vector<1x32xf32>
    %c0_3 = arith.constant 0 : index
    %c0_4 = arith.constant 0 : index
    %2 = vector.load %arg5[%c0_3, %c0_4] : memref<32x64xf32, #tpu.memory_space<vmem>>, vector<32x64xf32>
    %c0_5 = arith.constant 0 : index
    %c0_6 = arith.constant 0 : index
    %3 = vector.load %arg6[%c0_5, %c0_6] : memref<1x64xf32, #tpu.memory_space<vmem>>, vector<1x64xf32>
    %c0_7 = arith.constant 0 : index
    %c0_8 = arith.constant 0 : index
    %4 = vector.load %arg8[%c0_7, %c0_8] : memref<32x32xf32, #tpu.memory_space<vmem>>, vector<32x32xf32>
    %c0_9 = arith.constant 0 : index
    %c0_10 = arith.constant 0 : index
    %5 = vector.load %arg9[%c0_9, %c0_10] : memref<1x32xf32, #tpu.memory_space<vmem>>, vector<1x32xf32>
    %c0_i32 = arith.constant 0 : i32
    %c4_i32 = arith.constant 4 : i32
    %6 = arith.addi %c0_i32, %c4_i32 : i32
    %c1_i32 = arith.constant 1 : i32
    scf.for %arg11 = %c0_i32 to %6 step %c1_i32  : i32 {
      %c1_i32_12 = arith.constant 1 : i32
      %7 = arith.muli %arg11, %c1_i32_12 : i32
      %c0_i32_13 = arith.constant 0 : i32
      %8 = arith.addi %c0_i32_13, %7 : i32
      %9 = arith.index_cast %8 : i32 to index
      %c0_14 = arith.constant 0 : index
      %c0_15 = arith.constant 0 : index
      %10 = vector.load %arg1[%9, %c0_14, %c0_15] : memref<4x56x32xf32, #tpu.memory_space<vmem>>, vector<1x56x32xf32>
      %11 = vector.shape_cast %10 : vector<1x56x32xf32> to vector<56x32xf32>
      %12 = arith.index_cast %8 : i32 to index
      %c0_16 = arith.constant 0 : index
      %c0_17 = arith.constant 0 : index
      %13 = vector.load %arg2[%12, %c0_16, %c0_17] : memref<4x192x32xf32, #tpu.memory_space<vmem>>, vector<1x192x32xf32>
      %14 = vector.shape_cast %13 : vector<1x192x32xf32> to vector<192x32xf32>
      %cst = arith.constant dense<0.000000e+00> : vector<56x32xf32>
      %15 = tpu.matmul %11, %0, %cst {dimension_numbers = #tpu.dot_dimension_numbers<[1], [0], [0], [1], [0, 0, 1, 1], [], []>} : vector<56x32xf32>, vector<32x32xf32>, vector<56x32xf32> -> vector<56x32xf32>
      %16 = vector.broadcast %1 : vector<1x32xf32> to vector<56x32xf32>
      %17 = arith.addf %15, %16 : vector<56x32xf32>
      %cst_18 = arith.constant dense<0.000000e+00> : vector<192x64xf32>
      %18 = tpu.matmul %14, %2, %cst_18 {dimension_numbers = #tpu.dot_dimension_numbers<[1], [0], [0], [1], [0, 0, 1, 1], [], []>} : vector<192x32xf32>, vector<32x64xf32>, vector<192x64xf32> -> vector<192x64xf32>
      %19 = vector.broadcast %3 : vector<1x64xf32> to vector<192x64xf32>
      %20 = arith.addf %18, %19 : vector<192x64xf32>
      %21 = vector.extract_strided_slice %17 {offsets = [0, 0], sizes = [56, 8], strides = [1, 1]} : vector<56x32xf32> to vector<56x8xf32>
      %22 = vector.extract_strided_slice %20 {offsets = [0, 0], sizes = [192, 8], strides = [1, 1]} : vector<192x64xf32> to vector<192x8xf32>
      %23 = vector.extract_strided_slice %20 {offsets = [0, 32], sizes = [192, 8], strides = [1, 1]} : vector<192x64xf32> to vector<192x8xf32>
      %cst_19 = arith.constant dense<0.000000e+00> : vector<56x192xf32>
      %24 = tpu.matmul %21, %22, %cst_19 {dimension_numbers = #tpu.dot_dimension_numbers<[1], [1], [0], [0], [0, 0, 1, 0], [], []>} : vector<56x8xf32>, vector<192x8xf32>, vector<56x192xf32> -> vector<56x192xf32>
      %c0_20 = arith.constant 0 : index
      %c0_21 = arith.constant 0 : index
      %c0_22 = arith.constant 0 : index
      %25 = vector.load %arg7[%c0_20, %c0_21, %c0_22] : memref<4x56x192xf32, #tpu.memory_space<vmem>>, vector<1x56x192xf32>
      %26 = vector.shape_cast %25 : vector<1x56x192xf32> to vector<56x192xf32>
      %27 = arith.addf %24, %26 : vector<56x192xf32>
      %cst_23 = arith.constant dense<0xFF800000> : vector<56xf32>
      %28 = vector.multi_reduction <maximumf>, %27, %cst_23 [1] : vector<56x192xf32> to vector<56xf32>
      %29 = vector.shape_cast %28 : vector<56xf32> to vector<56x1xf32>
      %30 = vector.broadcast %29 : vector<56x1xf32> to vector<56x192xf32>
      %31 = arith.subf %27, %30 : vector<56x192xf32>
      %32 = math.exp %31 : vector<56x192xf32>
      %cst_24 = arith.constant dense<0.000000e+00> : vector<56xf32>
      %33 = vector.multi_reduction <add>, %32, %cst_24 [1] : vector<56x192xf32> to vector<56xf32>
      %34 = vector.shape_cast %33 : vector<56xf32> to vector<56x1xf32>
      %cst_25 = arith.constant dense<0.000000e+00> : vector<56x8xf32>
      %35 = tpu.matmul %32, %23, %cst_25 {dimension_numbers = #tpu.dot_dimension_numbers<[1], [0], [0], [1], [0, 0, 1, 1], [], []>} : vector<56x192xf32>, vector<192x8xf32>, vector<56x8xf32> -> vector<56x8xf32>
      %36 = tpu.reciprocal %34 {approx = true} : vector<56x1xf32> -> vector<56x1xf32>
      %37 = vector.broadcast %36 : vector<56x1xf32> to vector<56x8xf32>
      %38 = arith.mulf %35, %37 : vector<56x8xf32>
      %39 = vector.extract_strided_slice %17 {offsets = [0, 8], sizes = [56, 8], strides = [1, 1]} : vector<56x32xf32> to vector<56x8xf32>
      %40 = vector.extract_strided_slice %20 {offsets = [0, 8], sizes = [192, 8], strides = [1, 1]} : vector<192x64xf32> to vector<192x8xf32>
      %41 = vector.extract_strided_slice %20 {offsets = [0, 40], sizes = [192, 8], strides = [1, 1]} : vector<192x64xf32> to vector<192x8xf32>
      %cst_26 = arith.constant dense<0.000000e+00> : vector<56x192xf32>
      %42 = tpu.matmul %39, %40, %cst_26 {dimension_numbers = #tpu.dot_dimension_numbers<[1], [1], [0], [0], [0, 0, 1, 0], [], []>} : vector<56x8xf32>, vector<192x8xf32>, vector<56x192xf32> -> vector<56x192xf32>
      %c1 = arith.constant 1 : index
      %c0_27 = arith.constant 0 : index
      %c0_28 = arith.constant 0 : index
      %43 = vector.load %arg7[%c1, %c0_27, %c0_28] : memref<4x56x192xf32, #tpu.memory_space<vmem>>, vector<1x56x192xf32>
      %44 = vector.shape_cast %43 : vector<1x56x192xf32> to vector<56x192xf32>
      %45 = arith.addf %42, %44 : vector<56x192xf32>
      %cst_29 = arith.constant dense<0xFF800000> : vector<56xf32>
      %46 = vector.multi_reduction <maximumf>, %45, %cst_29 [1] : vector<56x192xf32> to vector<56xf32>
      %47 = vector.shape_cast %46 : vector<56xf32> to vector<56x1xf32>
      %48 = vector.broadcast %47 : vector<56x1xf32> to vector<56x192xf32>
      %49 = arith.subf %45, %48 : vector<56x192xf32>
      %50 = math.exp %49 : vector<56x192xf32>
      %cst_30 = arith.constant dense<0.000000e+00> : vector<56xf32>
      %51 = vector.multi_reduction <add>, %50, %cst_30 [1] : vector<56x192xf32> to vector<56xf32>
      %52 = vector.shape_cast %51 : vector<56xf32> to vector<56x1xf32>
      %cst_31 = arith.constant dense<0.000000e+00> : vector<56x8xf32>
      %53 = tpu.matmul %50, %41, %cst_31 {dimension_numbers = #tpu.dot_dimension_numbers<[1], [0], [0], [1], [0, 0, 1, 1], [], []>} : vector<56x192xf32>, vector<192x8xf32>, vector<56x8xf32> -> vector<56x8xf32>
      %54 = tpu.reciprocal %52 {approx = true} : vector<56x1xf32> -> vector<56x1xf32>
      %55 = vector.broadcast %54 : vector<56x1xf32> to vector<56x8xf32>
      %56 = arith.mulf %53, %55 : vector<56x8xf32>
      %57 = vector.extract_strided_slice %17 {offsets = [0, 16], sizes = [56, 8], strides = [1, 1]} : vector<56x32xf32> to vector<56x8xf32>
      %58 = vector.extract_strided_slice %20 {offsets = [0, 16], sizes = [192, 8], strides = [1, 1]} : vector<192x64xf32> to vector<192x8xf32>
      %59 = vector.extract_strided_slice %20 {offsets = [0, 48], sizes = [192, 8], strides = [1, 1]} : vector<192x64xf32> to vector<192x8xf32>
      %cst_32 = arith.constant dense<0.000000e+00> : vector<56x192xf32>
      %60 = tpu.matmul %57, %58, %cst_32 {dimension_numbers = #tpu.dot_dimension_numbers<[1], [1], [0], [0], [0, 0, 1, 0], [], []>} : vector<56x8xf32>, vector<192x8xf32>, vector<56x192xf32> -> vector<56x192xf32>
      %c2 = arith.constant 2 : index
      %c0_33 = arith.constant 0 : index
      %c0_34 = arith.constant 0 : index
      %61 = vector.load %arg7[%c2, %c0_33, %c0_34] : memref<4x56x192xf32, #tpu.memory_space<vmem>>, vector<1x56x192xf32>
      %62 = vector.shape_cast %61 : vector<1x56x192xf32> to vector<56x192xf32>
      %63 = arith.addf %60, %62 : vector<56x192xf32>
      %cst_35 = arith.constant dense<0xFF800000> : vector<56xf32>
      %64 = vector.multi_reduction <maximumf>, %63, %cst_35 [1] : vector<56x192xf32> to vector<56xf32>
      %65 = vector.shape_cast %64 : vector<56xf32> to vector<56x1xf32>
      %66 = vector.broadcast %65 : vector<56x1xf32> to vector<56x192xf32>
      %67 = arith.subf %63, %66 : vector<56x192xf32>
      %68 = math.exp %67 : vector<56x192xf32>
      %cst_36 = arith.constant dense<0.000000e+00> : vector<56xf32>
      %69 = vector.multi_reduction <add>, %68, %cst_36 [1] : vector<56x192xf32> to vector<56xf32>
      %70 = vector.shape_cast %69 : vector<56xf32> to vector<56x1xf32>
      %cst_37 = arith.constant dense<0.000000e+00> : vector<56x8xf32>
      %71 = tpu.matmul %68, %59, %cst_37 {dimension_numbers = #tpu.dot_dimension_numbers<[1], [0], [0], [1], [0, 0, 1, 1], [], []>} : vector<56x192xf32>, vector<192x8xf32>, vector<56x8xf32> -> vector<56x8xf32>
      %72 = tpu.reciprocal %70 {approx = true} : vector<56x1xf32> -> vector<56x1xf32>
      %73 = vector.broadcast %72 : vector<56x1xf32> to vector<56x8xf32>
      %74 = arith.mulf %71, %73 : vector<56x8xf32>
      %75 = vector.extract_strided_slice %17 {offsets = [0, 24], sizes = [56, 8], strides = [1, 1]} : vector<56x32xf32> to vector<56x8xf32>
      %76 = vector.extract_strided_slice %20 {offsets = [0, 24], sizes = [192, 8], strides = [1, 1]} : vector<192x64xf32> to vector<192x8xf32>
      %77 = vector.extract_strided_slice %20 {offsets = [0, 56], sizes = [192, 8], strides = [1, 1]} : vector<192x64xf32> to vector<192x8xf32>
      %cst_38 = arith.constant dense<0.000000e+00> : vector<56x192xf32>
      %78 = tpu.matmul %75, %76, %cst_38 {dimension_numbers = #tpu.dot_dimension_numbers<[1], [1], [0], [0], [0, 0, 1, 0], [], []>} : vector<56x8xf32>, vector<192x8xf32>, vector<56x192xf32> -> vector<56x192xf32>
      %c3 = arith.constant 3 : index
      %c0_39 = arith.constant 0 : index
      %c0_40 = arith.constant 0 : index
      %79 = vector.load %arg7[%c3, %c0_39, %c0_40] : memref<4x56x192xf32, #tpu.memory_space<vmem>>, vector<1x56x192xf32>
      %80 = vector.shape_cast %79 : vector<1x56x192xf32> to vector<56x192xf32>
      %81 = arith.addf %78, %80 : vector<56x192xf32>
      %cst_41 = arith.constant dense<0xFF800000> : vector<56xf32>
      %82 = vector.multi_reduction <maximumf>, %81, %cst_41 [1] : vector<56x192xf32> to vector<56xf32>
      %83 = vector.shape_cast %82 : vector<56xf32> to vector<56x1xf32>
      %84 = vector.broadcast %83 : vector<56x1xf32> to vector<56x192xf32>
      %85 = arith.subf %81, %84 : vector<56x192xf32>
      %86 = math.exp %85 : vector<56x192xf32>
      %cst_42 = arith.constant dense<0.000000e+00> : vector<56xf32>
      %87 = vector.multi_reduction <add>, %86, %cst_42 [1] : vector<56x192xf32> to vector<56xf32>
      %88 = vector.shape_cast %87 : vector<56xf32> to vector<56x1xf32>
      %cst_43 = arith.constant dense<0.000000e+00> : vector<56x8xf32>
      %89 = tpu.matmul %86, %77, %cst_43 {dimension_numbers = #tpu.dot_dimension_numbers<[1], [0], [0], [1], [0, 0, 1, 1], [], []>} : vector<56x192xf32>, vector<192x8xf32>, vector<56x8xf32> -> vector<56x8xf32>
      %90 = tpu.reciprocal %88 {approx = true} : vector<56x1xf32> -> vector<56x1xf32>
      %91 = vector.broadcast %90 : vector<56x1xf32> to vector<56x8xf32>
      %92 = arith.mulf %89, %91 : vector<56x8xf32>
      %93 = tpu.concatenate %38, %56, %74, %92 in 1 : vector<56x8xf32>, vector<56x8xf32>, vector<56x8xf32>, vector<56x8xf32> -> vector<56x32xf32>
      %cst_44 = arith.constant dense<0.000000e+00> : vector<56x32xf32>
      %94 = tpu.matmul %93, %4, %cst_44 {dimension_numbers = #tpu.dot_dimension_numbers<[1], [0], [0], [1], [0, 0, 1, 1], [], []>} : vector<56x32xf32>, vector<32x32xf32>, vector<56x32xf32> -> vector<56x32xf32>
      %95 = vector.broadcast %5 : vector<1x32xf32> to vector<56x32xf32>
      %96 = arith.addf %94, %95 : vector<56x32xf32>
      %97 = arith.index_cast %8 : i32 to index
      %c0_45 = arith.constant 0 : index
      %c0_46 = arith.constant 0 : index
      %98 = vector.load %arg10[%97, %c0_45, %c0_46] : memref<4x56x32xf32, #tpu.memory_space<vmem>>, vector<1x56x32xf32>
      %99 = vector.shape_cast %98 : vector<1x56x32xf32> to vector<56x32xf32>
      %100 = vector.shape_cast %96 : vector<56x32xf32> to vector<1x56x32xf32>
      tpu.vector_store %arg10[%97, %c0_45, %c0_46], %100 {strides = array<i32>} : memref<4x56x32xf32, #tpu.memory_space<vmem>>, vector<1x56x32xf32>,
    }
    %c4_i32_11 = arith.constant 4 : i32
    return
  }
  func.func @transform_0(%arg0: i32) -> (i32, i32, i32) {
    %c0_i32 = arith.constant 0 : i32
    %c0_i32_0 = arith.constant 0 : i32
    %c0_i32_1 = arith.constant 0 : i32
    return %arg0, %c0_i32, %c0_i32_0 : i32, i32, i32
  }
  func.func @transform_1(%arg0: i32) -> (i32, i32, i32) {
    %c0_i32 = arith.constant 0 : i32
    %c0_i32_0 = arith.constant 0 : i32
    %c0_i32_1 = arith.constant 0 : i32
    return %arg0, %c0_i32, %c0_i32_0 : i32, i32, i32
  }
  func.func @transform_2(%arg0: i32) -> (i32, i32) {
    %c0_i32 = arith.constant 0 : i32
    %c0_i32_0 = arith.constant 0 : i32
    %c0_i32_1 = arith.constant 0 : i32
    return %c0_i32, %c0_i32_0 : i32, i32
  }
  func.func @transform_3(%arg0: i32) -> (i32, i32) {
    %c0_i32 = arith.constant 0 : i32
    %c0_i32_0 = arith.constant 0 : i32
    %c0_i32_1 = arith.constant 0 : i32
    return %c0_i32, %c0_i32_0 : i32, i32
  }
  func.func @transform_4(%arg0: i32) -> (i32, i32) {
    %c0_i32 = arith.constant 0 : i32
    %c0_i32_0 = arith.constant 0 : i32
    %c0_i32_1 = arith.constant 0 : i32
    return %c0_i32, %c0_i32_0 : i32, i32
  }
  func.func @transform_5(%arg0: i32) -> (i32, i32) {
    %c0_i32 = arith.constant 0 : i32
    %c0_i32_0 = arith.constant 0 : i32
    %c0_i32_1 = arith.constant 0 : i32
    return %c0_i32, %c0_i32_0 : i32, i32
  }
  func.func @transform_6(%arg0: i32) -> (i32, i32, i32) {
    %c0_i32 = arith.constant 0 : i32
    %c0_i32_0 = arith.constant 0 : i32
    %c0_i32_1 = arith.constant 0 : i32
    %c0_i32_2 = arith.constant 0 : i32
    return %c0_i32, %c0_i32_0, %c0_i32_1 : i32, i32, i32
  }
  func.func @transform_7(%arg0: i32) -> (i32, i32) {
    %c0_i32 = arith.constant 0 : i32
    %c0_i32_0 = arith.constant 0 : i32
    %c0_i32_1 = arith.constant 0 : i32
    return %c0_i32, %c0_i32_0 : i32, i32
  }
  func.func @transform_8(%arg0: i32) -> (i32, i32) {
    %c0_i32 = arith.constant 0 : i32
    %c0_i32_0 = arith.constant 0 : i32
    %c0_i32_1 = arith.constant 0 : i32
    return %c0_i32, %c0_i32_0 : i32, i32
  }
  func.func @transform_9(%arg0: i32) -> (i32, i32, i32) {
    %c0_i32 = arith.constant 0 : i32
    %c0_i32_0 = arith.constant 0 : i32
    %c0_i32_1 = arith.constant 0 : i32
    return %arg0, %c0_i32, %c0_i32_0 : i32, i32, i32
  }
}

</mosaic_0001>

<bundles_post_ra>
// kernel: _lambda_.1
= control target key start
LH: loop header
LB: loop body
LE: loop exit
PB: predicated region body
PF: predicated region fallthrough
CT: control target
= control target key end

     0   :  { %s4768_s30 = smov 0   ;;  %s6277_s0 = inlined_call_operand.vmem [shape: f32[8,56,32], index: 0, kind: input, shape index: {}]   ;;  %s6278_s1 = inlined_call_operand.vmem [shape: f32[8,192,32], index: 1, kind: input, shape index: {}]   ;;  %s6279_s2 = inlined_call_operand.vmem [shape: f32[32,32], index: 2, kind: input, shape index: {}]   ;;  %s6280_s3 = inlined_call_operand.vmem [shape: f32[1,32], index: 3, kind: input, shape index: {}]   ;;  %s6281_s4 = inlined_call_operand.vmem [shape: f32[32,64], index: 4, kind: input, shape index: {}]   ;;  %s6282_s5 = inlined_call_operand.vmem [shape: f32[1,64], index: 5, kind: input, shape index: {}]   ;;  %s6283_s6 = inlined_call_operand.vmem [shape: f32[4,56,192], index: 6, kind: input, shape index: {}]   ;;  %s6284_s7 = inlined_call_operand.vmem [shape: f32[32,32], index: 7, kind: input, shape index: {}]   ;;  %s6285_s8 = inlined_call_operand.vmem [shape: f32[1,32], index: 8, kind: input, shape index: {}]   ;;  %s6286_s9 = inlined_call_operand.vmem [shape: f32[8,56,32], index: 9, kind: output, shape index: {}]  }
   0x1 LB: > { %s3310_s10 = sadd.s32 4294967295, %s4699_s30   ;;  %p3314_p0 = scmp.ge.s32.totalorder %s4699_s30, 1  ;;  %s4699_s30 = sphi %s4768_s30, %s19_s30  }
   0x2   : > { %p301_p1 = scmp.lt.s32.totalorder %s4699_s30, 3 }
   0x4   : > { %p302_p2 = pnand %p3314_p0, %p301_p1 }
   0x5   : > { %s3315_s11 = sshll.u32 (!%p302_p2), %s3310_s10, 2  ;;  %v4779_v0 = vld [vmem:[%s6279_s2] sm:$0xff] (!%p302_p2)  ;;  %v4784_v1 = vld [vmem:[%s6279_s2 + $0x8] sm:$0xff] (!%p302_p2)  ;;  %v4789_v2 = vld [vmem:[%s6279_s2 + $0x10] sm:$0xff] (!%p302_p2)  ;;  %s4866_s15 = smov (!%p302_p2), 0  }
   0x6   : > { %305 = sbr.rel (%p302_p2) target bundleno = 2766 (0xace), region = 56  ;;  %6294 = vst [vmem:[#allocation2_spill] sm:$0xff] (!%p302_p2), %v4779_v0  ;;  %6295 = vst [vmem:[#allocation3_spill] sm:$0xff] (!%p302_p2), %v4784_v1  ;;  %p346_p3 = scmp.lt.s32.totalorder (!%p302_p2), %s3315_s11, 7  ;;  %v4794_v3 = vld [vmem:[%s6279_s2 + $0x18] sm:$0xff] (!%p302_p2)  ;;  %v4804_v5 = vld [vmem:[%s6281_s4] sm:$0xff] (!%p302_p2) }
   0x7   : > { %6296 = vst [vmem:[#allocation4_spill] sm:$0xff] (!%p302_p2), %v4789_v2  ;;  %6297 = vst [vmem:[#allocation5_spill] sm:$0xff] (!%p302_p2), %v4794_v3  ;;  %v4799_v4 = vld [vmem:[%s6280_s3] ss:$0 sm:$0xff] (!%p302_p2)  ;;  %v4809_v6 = vld [vmem:[%s6281_s4 + $0x8] sm:$0xff] (!%p302_p2) }
   0x8   : > { %6298 = vst [vmem:[#allocation6_spill] sm:$0xff] (!%p302_p2), %v4799_v4  ;;  %6299 = vst [vmem:[#allocation7_spill] sm:$0xff] (!%p302_p2), %v4804_v5  ;;  %v4814_v7 = vld [vmem:[%s6281_s4 + $0x10] sm:$0xff] (!%p302_p2)  ;;  %v4819_v8 = vld [vmem:[%s6281_s4 + $0x18] sm:$0xff] (!%p302_p2) }
   0x9   : > { %6300 = vst [vmem:[#allocation8_spill] sm:$0xff] (!%p302_p2), %v4809_v6  ;;  %6301 = vst [vmem:[#allocation9_spill] sm:$0xff] (!%p302_p2), %v4814_v7  ;;  %v4824_v9 = vld [vmem:[%s6282_s5] ss:$0 sm:$0xff] (!%p302_p2)  ;;  %v4834_v11 = vld [vmem:[%s6284_s7 + $0x8] sm:$0xff] (!%p302_p2) }
   0xa   : > { %6302 = vst [vmem:[#allocation10_spill] sm:$0xff] (!%p302_p2), %v4819_v8  ;;  %6303 = vst [vmem:[#allocation11_spill] sm:$0xff] (!%p302_p2), %v4824_v9  ;;  %v4829_v10 = vld [vmem:[%s6284_s7] sm:$0xff] (!%p302_p2)  ;;  %v4839_v12 = vld [vmem:[%s6284_s7 + $0x10] sm:$0xff] (!%p302_p2) }
   0xb   : > { %6304 = vst [vmem:[#allocation12_spill] sm:$0xff] (!%p302_p2), %v4829_v10  ;;  %6305 = vst [vmem:[#allocation13_spill] sm:$0xff] (!%p302_p2), %v4834_v11  ;;  %v4844_v13 = vld [vmem:[%s6284_s7 + $0x18] sm:$0xff] (!%p302_p2)  ;;  %v4849_v14 = vld [vmem:[%s6285_s8] ss:$0 sm:$0xff] (!%p302_p2) }
   0xc   : > { %6306 = vst [vmem:[#allocation14_spill] sm:$0xff] (!%p302_p2), %v4839_v12  ;;  %6307 = vst [vmem:[#allocation15_spill] sm:$0xff] (!%p302_p2), %v4844_v13 }
   0xd   : > { %s6353_s11 = smov (!%p346_p3, %s3315_s11), 7  ;;  %6308 = vst [vmem:[#allocation16_spill] sm:$0xff] %v4849_v14 }
   0xe   : > { %s4070_s23 = smul.u32 56, %s6353_s11 }
   0xf   : > { %s4071_s24 = smul.u32 192, %s6353_s11 }
  0x10   : > { %s4854_s27 = scalar_lea.vmem %s6277_s0, %s4070_s23  ;;  %s4859_s10 = scalar_lea.vmem %s6286_s9, %s4070_s23 }
  0x11   : > { %s4864_s14 = scalar_lea.vmem %s6278_s1, %s4071_s24 }
  0x12 LB: >> { %v6309_v9 = vld [vmem:[#allocation11_spill] sm:$0xff]  ;;  %v6310_v4 = vld [vmem:[#allocation6_spill] sm:$0xff]  ;;  %v6312_v6 = vld [vmem:[#allocation8_spill] sm:$0xff]  ;;  %v6289_v17 = vmov 0.0|0.0   ;;  %s396_s11 = smul.u32 192, %s4703_s15  ;;  %vm4706_vm0 = vmmov 0   ;;  %s4703_s15 = sphi %s4866_s15, %s386_s15  }
  0x13   : >> { %v6311_v5 = vld [vmem:[#allocation7_spill] sm:$0xff]  ;;  %v6313_v7 = vld [vmem:[#allocation9_spill] sm:$0xff]  ;;  %v6314_v8 = vld [vmem:[#allocation10_spill] sm:$0xff]  ;;  %3710 = vmatprep.subr.bf16.mxu0 %v6289_v17  ;;  %v6287_v19 = vmov 0.0   ;;  %vm428_vm1 = vcmask 261120   ;;  %s387_s17 = smul.u32 56, %s4703_s15 }
  0x14   : >> { %v3716_v15 = vpack.c.bf16 %v6312_v6, %v6311_v5  ;;  %v3720_v16 = vpack.c.bf16 %v6314_v8, %v6313_v7  ;;  %v6315_v0 = vld [vmem:[#allocation2_spill] sm:$0xff]  ;;  %v6316_v1 = vld [vmem:[#allocation3_spill] sm:$0xff]  ;;  %3616 = vmatprep.mubr.msk.f32.mxu0 %vm4706_vm0, %v6287_v19  ;;  %v6317_v2 = vld [vmem:[#allocation4_spill] sm:$0xff]  ;;  %s4884_s16 = scalar_lea.vmem %s4864_s14, %s396_s11  ;;  %vm827_vm2 = vcmask 64512   ;;  %s4708_s19 = smov 96   ;;  %vm1028_vm4 = vcmask 523264  }
  0x15   : >> { %v3711_v18 = vpack.c.bf16 %v6316_v1, %v6315_v0  ;;  %v6318_v3 = vld [vmem:[#allocation5_spill] sm:$0xff]  ;;  %v398_v21 = vld [vmem:[%s4884_s16] sm:$0xff]  ;;  %v399_v22 = vld [vmem:[%s4884_s16 + $0x8] sm:$0xff]  ;;  %s4898_s18 = scalar_lea.vmem %s4854_s27, %s387_s17  ;;  %s4709_s20 = smov 120   ;;  %vm3078_vm5 = vcmask 130048   ;;  %vm3086_vm6 = vcmask 195584  }
  0x16   : >> { %3717 = vmatprep.subr.bf16.mxu1 %v3716_v15  ;;  %v3714_v20 = vpack.c.bf16 %v6318_v3, %v6317_v2  ;;  %3645 = vmatprep.mubr.msk.f32.mxu1 %vm428_vm1, %v398_v21  ;;  %v400_v23 = vld [vmem:[%s4884_s16 + $0x10] sm:$0xff]  ;;  %v401_v24 = vld [vmem:[%s4884_s16 + $0x18] sm:$0xff]  ;;  %v402_v25 = vld [vmem:[%s4884_s16 + $0x20] sm:$0xff]  ;;  %s4710_s21 = smov 88   ;;  %s4711_s22 = smov 112  }
  0x17   : >> { %3719 = vmatpush3.bf16.msra.mxu1 %v3716_v15  ;;  %3712 = vmatpush3.bf16.msra.mxu0 %v3711_v18  ;;  %v389_v26 = vld [vmem:[%s4898_s18] sm:$0xff]  ;;  %v403_v27 = vld [vmem:[%s4884_s16 + $0x28] sm:$0xff]  ;;  %v404_v29 = vld [vmem:[%s4884_s16 + $0x30] sm:$0xff]  ;;  %s4713_s23 = smov 104   ;;  %s4717_s24 = smov 24  }
  0x18   : >> { %3721 = vmatprep.subr.bf16.mxu1 %v3720_v16  ;;  %3713 = vmatprep.subr.bf16.mxu0 %v6289_v17  ;;  %v390_v28 = vld [vmem:[%s4898_s18 + $0x8] sm:$0xff]  ;;  %v405_v30 = vld [vmem:[%s4884_s16 + $0x38] sm:$0xff]  ;;  %v391_v31 = vld [vmem:[%s4898_s18 + $0x10] sm:$0xff]  ;;  %s3221_s25 = scalar_lea.vmem %s4859_s10, %s387_s17  ;;  %s386_s15 = sadd.s32 1, %s4703_s15  }
  0x19   : >> { %v406_v32 = vld [vmem:[%s4884_s16 + $0x40] sm:$0xff]  ;;  %v407_v33 = vld [vmem:[%s4884_s16 + $0x48] sm:$0xff]  ;;  %v392_v34 = vld [vmem:[%s4898_s18 + $0x18] sm:$0xff]  ;;  %p383_p4 = scmp.ge.s32.totalorder %s386_s15, 4  }
  0x1a   : >> { %v408_v35 = vld [vmem:[%s4884_s16 + $0x50] sm:$0xff]  ;;  %v409_v36 = vld [vmem:[%s4884_s16 + $0x58] sm:$0xff]  ;;  %v393_v37 = vld [vmem:[%s4898_s18 + $0x20] sm:$0xff] }
  0x1b   : >> { %3723 = vmatpush3.bf16.msra.mxu1 %v3720_v16  ;;  %3715 = vmatpush3.bf16.msra.mxu0 %v3714_v20  ;;  %v410_v38 = vld [vmem:[%s4884_s16 + $0x60] sm:$0xff]  ;;  %v411_v39 = vld [vmem:[%s4884_s16 + $0x68] sm:$0xff]  ;;  %v412_v41 = vld [vmem:[%s4884_s16 + $0x70] sm:$0xff] }
  0x1c   : >> { %3724 = vmatprep.subr.bf16.mxu0 %v6289_v17  ;;  %3772 = vmatprep.subr.bf16.mxu1 %v6289_v17  ;;  %v394_v40 = vld [vmem:[%s4898_s18 + $0x28] sm:$0xff]  ;;  %v413_v42 = vld [vmem:[%s4884_s16 + $0x78] sm:$0xff]  ;;  %v395_v43 = vld [vmem:[%s4898_s18 + $0x30] sm:$0xff] }
  0x1d   : >> { %v414_v44 = vld [vmem:[%s4884_s16 + $0x80] sm:$0xff]  ;;  %v415_v45 = vld [vmem:[%s4884_s16 + $0x88] sm:$0xff]  ;;  %v416_v46 = vld [vmem:[%s4884_s16 + $0x90] sm:$0xff] }
  0x1e   : >> { %3646 = vmatmul.mubr.msk.f32.vlgmr.msra.gmra.mrb[0].mxu1 %vm428_vm1, %v399_v22  ;;  %3617 = vmatmul.mubr.msk.f32.vlgmr.msra.gmra.mrb[0].mxu0 %vm428_vm1, %v389_v26  ;;  %v417_v47 = vld [vmem:[%s4884_s16 + $0x98] sm:$0xff]  ;;  %v418_v48 = vld [vmem:[%s4884_s16 + $0xa0] sm:$0xff]  ;;  %v419_v49 = vld [vmem:[%s4884_s16 + $0xa8] sm:$0xff] }
  0x1f   : >> { %3648 = vmatprep.mubr.msk.f32.mxu1 %vm428_vm1, %v400_v23  ;;  %3619 = vmatprep.mubr.msk.f32.mxu0 %vm4706_vm0, %v6287_v19  ;;  %v420_v50 = vld [vmem:[%s4884_s16 + $0xb0] sm:$0xff]  ;;  %v421_v51 = vld [vmem:[%s4884_s16 + $0xb8] sm:$0xff]  ;;  %vm4974_vm3 = vmpackc.low %vm827_vm2, %vm827_vm2 }
  0x20   : >> { %v3401_v8 = vld [vmem:[%s6283_s6 + $0xb8] sm:$0xff]  ;;  %v3403_v14 = vld [vmem:[%s6283_s6 + $0xc8] sm:$0xff] }
  0x22   : >> { %3649 = vmatmul.mubr.msk.f32.gmra.mrb[2].mxu1 %vm428_vm1, %v401_v24  ;;  %3620 = vmatmul.mubr.msk.f32.gmra.mrb[2].mxu0 %vm428_vm1, %v390_v28 }
  0x23   : >> { %3651 = vmatprep.mubr.msk.f32.mxu1 %vm428_vm1, %v402_v25  ;;  %3622 = vmatprep.mubr.msk.f32.mxu0 %vm4706_vm0, %v6287_v19 }
  0x26   : >> { %3652 = vmatmul.mubr.msk.f32.gmra.mrb[4].mxu1 %vm428_vm1, %v403_v27  ;;  %3623 = vmatmul.mubr.msk.f32.gmra.mrb[4].mxu0 %vm428_vm1, %v391_v31 }
  0x27   : >> { %3654 = vmatprep.mubr.msk.f32.mxu1 %vm428_vm1, %v404_v29  ;;  %3625 = vmatprep.mubr.msk.f32.mxu0 %vm4706_vm0, %v6287_v19 }
  0x2a   : >> { %3655 = vmatmul.mubr.msk.f32.gmra.mrb[6].mxu1 %vm428_vm1, %v405_v30  ;;  %3626 = vmatmul.mubr.msk.f32.gmra.mrb[6].mxu0 %vm428_vm1, %v392_v34 }
  0x2b   : >> { %3657 = vmatprep.mubr.msk.f32.mxu1 %vm428_vm1, %v406_v32  ;;  %3628 = vmatprep.mubr.msk.f32.mxu0 %vm4706_vm0, %v6287_v19 }
  0x2e   : >> { %3658 = vmatmul.mubr.msk.f32.gmra.mrb[8].mxu1 %vm428_vm1, %v407_v33  ;;  %3629 = vmatmul.mubr.msk.f32.gmra.mrb[8].mxu0 %vm428_vm1, %v393_v37 }
  0x2f   : >> { %3660 = vmatprep.mubr.msk.f32.mxu1 %vm428_vm1, %v408_v35  ;;  %3631 = vmatprep.mubr.msk.f32.mxu0 %vm4706_vm0, %v6287_v19 }
  0x32   : >> { %3661 = vmatmul.mubr.msk.f32.gmra.mrb[10].mxu1 %vm428_vm1, %v409_v36  ;;  %3632 = vmatmul.mubr.msk.f32.gmra.mrb[10].mxu0 %vm428_vm1, %v394_v40 }
  0x33   : >> { %3663 = vmatprep.mubr.msk.f32.mxu1 %vm428_vm1, %v410_v38  ;;  %3634 = vmatprep.mubr.msk.f32.mxu0 %vm4706_vm0, %v6287_v19 }
  0x36   : >> { %3664 = vmatmul.mubr.msk.f32.gmra.mrb[12].mxu1 %vm428_vm1, %v411_v39  ;;  %3635 = vmatmul.mubr.msk.f32.gmra.mrb[12].mxu0 %vm428_vm1, %v395_v43 }
  0x37   : >> { %3666 = vmatprep.mubr.msk.f32.mxu1 %vm428_vm1, %v412_v41  ;;  %985 = vmatprep.mubr.f32.mxu0 %v6287_v19 }
  0x3a   : >> { %3667 = vmatmul.mubr.msk.f32.gmra.mrb[14].mxu1 %vm428_vm1, %v413_v42 }
  0x3b   : >> { %3669 = vmatprep.mubr.msk.f32.mxu1 %vm428_vm1, %v414_v44 }
  0x3e   : >> { %3670 = vmatmul.mubr.msk.f32.gmra.mrb[16].mxu1 %vm428_vm1, %v415_v45 }
  0x3f   : >> { %3672 = vmatprep.mubr.msk.f32.mxu1 %vm428_vm1, %v416_v46 }
  0x42   : >> { %3673 = vmatmul.mubr.msk.f32.gmra.mrb[18].mxu1 %vm428_vm1, %v417_v47 }
  0x43   : >> { %3675 = vmatprep.mubr.msk.f32.mxu1 %vm428_vm1, %v418_v48 }
  0x46   : >> { %3676 = vmatmul.mubr.msk.f32.gmra.mrb[20].mxu1 %vm428_vm1, %v419_v49 }
  0x47   : >> { %3678 = vmatprep.mubr.msk.f32.mxu1 %vm428_vm1, %v420_v50 }
  0x4a   : >> { %3679 = vmatmul.mubr.msk.f32.gmra.mrb[22].mxu1 %vm428_vm1, %v421_v51 }
  0xf1   : >> { %v3647_v52 = vpop.f32.mrb[0].mxu1  ;;  %v4980_v60 = vpop.f32.mrb[0].mxu0 }
  0xf2   : >> { %v700_v53 = vadd.f32 %v3647_v52, %v6309_v9  ;;  %v694_v54 = vpop.f32.mrb[1].mxu1  ;;  %v3618_v63 = vpop.f32.mrb[1].mxu0 }
  0xf3   : >> { %v695_v55 = vadd.f32 %v6309_v9, %v694_v54 }
  0xf5   : >> { %v4978_v57 = vpack.i.bf16 %v700_v53, %v695_v55  ;;  %v3725_v58 = vpack.c.bf16 %v700_v53, %v695_v55  ;;  %v3650_v59 = vpop.f32.mrb[2].mxu1  ;;  %v4991_v21 = vpop.f32.mrb[2].mxu0 }
  0xf6   : >> { %v710_v61 = vadd.f32 %v3650_v59, %v6309_v9  ;;  %v704_v62 = vpop.f32.mrb[3].mxu1  ;;  %v3621_v24 = vpop.f32.mrb[3].mxu0 }
  0xf7   : >> { %4102 = vrot.lane.b32.xlu0 %v4978_v57, %s4708_s19  ;;  %3727 = vmatpush1.bf16.xpose.msk.msra.mxu0 %vm4974_vm3, %v3725_v58  ;;  %v705_v15 = vadd.f32 %v6309_v9, %v704_v62 }
  0xf8   : >> { %3728 = vmatprep.subr.bf16.mxu0 %v6289_v17 }
  0xf9   : >> { %v4989_v16 = vpack.i.bf16 %v710_v61, %v705_v15  ;;  %v3729_v18 = vpack.c.bf16 %v710_v61, %v705_v15  ;;  %v3653_v20 = vpop.f32.mrb[4].mxu1  ;;  %v4999_v29 = vpop.f32.mrb[4].mxu0 }
  0xfa   : >> { %v720_v22 = vadd.f32 %v3653_v20, %v6309_v9  ;;  %v714_v23 = vpop.f32.mrb[5].mxu1  ;;  %v3624_v32 = vpop.f32.mrb[5].mxu0 }
  0xfb   : >> { %4107 = vrot.lane.b32.xlu0 %v4978_v57, %s4709_s20  ;;  %v715_v25 = vadd.f32 %v6309_v9, %v714_v23 }
  0xfd   : >> { %v3656_v26 = vpop.f32.mrb[6].mxu1  ;;  %v4997_v27 = vpack.i.bf16 %v720_v22, %v715_v25  ;;  %v3733_v28 = vpack.c.bf16 %v720_v22, %v715_v25  ;;  %v5012_v37 = vpop.f32.mrb[6].mxu0 }
  0xfe   : >> { %v730_v30 = vadd.f32 %v3656_v26, %v6309_v9  ;;  %v724_v31 = vpop.f32.mrb[7].mxu1  ;;  %v3627_v40 = vpop.f32.mrb[7].mxu0 }
  0xff   : >> { %4112 = vrot.lane.b32.xlu0 %v4989_v16, %s4708_s19  ;;  %3731 = vmatpush1.bf16.xpose.msk.msra.mxu0 %vm4974_vm3, %v3729_v18  ;;  %v725_v33 = vadd.f32 %v6309_v9, %v724_v31 }
 0x100   : >> { %4122 = vrot.lane.b32.xlu1 %v4997_v27, %s4708_s19  ;;  %3732 = vmatprep.subr.bf16.mxu0 %v6289_v17 }
 0x101   : >> { %v3659_v34 = vpop.f32.mrb[8].mxu1  ;;  %v5010_v35 = vpack.i.bf16 %v730_v30, %v725_v33  ;;  %v3737_v36 = vpack.c.bf16 %v730_v30, %v725_v33  ;;  %v5022_v45 = vpop.f32.mrb[8].mxu0 }
 0x102   : >> { %v740_v38 = vadd.f32 %v3659_v34, %v6309_v9  ;;  %v734_v39 = vpop.f32.mrb[9].mxu1  ;;  %v3630_v48 = vpop.f32.mrb[9].mxu0 }
 0x103   : >> { %4117 = vrot.lane.b32.xlu0 %v4989_v16, %s4709_s20  ;;  %v735_v41 = vadd.f32 %v6309_v9, %v734_v39 }
 0x104   : >> { %4132 = vrot.lane.b32.xlu1 %v5010_v35, %s4708_s19 }
 0x105   : >> { %v3662_v42 = vpop.f32.mrb[10].mxu1  ;;  %v5020_v43 = vpack.i.bf16 %v740_v38, %v735_v41  ;;  %v3741_v44 = vpack.c.bf16 %v740_v38, %v735_v41  ;;  %v5033_v53 = vpop.f32.mrb[10].mxu0 }
 0x106   : >> { %v750_v46 = vadd.f32 %v3662_v42, %v6309_v9  ;;  %v744_v47 = vpop.f32.mrb[11].mxu1  ;;  %v3633_v58 = vpop.f32.mrb[11].mxu0 }
 0x107   : >> { %4127 = vrot.lane.b32.xlu0 %v4997_v27, %s4709_s20  ;;  %3735 = vmatpush1.bf16.xpose.msk.msra.mxu0 %vm4974_vm3, %v3733_v28  ;;  %v745_v49 = vadd.f32 %v6309_v9, %v744_v47 }
 0x108   : >> { %3736 = vmatprep.subr.bf16.mxu0 %v6289_v17 }
 0x109   : >> { %v3665_v50 = vpop.f32.mrb[12].mxu1  ;;  %v5031_v51 = vpack.i.bf16 %v750_v46, %v745_v49  ;;  %v3745_v52 = vpack.c.bf16 %v750_v46, %v745_v49  ;;  %v5043_v15 = vpop.f32.mrb[12].mxu0 }
 0x10a   : >> { %v760_v54 = vadd.f32 %v3665_v50, %v6309_v9  ;;  %v754_v55 = vpop.f32.mrb[13].mxu1  ;;  %v3636_v22 = vpop.f32.mrb[13].mxu0 }
 0x10b   : >> { %4137 = vrot.lane.b32.xlu0 %v5010_v35, %s4709_s20  ;;  %v755_v59 = vadd.f32 %v6309_v9, %v754_v55  ;;  %4147 = vrot.lane.b32.xlu1 %v5031_v51, %s4708_s19 }
 0x10d   : >> { %v3668_v61 = vpop.f32.mrb[14].mxu1  ;;  %v5041_v62 = vpack.i.bf16 %v760_v54, %v755_v59  ;;  %v3749_v63 = vpack.c.bf16 %v760_v54, %v755_v59 }
 0x10e   : >> { %v770_v18 = vadd.f32 %v3668_v61, %v6309_v9  ;;  %v764_v20 = vpop.f32.mrb[15].mxu1 }
 0x10f   : >> { %4142 = vrot.lane.b32.xlu0 %v5020_v43, %s4708_s19  ;;  %3739 = vmatpush1.bf16.xpose.msk.msra.mxu0 %vm4974_vm3, %v3737_v36  ;;  %v765_v23 = vadd.f32 %v6309_v9, %v764_v20 }
 0x110   : >> { %3740 = vmatprep.subr.bf16.mxu0 %v6289_v17 }
 0x111   : >> { %v3671_v24 = vpop.f32.mrb[16].mxu1  ;;  %v5052_v25 = vpack.i.bf16 %v770_v18, %v765_v23  ;;  %v3753_v26 = vpack.c.bf16 %v770_v18, %v765_v23  ;;  %v5125_v18 = vadd.f32 %v6310_v4, %v4999_v29  ;;  %v5146_v29 = vadd.f32 %v6310_v4, %v5033_v53 }
 0x112   : >> { %v780_v28 = vadd.f32 %v3671_v24, %v6309_v9  ;;  %v774_v30 = vpop.f32.mrb[17].mxu1 }
 0x113   : >> { %4152 = vrot.lane.b32.xlu0 %v5041_v62, %s4708_s19  ;;  %v775_v31 = vadd.f32 %v6309_v9, %v774_v30 }
 0x115   : >> { %v3674_v32 = vpop.f32.mrb[18].mxu1  ;;  %v5058_v33 = vpack.i.bf16 %v780_v28, %v775_v31  ;;  %v3757_v34 = vpack.c.bf16 %v780_v28, %v775_v31 }
 0x116   : >> { %v790_v36 = vadd.f32 %v3674_v32, %v6309_v9  ;;  %v784_v38 = vpop.f32.mrb[19].mxu1 }
 0x117   : >> { %4157 = vrot.lane.b32.xlu0 %v5052_v25, %s4708_s19  ;;  %3743 = vmatpush1.bf16.xpose.msk.msra.mxu0 %vm4974_vm3, %v3741_v44  ;;  %v785_v39 = vadd.f32 %v6309_v9, %v784_v38 }
 0x118   : >> { %3744 = vmatprep.subr.bf16.mxu0 %v6289_v17 }
 0x119   : >> { %v3677_v40 = vpop.f32.mrb[20].mxu1  ;;  %v5067_v41 = vpack.i.bf16 %v790_v36, %v785_v39  ;;  %v3761_v42 = vpack.c.bf16 %v790_v36, %v785_v39 }
 0x11a   : >> { %v800_v46 = vadd.f32 %v3677_v40, %v6309_v9  ;;  %v794_v47 = vpop.f32.mrb[21].mxu1 }
 0x11b   : >> { %4162 = vrot.lane.b32.xlu0 %v5058_v33, %s4708_s19  ;;  %v795_v48 = vadd.f32 %v6309_v9, %v794_v47 }
 0x11d   : >> { %v3680_v49 = vpop.f32.mrb[22].mxu1  ;;  %v5073_v50 = vpack.i.bf16 %v800_v46, %v795_v48  ;;  %v3765_v44 = vpack.c.bf16 %v800_v46, %v795_v48 }
 0x11e   : >> { %v810_v54 = vadd.f32 %v3680_v49, %v6309_v9  ;;  %v804_v55 = vpop.f32.mrb[23].mxu1 }
 0x11f   : >> { %4167 = vrot.lane.b32.xlu0 %v5067_v41, %s4708_s19  ;;  %3747 = vmatpush1.bf16.xpose.msk.msra.mxu0 %vm4974_vm3, %v3745_v52  ;;  %v805_v58 = vadd.f32 %v6309_v9, %v804_v55  ;;  %v5112_v52 = vadd.f32 %v6310_v4, %v4980_v60  ;;  %v5132_v60 = vadd.f32 %v6310_v4, %v5012_v37  ;;  %v3398_v9 = vld [vmem:[%s6283_s6 + $0xa0] sm:$0xff] }
 0x120   : >> { %3748 = vmatprep.subr.bf16.mxu0 %v6289_v17 }
 0x121   : >> { %v5082_v59 = vpack.i.bf16 %v810_v54, %v805_v58  ;;  %v3769_v61 = vpack.c.bf16 %v810_v54, %v805_v58 }
 0x123   : >> { %4172 = vrot.lane.b32.xlu0 %v5073_v50, %s4708_s19 }
 0x127   : >> { %4177 = vrot.lane.b32.xlu0 %v5082_v59, %s4708_s19  ;;  %3751 = vmatpush1.bf16.xpose.msk.msra.mxu0 %vm4974_vm3, %v3749_v63  ;;  %v5118_v63 = vadd.f32 %v6310_v4, %v4991_v21  ;;  %v5139_v21 = vadd.f32 %v6310_v4, %v5022_v45  ;;  %v5153_v45 = vadd.f32 %v6310_v4, %v5043_v15 }
 0x128   : >> { %3752 = vmatprep.subr.bf16.mxu0 %v6289_v17 }
 0x12b   : >> { %4187 = vrot.lane.b32.xlu0 %v5031_v51, %s4709_s20 }
 0x12f   : >> { %4192 = vrot.lane.b32.xlu0 %v5041_v62, %s4709_s20  ;;  %3755 = vmatpush1.bf16.xpose.msk.msra.mxu0 %vm4974_vm3, %v3753_v26 }
 0x130   : >> { %3756 = vmatprep.subr.bf16.mxu0 %v6289_v17 }
 0x137   : >> { %3759 = vmatpush1.bf16.xpose.msk.msra.mxu0 %vm4974_vm3, %v3757_v34 }
 0x138   : >> { %3760 = vmatprep.subr.bf16.mxu0 %v6289_v17 }
 0x13f   : >> { %3763 = vmatpush1.bf16.xpose.msk.msra.mxu0 %vm4974_vm3, %v3761_v42 }
 0x140   : >> { %3764 = vmatprep.subr.bf16.mxu0 %v6289_v17 }
 0x147   : >> { %3767 = vmatpush1.bf16.xpose.msk.msra.mxu0 %vm4974_vm3, %v3765_v44 }
 0x148   : >> { %3768 = vmatprep.subr.bf16.mxu0 %v6289_v17 }
 0x14f   : >> { %3771 = vmatpush1.bf16.xpose.msk.msra.mxu0 %vm4974_vm3, %v3769_v61 }
 0x150   : >> { %3856 = vmatprep.subr.bf16.mxu0 %v6289_v17 }
 0x156   : >> { %3378 = vmatmul.mubr.msk.f32.vlgmr.msra.gmra.mrb[14].mxu0 %vm827_vm2, %v5112_v52 }
 0x157   : >> { %991 = vmatprep.mubr.f32.mxu0 %v6287_v19 }
 0x15a   : >> { %3379 = vmatmul.mubr.msk.f32.gmra.mrb[16].mxu0 %vm827_vm2, %v5118_v63 }
 0x15b   : >> { %997 = vmatprep.mubr.f32.mxu0 %v6287_v19 }
 0x15e   : >> { %3380 = vmatmul.mubr.msk.f32.gmra.mrb[18].mxu0 %vm827_vm2, %v5125_v18 }
 0x15f   : >> { %1003 = vmatprep.mubr.f32.mxu0 %v6287_v19 }
 0x162   : >> { %3381 = vmatmul.mubr.msk.f32.gmra.mrb[20].mxu0 %vm827_vm2, %v5132_v60 }
 0x163   : >> { %1009 = vmatprep.mubr.f32.mxu0 %v6287_v19 }
 0x166   : >> { %3382 = vmatmul.mubr.msk.f32.gmra.mrb[22].mxu0 %vm827_vm2, %v5139_v21 }
 0x167   : >> { %1015 = vmatprep.mubr.f32.mxu0 %v6287_v19 }
 0x169   : >> { %v4103_v37 = vpop.permute.xlu0 %4102 }
 0x16a   : >> { %v4105_v20 = vunpack.i.h.bf16 %v4103_v37  ;;  %v4104_v22 = vunpack.i.l.bf16 %v4103_v37  ;;  %3383 = vmatmul.mubr.msk.f32.gmra.mrb[24].mxu0 %vm827_vm2, %v5146_v29 }
 0x16b   : >> { %1021 = vmatprep.mubr.f32.mxu0 %v6287_v19 }
 0x16c   : >> { %v3773_v23 = vpack.c.bf16 %v4105_v20, %v4104_v22 }
 0x16d   : >> { %v5156_v24 = vpop.permute.xlu0 %4107 }
 0x16e   : >> { %3774 = vmatpush1.bf16.msra.mxu1 %v3773_v23  ;;  %3384 = vmatmul.mubr.msk.f32.gmra.mrb[26].mxu0 %vm827_vm2, %v5153_v45  ;;  %v4110_v1 = vunpack.i.h.bf16 %v5156_v24  ;;  %v4109_v2 = vunpack.i.l.bf16 %v5156_v24 }
 0x16f   : >> { %3775 = vmatprep.subr.bf16.mxu1 %v6289_v17 }
 0x171   : >> { %v4113_v53 = vpop.permute.xlu0 %4112 }
 0x172   : >> { %v4115_v26 = vunpack.i.h.bf16 %v4113_v53  ;;  %v4114_v28 = vunpack.i.l.bf16 %v4113_v53  ;;  %v4123_v30 = vpop.permute.xlu1 %4122 }
 0x173   : >> { %v4125_v31 = vunpack.i.h.bf16 %v4123_v30  ;;  %v4124_v32 = vunpack.i.l.bf16 %v4123_v30 }
 0x174   : >> { %v3776_v34 = vpack.c.bf16 %v4115_v26, %v4114_v28 }
 0x175   : >> { %v5161_v15 = vpop.permute.xlu0 %4117  ;;  %v3779_v36 = vpack.c.bf16 %v4125_v31, %v4124_v32 }
 0x176   : >> { %3777 = vmatpush1.bf16.msra.mxu1 %v3776_v34  ;;  %v4133_v38 = vpop.permute.xlu1 %4132  ;;  %v4119_v24 = vunpack.i.l.bf16 %v5161_v15 }
 0x177   : >> { %3778 = vmatprep.subr.bf16.mxu1 %v6289_v17  ;;  %v4135_v39 = vunpack.i.h.bf16 %v4133_v38  ;;  %v4134_v40 = vunpack.i.l.bf16 %v4133_v38 }
 0x179   : >> { %v5164_v42 = vpop.permute.xlu0 %4127  ;;  %v3782_v46 = vpack.c.bf16 %v4135_v39, %v4134_v40 }
 0x17a   : >> { %3780 = vmatpush1.bf16.msra.mxu1 %v3779_v36 }
 0x17b   : >> { %3781 = vmatprep.subr.bf16.mxu1 %v6289_v17 }
 0x17d   : >> { %v5167_v47 = vpop.permute.xlu0 %4137  ;;  %v4148_v48 = vpop.permute.xlu1 %4147 }
 0x17e   : >> { %3783 = vmatpush1.bf16.msra.mxu1 %v3782_v46  ;;  %v4150_v55 = vunpack.i.h.bf16 %v4148_v48  ;;  %v4149_v58 = vunpack.i.l.bf16 %v4148_v48 }
 0x17f   : >> { %3784 = vmatprep.subr.bf16.mxu1 %v6289_v17 }
 0x180   : >> { %v3788_v23 = vpack.c.bf16 %v4150_v55, %v4149_v58 }
 0x181   : >> { %v4143_v49 = vpop.permute.xlu0 %4142 }
 0x182   : >> { %v4145_v44 = vunpack.i.h.bf16 %v4143_v49  ;;  %v4144_v54 = vunpack.i.l.bf16 %v4143_v49 }
 0x184   : >> { %v3785_v61 = vpack.c.bf16 %v4145_v44, %v4144_v54 }
 0x185   : >> { %v4153_v37 = vpop.permute.xlu0 %4152 }
 0x186   : >> { %v4155_v20 = vunpack.i.h.bf16 %v4153_v37  ;;  %v4154_v22 = vunpack.i.l.bf16 %v4153_v37  ;;  %3786 = vmatpush1.bf16.msra.mxu1 %v3785_v61 }
 0x187   : >> { %3787 = vmatprep.subr.bf16.mxu1 %v6289_v17 }
 0x188   : >> { %v3791_v26 = vpack.c.bf16 %v4155_v20, %v4154_v22  ;;  %v814_v22 = vld [vmem:[%s6283_s6 + $0x8] sm:$0xff] }
 0x189   : >> { %v4158_v53 = vpop.permute.xlu0 %4157 }
 0x18a   : >> { %v4160_v28 = vunpack.i.h.bf16 %v4158_v53  ;;  %v4159_v30 = vunpack.i.l.bf16 %v4158_v53  ;;  %3789 = vmatpush1.bf16.msra.mxu1 %v3788_v23  ;;  %v813_v23 = vld [vmem:[%s6283_s6] sm:$0xff] }
 0x18b   : >> { %3790 = vmatprep.subr.bf16.mxu1 %v6289_v17 }
 0x18c   : >> { %v3794_v32 = vpack.c.bf16 %v4160_v28, %v4159_v30  ;;  %v815_v30 = vld [vmem:[%s6283_s6 + $0x10] sm:$0xff] }
 0x18d   : >> { %v4163_v31 = vpop.permute.xlu0 %4162 }
 0x18e   : >> { %v4165_v34 = vunpack.i.h.bf16 %v4163_v31  ;;  %v4164_v36 = vunpack.i.l.bf16 %v4163_v31  ;;  %3792 = vmatpush1.bf16.msra.mxu1 %v3791_v26 }
 0x18f   : >> { %3793 = vmatprep.subr.bf16.mxu1 %v6289_v17 }
 0x190   : >> { %v3797_v39 = vpack.c.bf16 %v4165_v34, %v4164_v36 }
 0x191   : >> { %v4168_v38 = vpop.permute.xlu0 %4167 }
 0x192   : >> { %v4170_v40 = vunpack.i.h.bf16 %v4168_v38  ;;  %v4169_v46 = vunpack.i.l.bf16 %v4168_v38  ;;  %3795 = vmatpush1.bf16.msra.mxu1 %v3794_v32  ;;  %v816_v32 = vld [vmem:[%s6283_s6 + $0x18] sm:$0xff] }
 0x193   : >> { %3796 = vmatprep.subr.bf16.mxu1 %v6289_v17 }
 0x194   : >> { %v3800_v49 = vpack.c.bf16 %v4170_v40, %v4169_v46 }
 0x195   : >> { %v4173_v48 = vpop.permute.xlu0 %4172 }
 0x196   : >> { %v4175_v44 = vunpack.i.h.bf16 %v4173_v48  ;;  %v4174_v54 = vunpack.i.l.bf16 %v4173_v48  ;;  %3798 = vmatpush1.bf16.msra.mxu1 %v3797_v39 }
 0x197   : >> { %3799 = vmatprep.subr.bf16.mxu1 %v6289_v17 }
 0x198   : >> { %v3803_v58 = vpack.c.bf16 %v4175_v44, %v4174_v54 }
 0x199   : >> { %v4178_v55 = vpop.permute.xlu0 %4177 }
 0x19a   : >> { %v4180_v61 = vunpack.i.h.bf16 %v4178_v55  ;;  %v4179_v37 = vunpack.i.l.bf16 %v4178_v55  ;;  %3801 = vmatpush1.bf16.msra.mxu1 %v3800_v49 }
 0x19b   : >> { %3802 = vmatprep.subr.bf16.mxu1 %v6289_v17 }
 0x19c   : >> { %v3806_v20 = vpack.c.bf16 %v4180_v61, %v4179_v37 }
 0x19e   : >> { %3804 = vmatpush1.bf16.msra.mxu1 %v3803_v58 }
 0x19f   : >> { %3805 = vmatprep.subr.bf16.mxu1 %v6289_v17 }
 0x1a2   : >> { %3807 = vmatpush1.bf16.msra.mxu1 %v3806_v20 }
 0x1a3   : >> { %3808 = vmatprep.subr.bf16.mxu1 %v6289_v17 }
 0x229   : >> { %v987_v53 = vpop.f32.mrb[14].mxu0 }
 0x22a   : >> { %v989_v26 = vpop.f32.mrb[15].mxu0  ;;  %v5189_v31 = vadd.f32 %v987_v53, %v813_v23 }
 0x22b   : >> { %v5184_v28 = vadd.f32 %v989_v26, %v814_v22  ;;  %v818_v26 = vld [vmem:[%s6283_s6 + $0x28] sm:$0xff] }
 0x22d   : >> { %v993_v34 = vpop.f32.mrb[16].mxu0  ;;  %v1029_v36 = vsel %vm1028_vm4, %v5184_v28, -inf }
 0x22e   : >> { %v5196_v38 = vadd.f32 %v993_v34, %v815_v30  ;;  %v995_v39 = vpop.f32.mrb[17].mxu0  ;;  %v1030_v40 = vmax.f32 %v5189_v31, %v1029_v36  ;;  %v817_v30 = vld [vmem:[%s6283_s6 + $0x20] sm:$0xff]  ;;  %v820_v34 = vld [vmem:[%s6283_s6 + $0x38] sm:$0xff]  ;;  %v826_v36 = vld [vmem:[%s6283_s6 + $0x68] sm:$0xff] }
 0x22f   : >> { %v5199_v46 = vadd.f32 %v995_v39, %v816_v32 }
 0x230   : >> { %1031 = vmax.xlane.f32.xlu1 %v1030_v40  ;;  %v819_v40 = vld [vmem:[%s6283_s6 + $0x30] sm:$0xff] }
 0x231   : >> { %v1033_v48 = vsel %vm1028_vm4, %v5199_v46, -inf  ;;  %v999_v49 = vpop.f32.mrb[18].mxu0 }
 0x232   : >> { %v1034_v44 = vmax.f32 %v5196_v38, %v1033_v48  ;;  %v1001_v54 = vpop.f32.mrb[19].mxu0  ;;  %v5222_v39 = vadd.f32 %v999_v49, %v817_v30  ;;  %v822_v49 = vld [vmem:[%s6283_s6 + $0x48] sm:$0xff] }
 0x233   : >> { %v5214_v32 = vadd.f32 %v1001_v54, %v818_v26 }
 0x234   : >> { %1035 = vmax.xlane.f32.xlu0 %v1034_v44  ;;  %v825_v44 = vld [vmem:[%s6283_s6 + $0x60] sm:$0xff] }
 0x235   : >> { %v1005_v55 = vpop.f32.mrb[20].mxu0  ;;  %v1037_v26 = vsel %vm1028_vm4, %v5214_v32, -inf }
 0x236   : >> { %v1007_v58 = vpop.f32.mrb[21].mxu0  ;;  %v5239_v30 = vadd.f32 %v1005_v55, %v819_v40  ;;  %v824_v55 = vld [vmem:[%s6283_s6 + $0x58] sm:$0xff] }
 0x237   : >> { %v5227_v48 = vadd.f32 %v1007_v58, %v820_v34  ;;  %v1038_v58 = vmax.f32 %v5222_v39, %v1037_v26  ;;  %v821_v34 = vld [vmem:[%s6283_s6 + $0x40] sm:$0xff] }
 0x239   : >> { %v1011_v61 = vpop.f32.mrb[22].mxu0 }
 0x23a   : >> { %v1013_v37 = vpop.f32.mrb[23].mxu0 }
 0x23b   : >> { %v5247_v17 = vadd.f32 %v1013_v37, %v822_v49  ;;  %v823_v37 = vld [vmem:[%s6283_s6 + $0x50] sm:$0xff] }
 0x23d   : >> { %v1017_v20 = vpop.f32.mrb[24].mxu0  ;;  %v1045_v49 = vsel %vm1028_vm4, %v5247_v17, -inf }
 0x23e   : >> { %v1019_v22 = vpop.f32.mrb[25].mxu0  ;;  %v5267_v0 = vadd.f32 %v1017_v20, %v823_v37  ;;  %v5315_v20 = vpop.permute.xlu0 %4187 }
 0x23f   : >> { %v5263_v26 = vadd.f32 %v1019_v22, %v824_v55 }
 0x241   : >> { %4182 = vrot.lane.b32.xlu1 %v5020_v43, %s4709_s20  ;;  %v1023_v23 = vpop.f32.mrb[26].mxu0 }
 0x242   : >> { %v1025_v53 = vpop.f32.mrb[27].mxu0  ;;  %v5241_v19 = vadd.f32 %v1023_v23, %v825_v44  ;;  %v5256_v23 = vadd.f32 %v1011_v61, %v821_v34  ;;  %v5321_v22 = vpop.permute.xlu0 %4192 }
 0x243   : >> { %v5232_v54 = vadd.f32 %v1025_v53, %v826_v36  ;;  %v1041_v36 = vsel %vm1028_vm4, %v5227_v48, -inf }
 0x244   : >> { %v1042_v44 = vmax.f32 %v5239_v30, %v1041_v36  ;;  %v1046_v61 = vmax.f32 %v5256_v23, %v1045_v49 }
 0x245   : >> { %v1053_v53 = vsel %vm1028_vm4, %v5232_v54, -inf }
 0x246   : >> { %v1054_v40 = vmax.f32 %v5241_v19, %v1053_v53 }
 0x24a   : >> { %4197 = vrot.lane.b32.xlu0 %v5052_v25, %s4709_s20 }
 0x265   : >> { %1039 = vmax.xlane.f32.xlu1 %v1038_v58  ;;  %v1049_v58 = vsel %vm1028_vm4, %v5263_v26, -inf }
 0x266   : >> { %v1050_v34 = vmax.f32 %v5267_v0, %v1049_v58 }
 0x269   : >> { %1055 = vmax.xlane.f32.xlu0 %v1054_v40  ;;  %1043 = vmax.xlane.f32.xlu1 %v1042_v44 }
 0x26d   : >> { %1047 = vmax.xlane.f32.xlu1 %v1046_v61 }
 0x271   : >> { %1051 = vmax.xlane.f32.xlu1 %v1050_v34 }
 0x27f   : >> { %1351 = vrot.lane.b32.xlu0 %v5118_v63, %s4709_s20 }
 0x282   : >> { %4202 = vrot.lane.b32.xlu1 %v5058_v33, %s4709_s20 }
 0x283   : >> { %4222 = vrot.lane.b32.xlu0 %v4978_v57, %s4710_s21 }
 0x286   : >> { %4207 = vrot.lane.b32.xlu1 %v5067_v41, %s4709_s20 }
 0x287   : >> { %4232 = vrot.lane.b32.xlu0 %v4997_v27, %s4710_s21 }
 0x28a   : >> { %4212 = vrot.lane.b32.xlu1 %v5073_v50, %s4709_s20 }
 0x28b   : >> { %4242 = vrot.lane.b32.xlu0 %v5020_v43, %s4710_s21 }
 0x28e   : >> { %4217 = vrot.lane.b32.xlu1 %v5082_v59, %s4709_s20 }
 0x28f   : >> { %4252 = vrot.lane.b32.xlu0 %v5041_v62, %s4710_s21 }
 0x292   : >> { %1349 = vrot.lane.b32.xlu1 %v5112_v52, %s4709_s20 }
 0x293   : >> { %4257 = vrot.lane.b32.xlu0 %v5052_v25, %s4710_s21 }
 0x296   : >> { %1353 = vrot.lane.b32.xlu1 %v5125_v18, %s4709_s20 }
 0x297   : >> { %4262 = vrot.lane.b32.xlu0 %v5058_v33, %s4710_s21 }
 0x29a   : >> { %1355 = vrot.lane.b32.xlu1 %v5132_v60, %s4709_s20 }
 0x29b   : >> { %4267 = vrot.lane.b32.xlu0 %v5067_v41, %s4710_s21 }
 0x29e   : >> { %1357 = vrot.lane.b32.xlu1 %v5139_v21, %s4709_s20 }
 0x29f   : >> { %4272 = vrot.lane.b32.xlu0 %v5073_v50, %s4710_s21 }
 0x2a2   : >> { %1359 = vrot.lane.b32.xlu1 %v5146_v29, %s4709_s20 }
 0x2a3   : >> { %4277 = vrot.lane.b32.xlu0 %v5082_v59, %s4710_s21 }
 0x2a6   : >> { %1361 = vrot.lane.b32.xlu1 %v5153_v45, %s4709_s20  ;;  %s4712_s20 = smov 80  }
 0x2a7   : >> { %4282 = vrot.lane.b32.xlu0 %v4978_v57, %s4711_s22 }
 0x2aa   : >> { %4227 = vrot.lane.b32.xlu1 %v4989_v16, %s4710_s21 }
 0x2ab   : >> { %4287 = vrot.lane.b32.xlu0 %v4989_v16, %s4711_s22 }
 0x2ae   : >> { %4237 = vrot.lane.b32.xlu1 %v5010_v35, %s4710_s21 }
 0x2af   : >> { %4292 = vrot.lane.b32.xlu0 %v4997_v27, %s4711_s22 }
 0x2b2   : >> { %4247 = vrot.lane.b32.xlu1 %v5031_v51, %s4710_s21 }
 0x2b3   : >> { %4297 = vrot.lane.b32.xlu0 %v5010_v35, %s4711_s22 }
 0x2b7   : >> { %4307 = vrot.lane.b32.xlu0 %v5031_v51, %s4711_s22 }
 0x2bb   : >> { %4312 = vrot.lane.b32.xlu0 %v5041_v62, %s4711_s22 }
 0x2bd   : >> { %v1032_v53 = vpop.xlane.xlu1 %1031 }
 0x2be   : >> { %v1057_v36 = vsub.f32 %v5189_v31, %v1032_v53  ;;  %v1058_v55 = vsub.f32 %v5184_v28, %v1032_v53  ;;  %v3809_v28 = vpack.c.bf16 %v4110_v1, %v4109_v2 }
 0x2c0   : >> { %v1071_v40 = vmul.f32 1.442695, %v1057_v36  ;;  %v1073_v44 = vmul.f32 1.442695, %v1058_v55  ;;  %v6321_v55 = vmov 0.0|0.0  }
 0x2c1   : >> { %v1036_v37 = vpop.xlane.xlu0 %1035 }
 0x2c2   : >> { %4521 = vpow2.f32 %v1071_v40  ;;  %v1059_v49 = vsub.f32 %v5196_v38, %v1036_v37  ;;  %v1060_v61 = vsub.f32 %v5199_v46, %v1036_v37  ;;  %v4120_v40 = vunpack.i.h.bf16 %v5161_v15 }
 0x2c3   : >> { %4523 = vpow2.f32 %v1073_v44  ;;  %v4130_v44 = vunpack.i.h.bf16 %v5164_v42  ;;  %v4129_v37 = vunpack.i.l.bf16 %v5164_v42  ;;  %v4140_v15 = vunpack.i.h.bf16 %v5167_v47 }
 0x2c4   : >> { %v1075_v58 = vmul.f32 1.442695, %v1059_v49  ;;  %v1077_v34 = vmul.f32 1.442695, %v1060_v61  ;;  %v4139_v61 = vunpack.i.l.bf16 %v5167_v47 }
 0x2c5   : >> { %v3817_v49 = vpack.c.bf16 %v4130_v44, %v4129_v37  ;;  %v5360_v47 = vpop.permute.xlu0 %4197 }
 0x2c6   : >> { %4525 = vpow2.f32 %v1075_v58  ;;  %v3821_v58 = vpack.c.bf16 %v4140_v15, %v4139_v61 }
 0x2c7   : >> { %4527 = vpow2.f32 %v1077_v34  ;;  %v4183_v34 = vpop.permute.xlu1 %4182 }
 0x2cc   : >> { %v4522_v31 = vpop.eup %4521 }
 0x2cd   : >> { %v4524_v3 = vpop.eup %4523 }
 0x2ce   : >> { %3385 = vmatprep.mubr.msk.f32.mxu1 %vm1028_vm4, %v4524_v3  ;;  %v1099_v53 = vsel %vm1028_vm4, %v4524_v3, 0.0  ;;  %v3813_v3 = vpack.c.bf16 %v4120_v40, %v4119_v24 }
 0x2cf   : >> { %1285 = vmatmul.mubr.f32.vlgmr.msra.gmra.mrb[24].mxu1 %v4522_v31  ;;  %v5331_v38 = vadd.f32 %v4522_v31, %v1099_v53  ;;  %v4185_v31 = vunpack.i.h.bf16 %v4183_v34  ;;  %v4190_v53 = vunpack.i.h.bf16 %v5315_v20 }
 0x2d0   : >> { %v4526_v46 = vpop.eup %4525  ;;  %3811 = vmatpush1.bf16.xpose.msk.msra.mxu1 %vm4974_vm3, %v3809_v28  ;;  %v4184_v28 = vunpack.i.l.bf16 %v4183_v34 }
 0x2d1   : >> { %v4528_v36 = vpop.eup %4527  ;;  %3812 = vmatprep.subr.bf16.mxu1 %v6321_v55 }
 0x2d2   : >> { %3386 = vmatprep.mubr.msk.f32.mxu1 %vm1028_vm4, %v4528_v36  ;;  %v1103_v1 = vsel %vm1028_vm4, %v4528_v36, 0.0  ;;  %v3825_v42 = vpack.c.bf16 %v4185_v31, %v4184_v28  ;;  %v4195_v31 = vunpack.i.h.bf16 %v5321_v22  ;;  %v4194_v28 = vunpack.i.l.bf16 %v5321_v22 }
 0x2d3   : >> { %1290 = vmatmul.mubr.f32.gmra.mrb[26].mxu1 %v4526_v46  ;;  %v5340_v2 = vadd.f32 %v4526_v46, %v1103_v1  ;;  %v4189_v46 = vunpack.i.l.bf16 %v5315_v20 }
 0x2d5   : >> { %v3829_v44 = vpack.c.bf16 %v4190_v53, %v4189_v46 }
 0x2d8   : >> { %3815 = vmatpush1.bf16.xpose.msk.msra.mxu1 %vm4974_vm3, %v3813_v3 }
 0x2d9   : >> { %3816 = vmatprep.subr.bf16.mxu1 %v6321_v55 }
 0x2e0   : >> { %3819 = vmatpush1.bf16.xpose.msk.msra.mxu1 %vm4974_vm3, %v3817_v49 }
 0x2e1   : >> { %3820 = vmatprep.subr.bf16.mxu1 %v6321_v55 }
 0x2e8   : >> { %3823 = vmatpush1.bf16.xpose.msk.msra.mxu1 %vm4974_vm3, %v3821_v58 }
 0x2e9   : >> { %3824 = vmatprep.subr.bf16.mxu1 %v6321_v55 }
 0x2f0   : >> { %3827 = vmatpush1.bf16.xpose.msk.msra.mxu1 %vm4974_vm3, %v3825_v42 }
 0x2f1   : >> { %3828 = vmatprep.subr.bf16.mxu1 %v6321_v55 }
 0x2f2   : >> { %v1040_v36 = vpop.xlane.xlu1 %1039 }
 0x2f3   : >> { %v1061_v40 = vsub.f32 %v5222_v39, %v1040_v36  ;;  %v1062_v24 = vsub.f32 %v5214_v32, %v1040_v36  ;;  %v3833_v36 = vpack.c.bf16 %v4195_v31, %v4194_v28 }
 0x2f5   : >> { %v1079_v1 = vmul.f32 1.442695, %v1061_v40  ;;  %v1081_v3 = vmul.f32 1.442695, %v1062_v24 }
 0x2f6   : >> { %v1056_v37 = vpop.xlane.xlu0 %1055  ;;  %v1044_v49 = vpop.xlane.xlu1 %1043 }
 0x2f7   : >> { %4529 = vpow2.f32 %v1079_v1  ;;  %v1069_v15 = vsub.f32 %v5241_v19, %v1056_v37  ;;  %v1070_v61 = vsub.f32 %v5232_v54, %v1056_v37  ;;  %v1063_v58 = vsub.f32 %v5239_v30, %v1044_v49 }
 0x2f8   : >> { %4531 = vpow2.f32 %v1081_v3  ;;  %v1064_v20 = vsub.f32 %v5227_v48, %v1044_v49  ;;  %3831 = vmatpush1.bf16.xpose.msk.msra.mxu1 %vm4974_vm3, %v3829_v44 }
 0x2f9   : >> { %v1095_v39 = vmul.f32 1.442695, %v1069_v15  ;;  %v1097_v32 = vmul.f32 1.442695, %v1070_v61  ;;  %v1083_v34 = vmul.f32 1.442695, %v1063_v58  ;;  %3832 = vmatprep.subr.bf16.mxu1 %v6321_v55  ;;  %v4200_v15 = vunpack.i.h.bf16 %v5360_v47 }
 0x2fa   : >> { %v1085_v19 = vmul.f32 1.442695, %v1064_v20  ;;  %v5373_v42 = vpop.permute.xlu0 %1351  ;;  %v1048_v54 = vpop.xlane.xlu1 %1047  ;;  %v4199_v61 = vunpack.i.l.bf16 %v5360_v47 }
 0x2fb   : >> { %4533 = vpow2.f32 %v1095_v39  ;;  %v1065_v30 = vsub.f32 %v5256_v23, %v1048_v54  ;;  %v1066_v48 = vsub.f32 %v5247_v17, %v1048_v54 }
 0x2fc   : >> { %4535 = vpow2.f32 %v1097_v32 }
 0x2fd   : >> { %4537 = vpow2.f32 %v1083_v34  ;;  %v1087_v53 = vmul.f32 1.442695, %v1065_v30  ;;  %v1089_v46 = vmul.f32 1.442695, %v1066_v48  ;;  %v3837_v34 = vpack.c.bf16 %v4200_v15, %v4199_v61 }
 0x2fe   : >> { %4539 = vpow2.f32 %v1085_v19  ;;  %v4223_v40 = vpop.permute.xlu0 %4222  ;;  %v1052_v24 = vpop.xlane.xlu1 %1051 }
 0x2ff   : >> { %4541 = vpow2.f32 %v1087_v53  ;;  %v4225_v1 = vunpack.i.h.bf16 %v4223_v40  ;;  %v4224_v22 = vunpack.i.l.bf16 %v4223_v40  ;;  %v1067_v3 = vsub.f32 %v5267_v0, %v1052_v24 }
 0x300   : >> { %4543 = vpow2.f32 %v1089_v46  ;;  %v1068_v44 = vsub.f32 %v5263_v26, %v1052_v24  ;;  %3835 = vmatpush1.bf16.xpose.msk.msra.mxu1 %vm4974_vm3, %v3833_v36 }
 0x301   : >> { %v4530_v17 = vpop.eup %4529  ;;  %v3857_v23 = vpack.c.bf16 %v4225_v1, %v4224_v22  ;;  %v1091_v37 = vmul.f32 1.442695, %v1067_v3  ;;  %3836 = vmatprep.subr.bf16.mxu1 %v6321_v55 }
 0x302   : >> { %v4532_v49 = vpop.eup %4531  ;;  %v1093_v58 = vmul.f32 1.442695, %v1068_v44  ;;  %v4203_v20 = vpop.permute.xlu1 %4202 }
 0x303   : >> { %4545 = vpow2.f32 %v1091_v37  ;;  %3387 = vmatprep.mubr.msk.f32.mxu1 %vm1028_vm4, %v4532_v49  ;;  %3858 = vmatpush1.bf16.msra.mxu0 %v3857_v23  ;;  %v1107_v0 = vsel %vm1028_vm4, %v4532_v49, 0.0  ;;  %v4205_v46 = vunpack.i.h.bf16 %v4203_v20  ;;  %v4204_v36 = vunpack.i.l.bf16 %v4203_v20 }
 0x304   : >> { %4547 = vpow2.f32 %v1093_v58  ;;  %1295 = vmatmul.mubr.f32.gmra.mrb[28].mxu1 %v4530_v17  ;;  %3859 = vmatprep.subr.bf16.mxu0 %v6321_v55  ;;  %v5387_v39 = vadd.f32 %v4530_v17, %v1107_v0 }
 0x305   : >> { %v4534_v26 = vpop.eup %4533  ;;  %v3841_v17 = vpack.c.bf16 %v4205_v46, %v4204_v36 }
 0x306   : >> { %v4536_v32 = vpop.eup %4535  ;;  %v4208_v31 = vpop.permute.xlu1 %4207 }
 0x307   : >> { %v4538_v28 = vpop.eup %4537  ;;  %v1123_v19 = vsel %vm1028_vm4, %v4536_v32, 0.0  ;;  %v4210_v15 = vunpack.i.h.bf16 %v4208_v31  ;;  %v4209_v61 = vunpack.i.l.bf16 %v4208_v31 }
 0x308   : >> { %v4540_v47 = vpop.eup %4539  ;;  %3839 = vmatpush1.bf16.xpose.msk.msra.mxu1 %vm4974_vm3, %v3837_v34  ;;  %v5394_v30 = vadd.f32 %v4534_v26, %v1123_v19  ;;  %v6322_v34 = vmov 0.0  }
 0x309   : >> { %v4542_v54 = vpop.eup %4541  ;;  %3388 = vmatprep.mubr.msk.f32.mxu1 %vm1028_vm4, %v4540_v47  ;;  %3840 = vmatprep.subr.bf16.mxu1 %v6321_v55  ;;  %v1111_v48 = vsel %vm1028_vm4, %v4540_v47, 0.0  ;;  %v3845_v20 = vpack.c.bf16 %v4210_v15, %v4209_v61 }
 0x30a   : >> { %v4544_v53 = vpop.eup %4543  ;;  %1300 = vmatmul.mubr.f32.gmra.mrb[30].mxu1 %v4538_v28  ;;  %v4213_v40 = vpop.permute.xlu1 %4212  ;;  %v5397_v24 = vadd.f32 %v4538_v28, %v1111_v48 }
 0x30b   : >> { %3389 = vmatprep.mubr.msk.f32.mxu1 %vm1028_vm4, %v4544_v53  ;;  %v1115_v1 = vsel %vm1028_vm4, %v4544_v53, 0.0  ;;  %v4215_v28 = vunpack.i.h.bf16 %v4213_v40  ;;  %v4214_v47 = vunpack.i.l.bf16 %v4213_v40  ;;  %v4233_v53 = vpop.permute.xlu0 %4232 }
 0x30c   : >> { %v5401_v3 = vadd.f32 %v4542_v54, %v1115_v1 }
 0x30d   : >> { %v4546_v22 = vpop.eup %4545 }
 0x30e   : >> { %v4548_v44 = vpop.eup %4547  ;;  %1305 = vmatmul.mubr.f32.gmra.mrb[32].mxu1 %v4542_v54  ;;  %v4218_v23 = vpop.permute.xlu1 %4217  ;;  %v3849_v54 = vpack.c.bf16 %v4215_v28, %v4214_v47 }
 0x30f   : >> { %3390 = vmatprep.mubr.msk.f32.mxu1 %vm1028_vm4, %v4548_v44  ;;  %v1119_v37 = vsel %vm1028_vm4, %v4548_v44, 0.0  ;;  %v4243_v40 = vpop.permute.xlu0 %4242 }
 0x310   : >> { %3843 = vmatpush1.bf16.xpose.msk.msra.mxu1 %vm4974_vm3, %v3841_v17  ;;  %v5408_v49 = vadd.f32 %v4546_v22, %v1119_v37  ;;  %v4235_v17 = vunpack.i.h.bf16 %v4233_v53  ;;  %v4234_v37 = vunpack.i.l.bf16 %v4233_v53 }
 0x311   : >> { %3844 = vmatprep.subr.bf16.mxu1 %v6321_v55 }
 0x312   : >> { %1310 = vmatmul.mubr.f32.gmra.mrb[34].mxu1 %v4546_v22  ;;  %v1350_v58 = vpop.permute.xlu1 %1349 }
 0x313   : >> { %3391 = vmatprep.mubr.msk.f32.mxu1 %vm1028_vm4, %v4536_v32  ;;  %v4220_v32 = vunpack.i.h.bf16 %v4218_v23 }
 0x316   : >> { %1315 = vmatmul.mubr.f32.gmra.mrb[36].mxu1 %v4534_v26  ;;  %v1354_v0 = vpop.permute.xlu1 %1353  ;;  %v4219_v26 = vunpack.i.l.bf16 %v4218_v23  ;;  %v4253_v23 = vpop.permute.xlu0 %4252 }
 0x317   : >> { %1537 = vmatprep.mubr.f32.mxu1 %v6322_v34 }
 0x318   : >> { %3847 = vmatpush1.bf16.xpose.msk.msra.mxu1 %vm4974_vm3, %v3845_v20  ;;  %v3853_v46 = vpack.c.bf16 %v4220_v32, %v4219_v26  ;;  %v3863_v20 = vpack.c.bf16 %v4235_v17, %v4234_v37  ;;  %v4244_v32 = vunpack.i.l.bf16 %v4243_v40 }
 0x319   : >> { %3848 = vmatprep.subr.bf16.mxu1 %v6321_v55 }
 0x31a   : >> { %v1356_v19 = vpop.permute.xlu1 %1355  ;;  %v4258_v26 = vpop.permute.xlu0 %4257 }
 0x31b   : >> { %v4260_v37 = vunpack.i.h.bf16 %v4258_v26 }
 0x31e   : >> { %v1358_v48 = vpop.permute.xlu1 %1357 }
 0x320   : >> { %3851 = vmatpush1.bf16.xpose.msk.msra.mxu1 %vm4974_vm3, %v3849_v54  ;;  %v4245_v54 = vunpack.i.h.bf16 %v4243_v40  ;;  %v4255_v40 = vunpack.i.h.bf16 %v4253_v23 }
 0x321   : >> { %3852 = vmatprep.subr.bf16.mxu1 %v6321_v55 }
 0x322   : >> { %v1360_v31 = vpop.permute.xlu1 %1359 }
 0x326   : >> { %v1362_v36 = vpop.permute.xlu1 %1361 }
 0x328   : >> { %3855 = vmatpush1.bf16.xpose.msk.msra.mxu1 %vm4974_vm3, %v3853_v46  ;;  %v3869_v46 = vpack.c.bf16 %v4245_v54, %v4244_v32 }
 0x329   : >> { %3940 = vmatprep.subr.bf16.mxu1 %v6321_v55 }
 0x32a   : >> { %v4228_v1 = vpop.permute.xlu1 %4227 }
 0x32b   : >> { %v4230_v22 = vunpack.i.h.bf16 %v4228_v1  ;;  %v4229_v44 = vunpack.i.l.bf16 %v4228_v1 }
 0x32d   : >> { %v3860_v15 = vpack.c.bf16 %v4230_v22, %v4229_v44  ;;  %v4263_v22 = vpop.permute.xlu0 %4262  ;;  %v4254_v44 = vunpack.i.l.bf16 %v4253_v23 }
 0x32e   : >> { %v4238_v61 = vpop.permute.xlu1 %4237  ;;  %v4265_v23 = vunpack.i.h.bf16 %v4263_v22 }
 0x32f   : >> { %3430 = vmatmul.mubr.msk.f32.vlgmr.msra.gmra.mrb[38].mxu1 %vm827_vm2, %v1350_v58  ;;  %3861 = vmatpush1.bf16.msra.mxu0 %v3860_v15  ;;  %v4240_v28 = vunpack.i.h.bf16 %v4238_v61  ;;  %v4239_v47 = vunpack.i.l.bf16 %v4238_v61  ;;  %v4259_v15 = vunpack.i.l.bf16 %v4258_v26 }
 0x330   : >> { %1543 = vmatprep.mubr.f32.mxu1 %v6322_v34  ;;  %3862 = vmatprep.subr.bf16.mxu0 %v6321_v55 }
 0x331   : >> { %v3866_v58 = vpack.c.bf16 %v4240_v28, %v4239_v47  ;;  %v3878_v61 = vpack.c.bf16 %v4260_v37, %v4259_v15 }
 0x332   : >> { %v4248_v53 = vpop.permute.xlu1 %4247 }
 0x333   : >> { %3431 = vmatmul.mubr.msk.f32.gmra.mrb[40].mxu1 %vm827_vm2, %v5373_v42  ;;  %3864 = vmatpush1.bf16.msra.mxu0 %v3863_v20  ;;  %v4250_v1 = vunpack.i.h.bf16 %v4248_v53  ;;  %v4249_v42 = vunpack.i.l.bf16 %v4248_v53  ;;  %v4264_v20 = vunpack.i.l.bf16 %v4263_v22 }
 0x334   : >> { %1549 = vmatprep.mubr.f32.mxu1 %v6322_v34  ;;  %3865 = vmatprep.subr.bf16.mxu0 %v6321_v55 }
 0x335   : >> { %v3872_v17 = vpack.c.bf16 %v4250_v1, %v4249_v42  ;;  %v3881_v28 = vpack.c.bf16 %v4265_v23, %v4264_v20 }
 0x337   : >> { %3432 = vmatmul.mubr.msk.f32.gmra.mrb[42].mxu1 %vm827_vm2, %v1354_v0  ;;  %3867 = vmatpush1.bf16.msra.mxu0 %v3866_v58  ;;  %v3875_v0 = vpack.c.bf16 %v4255_v40, %v4254_v44 }
 0x338   : >> { %1555 = vmatprep.mubr.f32.mxu1 %v6322_v34  ;;  %3868 = vmatprep.subr.bf16.mxu0 %v6321_v55 }
 0x33b   : >> { %3433 = vmatmul.mubr.msk.f32.gmra.mrb[44].mxu1 %vm827_vm2, %v1356_v19  ;;  %3870 = vmatpush1.bf16.msra.mxu0 %v3869_v46  ;;  %v4268_v19 = vpop.permute.xlu0 %4267 }
 0x33c   : >> { %1561 = vmatprep.mubr.f32.mxu1 %v6322_v34  ;;  %3871 = vmatprep.subr.bf16.mxu0 %v6321_v55  ;;  %v4270_v47 = vunpack.i.h.bf16 %v4268_v19  ;;  %v4269_v54 = vunpack.i.l.bf16 %v4268_v19 }
 0x33f   : >> { %3434 = vmatmul.mubr.msk.f32.gmra.mrb[46].mxu1 %vm827_vm2, %v1358_v48  ;;  %3873 = vmatpush1.bf16.msra.mxu0 %v3872_v17  ;;  %v4273_v48 = vpop.permute.xlu0 %4272 }
 0x340   : >> { %1567 = vmatprep.mubr.f32.mxu1 %v6322_v34  ;;  %3874 = vmatprep.subr.bf16.mxu0 %v6321_v55  ;;  %v4275_v32 = vunpack.i.h.bf16 %v4273_v48  ;;  %v4274_v58 = vunpack.i.l.bf16 %v4273_v48 }
 0x342   : >> { %v3887_v53 = vpack.c.bf16 %v4275_v32, %v4274_v58 }
 0x343   : >> { %3435 = vmatmul.mubr.msk.f32.gmra.mrb[48].mxu1 %vm827_vm2, %v1360_v31  ;;  %3876 = vmatpush1.bf16.msra.mxu0 %v3875_v0  ;;  %v3884_v31 = vpack.c.bf16 %v4270_v47, %v4269_v54  ;;  %v4278_v26 = vpop.permute.xlu0 %4277  ;;  %v3393_v47 = vld [vmem:[%s6283_s6 + $0x78] sm:$0xff]  ;;  %v3392_v54 = vld [vmem:[%s6283_s6 + $0x70] sm:$0xff] }
 0x344   : >> { %1573 = vmatprep.mubr.f32.mxu1 %v6322_v34  ;;  %3877 = vmatprep.subr.bf16.mxu0 %v6321_v55  ;;  %v4280_v46 = vunpack.i.h.bf16 %v4278_v26 }
 0x347   : >> { %3436 = vmatmul.mubr.msk.f32.gmra.mrb[50].mxu1 %vm827_vm2, %v1362_v36  ;;  %3879 = vmatpush1.bf16.msra.mxu0 %v3878_v61  ;;  %v4279_v36 = vunpack.i.l.bf16 %v4278_v26 }
 0x348   : >> { %3880 = vmatprep.subr.bf16.mxu0 %v6321_v55 }
 0x349   : >> { %v3890_v1 = vpack.c.bf16 %v4280_v46, %v4279_v36  ;;  %v3394_v46 = vld [vmem:[%s6283_s6 + $0x80] sm:$0xff] }
 0x34b   : >> { %3882 = vmatpush1.bf16.msra.mxu0 %v3881_v28 }
 0x34c   : >> { %3883 = vmatprep.subr.bf16.mxu0 %v6321_v55 }
 0x34f   : >> { %3885 = vmatpush1.bf16.msra.mxu0 %v3884_v31 }
 0x350   : >> { %3886 = vmatprep.subr.bf16.mxu0 %v6321_v55 }
 0x353   : >> { %3888 = vmatpush1.bf16.msra.mxu0 %v3887_v53  ;;  %v3395_v53 = vld [vmem:[%s6283_s6 + $0x88] sm:$0xff] }
 0x354   : >> { %3889 = vmatprep.subr.bf16.mxu0 %v6321_v55 }
 0x357   : >> { %3891 = vmatpush1.bf16.msra.mxu0 %v3890_v1 }
 0x358   : >> { %3892 = vmatprep.subr.bf16.mxu0 %v6321_v55 }
 0x3a2   : >> { %v5446_v42 = vpop.f32.mrb[24].mxu1 }
 0x3a3   : >> { %6323 = vst [vmem:[#allocation17_spill] sm:$0xff] %v5446_v42  ;;  %v1288_v22 = vpop.f32.mrb[25].mxu1 }
 0x3a6   : >> { %v5448_v40 = vpop.f32.mrb[26].mxu1 }
 0x3a7   : >> { %6324 = vst [vmem:[#allocation18_spill] sm:$0xff] %v5448_v40  ;;  %v1293_v44 = vpop.f32.mrb[27].mxu1 }
 0x3d7   : >> { %v5450_v17 = vpop.f32.mrb[28].mxu1 }
 0x3d8   : >> { %6325 = vst [vmem:[#allocation19_spill] sm:$0xff] %v5450_v17  ;;  %v1298_v0 = vpop.f32.mrb[29].mxu1 }
 0x3dd   : >> { %v5452_v37 = vpop.f32.mrb[30].mxu1 }
 0x3de   : >> { %6326 = vst [vmem:[#allocation20_spill] sm:$0xff] %v5452_v37  ;;  %v1303_v15 = vpop.f32.mrb[31].mxu1 }
 0x3e1   : >> { %v5454_v19 = vpop.f32.mrb[32].mxu1 }
 0x3e2   : >> { %6327 = vst [vmem:[#allocation21_spill] sm:$0xff] %v5454_v19  ;;  %v1308_v61 = vpop.f32.mrb[33].mxu1 }
 0x3e5   : >> { %v5456_v23 = vpop.f32.mrb[34].mxu1 }
 0x3e6   : >> { %6328 = vst [vmem:[#allocation22_spill] sm:$0xff] %v5456_v23  ;;  %v1313_v20 = vpop.f32.mrb[35].mxu1 }
 0x3e9   : >> { %v5458_v48 = vpop.f32.mrb[36].mxu1 }
 0x3ea   : >> { %6329 = vst [vmem:[#allocation23_spill] sm:$0xff] %v5458_v48  ;;  %v1318_v28 = vpop.f32.mrb[37].mxu1 }
 0x402   : >> { %v1539_v31 = vpop.f32.mrb[38].mxu1 }
 0x403   : >> { %v1541_v32 = vpop.f32.mrb[39].mxu1  ;;  %v5468_v26 = vadd.f32 %v3392_v54, %v1539_v31 }
 0x404   : >> { %v5466_v58 = vadd.f32 %v3393_v47, %v1541_v32 }
 0x406   : >> { %v1545_v36 = vpop.f32.mrb[40].mxu1  ;;  %v1580_v1 = vsel %vm1028_vm4, %v5466_v58, -inf }
 0x407   : >> { %v1547_v22 = vpop.f32.mrb[41].mxu1  ;;  %v1581_v44 = vmax.f32 %v5468_v26, %v1580_v1  ;;  %v5481_v15 = vadd.f32 %v3394_v46, %v1545_v36  ;;  %v3397_v46 = vld [vmem:[%s6283_s6 + $0x98] sm:$0xff] }
 0x408   : >> { %v5479_v0 = vadd.f32 %v3395_v53, %v1547_v22  ;;  %v3399_v22 = vld [vmem:[%s6283_s6 + $0xa8] sm:$0xff] }
 0x409   : >> { %1582 = vmax.xlane.f32.xlu1 %v1581_v44  ;;  %v3405_v44 = vld [vmem:[%s6283_s6 + $0xd8] sm:$0xff] }
 0x40a   : >> { %v1551_v61 = vpop.f32.mrb[42].mxu1  ;;  %v1584_v20 = vsel %vm1028_vm4, %v5479_v0, -inf }
 0x40b   : >> { %v1553_v28 = vpop.f32.mrb[43].mxu1  ;;  %v1585_v47 = vmax.f32 %v5481_v15, %v1584_v20  ;;  %v3396_v20 = vld [vmem:[%s6283_s6 + $0x90] sm:$0xff] }
 0x40c   : >> { %v5493_v36 = vadd.f32 %v3397_v46, %v1553_v28  ;;  %v5510_v46 = vadd.f32 %v3396_v20, %v1551_v61 }
 0x40d   : >> { %1586 = vmax.xlane.f32.xlu0 %v1585_v47 }
 0x40e   : >> { %v1557_v54 = vpop.f32.mrb[44].mxu1  ;;  %v1588_v28 = vsel %vm1028_vm4, %v5493_v36, -inf }
 0x40f   : >> { %v1559_v31 = vpop.f32.mrb[45].mxu1  ;;  %v5528_v20 = vadd.f32 %v3398_v9, %v1557_v54 }
 0x410   : >> { %v5504_v47 = vadd.f32 %v3399_v22, %v1559_v31  ;;  %v3404_v31 = vld [vmem:[%s6283_s6 + $0xd0] sm:$0xff] }
 0x412   : >> { %v1563_v32 = vpop.f32.mrb[46].mxu1 }
 0x413   : >> { %v1565_v4 = vpop.f32.mrb[47].mxu1 }
 0x414   : >> { %v5522_v22 = vadd.f32 %v3401_v8, %v1565_v4  ;;  %v3400_v4 = vld [vmem:[%s6283_s6 + $0xb0] sm:$0xff] }
 0x415   : >> { %v5544_v54 = vadd.f32 %v3400_v4, %v1563_v32 }
 0x416   : >> { %v1569_v5 = vpop.f32.mrb[48].mxu1  ;;  %v1596_v9 = vsel %vm1028_vm4, %v5522_v22, -inf }
 0x417   : >> { %v1571_v6 = vpop.f32.mrb[49].mxu1 }
 0x418   : >> { %v5540_v23 = vadd.f32 %v3403_v14, %v1571_v6 }
 0x41a   : >> { %v1575_v1 = vpop.f32.mrb[50].mxu1  ;;  %4302 = vrot.lane.b32.xlu1 %v5020_v43, %s4711_s22 }
 0x41b   : >> { %v1577_v53 = vpop.f32.mrb[51].mxu1  ;;  %v5533_v48 = vadd.f32 %v3404_v31, %v1575_v1  ;;  %v3402_v1 = vld [vmem:[%s6283_s6 + $0xc0] sm:$0xff]  ;;  %v1597_v31 = vmax.f32 %v5544_v54, %v1596_v9 }
 0x41c   : >> { %v5506_v7 = vadd.f32 %v3405_v44, %v1577_v53  ;;  %v1589_v53 = vmax.f32 %v5510_v46, %v1588_v28  ;;  %v1592_v44 = vsel %vm1028_vm4, %v5504_v47, -inf }
 0x41d   : >> { %v1593_v28 = vmax.f32 %v5528_v20, %v1592_v44 }
 0x41e   : >> { %v1604_v61 = vsel %vm1028_vm4, %v5506_v7, -inf }
 0x41f   : >> { %v1605_v8 = vmax.f32 %v5533_v48, %v1604_v61  ;;  %v5552_v61 = vadd.f32 %v3402_v1, %v1569_v5  ;;  %v4283_v5 = vpop.permute.xlu0 %4282 }
 0x420   : >> { %v4285_v42 = vunpack.i.h.bf16 %v4283_v5  ;;  %v4284_v13 = vunpack.i.l.bf16 %v4283_v5 }
 0x423   : >> { %4317 = vrot.lane.b32.xlu0 %v5052_v25, %s4711_s22  ;;  %v4288_v14 = vpop.permute.xlu0 %4287 }
 0x427   : >> { %v4293_v32 = vpop.permute.xlu0 %4292 }
 0x42b   : >> { %v4298_v44 = vpop.permute.xlu0 %4297 }
 0x42c   : >> { %v4300_v5 = vunpack.i.h.bf16 %v4298_v44 }
 0x42f   : >> { %v5597_v4 = vpop.permute.xlu0 %4307 }
 0x43e   : >> { %1590 = vmax.xlane.f32.xlu1 %v1589_v53  ;;  %v1600_v53 = vsel %vm1028_vm4, %v5540_v23, -inf }
 0x43f   : >> { %v1601_v6 = vmax.f32 %v5552_v61, %v1600_v53 }
 0x442   : >> { %1606 = vmax.xlane.f32.xlu0 %v1605_v8  ;;  %1594 = vmax.xlane.f32.xlu1 %v1593_v28  ;;  %v5603_v8 = vpop.permute.xlu0 %4312 }
 0x446   : >> { %1598 = vmax.xlane.f32.xlu1 %v1597_v31 }
 0x44a   : >> { %1602 = vmax.xlane.f32.xlu1 %v1601_v6 }
 0x458   : >> { %1902 = vrot.lane.b32.xlu0 %v5118_v63, %s4711_s22 }
 0x45b   : >> { %4322 = vrot.lane.b32.xlu1 %v5058_v33, %s4711_s22 }
 0x45c   : >> { %4342 = vrot.lane.b32.xlu0 %v4978_v57, %s4712_s20 }
 0x45f   : >> { %4327 = vrot.lane.b32.xlu1 %v5067_v41, %s4711_s22 }
 0x460   : >> { %4352 = vrot.lane.b32.xlu0 %v4997_v27, %s4712_s20 }
 0x463   : >> { %4332 = vrot.lane.b32.xlu1 %v5073_v50, %s4711_s22 }
 0x464   : >> { %4362 = vrot.lane.b32.xlu0 %v5020_v43, %s4712_s20 }
 0x467   : >> { %4337 = vrot.lane.b32.xlu1 %v5082_v59, %s4711_s22 }
 0x468   : >> { %4372 = vrot.lane.b32.xlu0 %v5041_v62, %s4712_s20 }
 0x46b   : >> { %1900 = vrot.lane.b32.xlu1 %v5112_v52, %s4711_s22 }
 0x46c   : >> { %4377 = vrot.lane.b32.xlu0 %v5052_v25, %s4712_s20 }
 0x46f   : >> { %1904 = vrot.lane.b32.xlu1 %v5125_v18, %s4711_s22 }
 0x470   : >> { %4382 = vrot.lane.b32.xlu0 %v5058_v33, %s4712_s20 }
 0x473   : >> { %1906 = vrot.lane.b32.xlu1 %v5132_v60, %s4711_s22 }
 0x474   : >> { %4387 = vrot.lane.b32.xlu0 %v5067_v41, %s4712_s20 }
 0x477   : >> { %1908 = vrot.lane.b32.xlu1 %v5139_v21, %s4711_s22 }
 0x478   : >> { %4392 = vrot.lane.b32.xlu0 %v5073_v50, %s4712_s20 }
 0x47b   : >> { %1910 = vrot.lane.b32.xlu1 %v5146_v29, %s4711_s22 }
 0x47c   : >> { %4397 = vrot.lane.b32.xlu0 %v5082_v59, %s4712_s20 }
 0x47f   : >> { %1912 = vrot.lane.b32.xlu1 %v5153_v45, %s4711_s22  ;;  %s4714_s22 = smov 72  }
 0x480   : >> { %4402 = vrot.lane.b32.xlu0 %v4978_v57, %s4713_s23 }
 0x483   : >> { %4347 = vrot.lane.b32.xlu1 %v4989_v16, %s4712_s20 }
 0x484   : >> { %4407 = vrot.lane.b32.xlu0 %v4989_v16, %s4713_s23 }
 0x487   : >> { %4357 = vrot.lane.b32.xlu1 %v5010_v35, %s4712_s20 }
 0x488   : >> { %4412 = vrot.lane.b32.xlu0 %v4997_v27, %s4713_s23 }
 0x48b   : >> { %4367 = vrot.lane.b32.xlu1 %v5031_v51, %s4712_s20 }
 0x48c   : >> { %4417 = vrot.lane.b32.xlu0 %v5010_v35, %s4713_s23 }
 0x490   : >> { %4427 = vrot.lane.b32.xlu0 %v5031_v51, %s4713_s23 }
 0x494   : >> { %4432 = vrot.lane.b32.xlu0 %v5041_v62, %s4713_s23 }
 0x496   : >> { %v1583_v28 = vpop.xlane.xlu1 %1582 }
 0x497   : >> { %v1608_v9 = vsub.f32 %v5468_v26, %v1583_v28  ;;  %v1609_v1 = vsub.f32 %v5466_v58, %v1583_v28  ;;  %v3893_v26 = vpack.c.bf16 %v4285_v42, %v4284_v13 }
 0x499   : >> { %v1622_v31 = vmul.f32 1.442695, %v1608_v9  ;;  %v1624_v53 = vmul.f32 1.442695, %v1609_v1 }
 0x49a   : >> { %v1587_v6 = vpop.xlane.xlu0 %1586  ;;  %v4303_v1 = vpop.permute.xlu1 %4302 }
 0x49b   : >> { %4549 = vpow2.f32 %v1622_v31  ;;  %v1610_v19 = vsub.f32 %v5481_v15, %v1587_v6  ;;  %v1611_v37 = vsub.f32 %v5479_v0, %v1587_v6  ;;  %v4305_v31 = vunpack.i.h.bf16 %v4303_v1 }
 0x49c   : >> { %4551 = vpow2.f32 %v1624_v53  ;;  %v4304_v53 = vunpack.i.l.bf16 %v4303_v1  ;;  %v4314_v1 = vunpack.i.l.bf16 %v5603_v8 }
 0x49d   : >> { %v1626_v17 = vmul.f32 1.442695, %v1610_v19  ;;  %v1628_v40 = vmul.f32 1.442695, %v1611_v37  ;;  %v4294_v37 = vunpack.i.l.bf16 %v4293_v32 }
 0x49e   : >> { %v3909_v6 = vpack.c.bf16 %v4305_v31, %v4304_v53 }
 0x49f   : >> { %4553 = vpow2.f32 %v1626_v17  ;;  %v4289_v17 = vunpack.i.l.bf16 %v4288_v14 }
 0x4a0   : >> { %4555 = vpow2.f32 %v1628_v40  ;;  %v4290_v40 = vunpack.i.h.bf16 %v4288_v14  ;;  %v4299_v14 = vunpack.i.l.bf16 %v4298_v44  ;;  %v5634_v44 = vpop.permute.xlu0 %4317 }
 0x4a2   : >> { %v3905_v9 = vpack.c.bf16 %v4300_v5, %v4299_v14 }
 0x4a5   : >> { %v4550_v12 = vpop.eup %4549 }
 0x4a6   : >> { %v4552_v11 = vpop.eup %4551 }
 0x4a7   : >> { %3437 = vmatprep.mubr.msk.f32.mxu0 %vm1028_vm4, %v4552_v11  ;;  %v1650_v58 = vsel %vm1028_vm4, %v4552_v11, 0.0  ;;  %v3897_v11 = vpack.c.bf16 %v4290_v40, %v4289_v17 }
 0x4a8   : >> { %1836 = vmatmul.mubr.f32.vlgmr.msra.gmra.mrb[28].mxu0 %v4550_v12  ;;  %v5611_v28 = vadd.f32 %v4550_v12, %v1650_v58  ;;  %v4295_v12 = vunpack.i.h.bf16 %v4293_v32  ;;  %v4310_v32 = vunpack.i.h.bf16 %v5597_v4 }
 0x4a9   : >> { %v4554_v15 = vpop.eup %4553  ;;  %3895 = vmatpush1.bf16.xpose.msk.msra.mxu0 %vm4974_vm3, %v3893_v26  ;;  %v4309_v26 = vunpack.i.l.bf16 %v5597_v4 }
 0x4aa   : >> { %v4556_v19 = vpop.eup %4555  ;;  %3896 = vmatprep.subr.bf16.mxu0 %v6321_v55  ;;  %v3901_v0 = vpack.c.bf16 %v4295_v12, %v4294_v37 }
 0x4ab   : >> { %3438 = vmatprep.mubr.msk.f32.mxu0 %vm1028_vm4, %v4556_v19  ;;  %v1654_v13 = vsel %vm1028_vm4, %v4556_v19, 0.0 }
 0x4ac   : >> { %1841 = vmatmul.mubr.f32.gmra.mrb[30].mxu0 %v4554_v15  ;;  %v5618_v42 = vadd.f32 %v4554_v15, %v1654_v13  ;;  %v3913_v13 = vpack.c.bf16 %v4310_v32, %v4309_v26 }
 0x4b1   : >> { %3899 = vmatpush1.bf16.xpose.msk.msra.mxu0 %vm4974_vm3, %v3897_v11 }
 0x4b2   : >> { %3900 = vmatprep.subr.bf16.mxu0 %v6321_v55 }
 0x4b9   : >> { %3903 = vmatpush1.bf16.xpose.msk.msra.mxu0 %vm4974_vm3, %v3901_v0 }
 0x4ba   : >> { %3904 = vmatprep.subr.bf16.mxu0 %v6321_v55 }
 0x4c1   : >> { %3907 = vmatpush1.bf16.xpose.msk.msra.mxu0 %vm4974_vm3, %v3905_v9  ;;  %v4315_v9 = vunpack.i.h.bf16 %v5603_v8 }
 0x4c2   : >> { %3908 = vmatprep.subr.bf16.mxu0 %v6321_v55 }
 0x4c3   : >> { %v3917_v32 = vpack.c.bf16 %v4315_v9, %v4314_v1 }
 0x4c9   : >> { %3911 = vmatpush1.bf16.xpose.msk.msra.mxu0 %vm4974_vm3, %v3909_v6 }
 0x4ca   : >> { %3912 = vmatprep.subr.bf16.mxu0 %v6321_v55 }
 0x4cb   : >> { %v1591_v58 = vpop.xlane.xlu1 %1590 }
 0x4cc   : >> { %v1612_v15 = vsub.f32 %v5510_v46, %v1591_v58  ;;  %v1613_v19 = vsub.f32 %v5493_v36, %v1591_v58 }
 0x4ce   : >> { %v1630_v40 = vmul.f32 1.442695, %v1612_v15  ;;  %v1632_v17 = vmul.f32 1.442695, %v1613_v19 }
 0x4cf   : >> { %v1607_v11 = vpop.xlane.xlu0 %1606  ;;  %v1595_v12 = vpop.xlane.xlu1 %1594 }
 0x4d0   : >> { %4557 = vpow2.f32 %v1630_v40  ;;  %v1620_v37 = vsub.f32 %v5533_v48, %v1607_v11  ;;  %v1621_v0 = vsub.f32 %v5506_v7, %v1607_v11  ;;  %v1614_v5 = vsub.f32 %v5528_v20, %v1595_v12 }
 0x4d1   : >> { %4559 = vpow2.f32 %v1632_v17  ;;  %v1615_v4 = vsub.f32 %v5504_v47, %v1595_v12  ;;  %3915 = vmatpush1.bf16.xpose.msk.msra.mxu0 %vm4974_vm3, %v3913_v13  ;;  %v4320_v11 = vunpack.i.h.bf16 %v5634_v44  ;;  %v4319_v12 = vunpack.i.l.bf16 %v5634_v44 }
 0x4d2   : >> { %v1646_v46 = vmul.f32 1.442695, %v1620_v37  ;;  %v1648_v36 = vmul.f32 1.442695, %v1621_v0  ;;  %v1634_v14 = vmul.f32 1.442695, %v1614_v5  ;;  %3916 = vmatprep.subr.bf16.mxu0 %v6321_v55 }
 0x4d3   : >> { %v1636_v48 = vmul.f32 1.442695, %v1615_v4  ;;  %v5647_v31 = vpop.permute.xlu0 %1902  ;;  %v1599_v7 = vpop.xlane.xlu1 %1598 }
 0x4d4   : >> { %4561 = vpow2.f32 %v1646_v46  ;;  %v1616_v20 = vsub.f32 %v5544_v54, %v1599_v7  ;;  %v1617_v47 = vsub.f32 %v5522_v22, %v1599_v7  ;;  %v3921_v46 = vpack.c.bf16 %v4320_v11, %v4319_v12 }
 0x4d5   : >> { %4563 = vpow2.f32 %v1648_v36 }
 0x4d6   : >> { %4565 = vpow2.f32 %v1634_v14  ;;  %v1638_v53 = vmul.f32 1.442695, %v1616_v20  ;;  %v1640_v6 = vmul.f32 1.442695, %v1617_v47 }
 0x4d7   : >> { %4567 = vpow2.f32 %v1636_v48  ;;  %v4343_v26 = vpop.permute.xlu0 %4342  ;;  %v1603_v58 = vpop.xlane.xlu1 %1602 }
 0x4d8   : >> { %4569 = vpow2.f32 %v1638_v53  ;;  %v4345_v15 = vunpack.i.h.bf16 %v4343_v26  ;;  %v4344_v8 = vunpack.i.l.bf16 %v4343_v26  ;;  %v1618_v19 = vsub.f32 %v5552_v61, %v1603_v58 }
 0x4d9   : >> { %4571 = vpow2.f32 %v1640_v6  ;;  %v1619_v40 = vsub.f32 %v5540_v23, %v1603_v58  ;;  %3919 = vmatpush1.bf16.xpose.msk.msra.mxu0 %vm4974_vm3, %v3917_v32 }
 0x4da   : >> { %v4558_v22 = vpop.eup %4557  ;;  %v3941_v54 = vpack.c.bf16 %v4345_v15, %v4344_v8  ;;  %v1642_v17 = vmul.f32 1.442695, %v1618_v19  ;;  %3920 = vmatprep.subr.bf16.mxu0 %v6321_v55 }
 0x4db   : >> { %v4560_v13 = vpop.eup %4559  ;;  %v1644_v37 = vmul.f32 1.442695, %v1619_v40  ;;  %v4323_v0 = vpop.permute.xlu1 %4322 }
 0x4dc   : >> { %4573 = vpow2.f32 %v1642_v17  ;;  %3439 = vmatprep.mubr.msk.f32.mxu0 %vm1028_vm4, %v4560_v13  ;;  %3942 = vmatpush1.bf16.msra.mxu1 %v3941_v54  ;;  %v1658_v23 = vsel %vm1028_vm4, %v4560_v13, 0.0  ;;  %v4325_v47 = vunpack.i.h.bf16 %v4323_v0  ;;  %v4324_v53 = vunpack.i.l.bf16 %v4323_v0 }
 0x4dd   : >> { %4575 = vpow2.f32 %v1644_v37  ;;  %1846 = vmatmul.mubr.f32.gmra.mrb[32].mxu0 %v4558_v22  ;;  %3943 = vmatprep.subr.bf16.mxu1 %v6321_v55  ;;  %v5661_v5 = vadd.f32 %v4558_v22, %v1658_v23 }
 0x4de   : >> { %v4562_v61 = vpop.eup %4561  ;;  %v3925_v19 = vpack.c.bf16 %v4325_v47, %v4324_v53 }
 0x4df   : >> { %v4564_v4 = vpop.eup %4563  ;;  %v4328_v36 = vpop.permute.xlu1 %4327 }
 0x4e0   : >> { %v4566_v14 = vpop.eup %4565  ;;  %v1674_v9 = vsel %vm1028_vm4, %v4564_v4, 0.0  ;;  %v4330_v17 = vunpack.i.h.bf16 %v4328_v36  ;;  %v4329_v13 = vunpack.i.l.bf16 %v4328_v36 }
 0x4e1   : >> { %v4568_v44 = vpop.eup %4567  ;;  %3923 = vmatpush1.bf16.xpose.msk.msra.mxu0 %vm4974_vm3, %v3921_v46  ;;  %v5669_v7 = vadd.f32 %v4562_v61, %v1674_v9  ;;  %v4353_v9 = vpop.permute.xlu0 %4352 }
 0x4e2   : >> { %v4570_v1 = vpop.eup %4569  ;;  %3440 = vmatprep.mubr.msk.f32.mxu0 %vm1028_vm4, %v4568_v44  ;;  %3924 = vmatprep.subr.bf16.mxu0 %v6321_v55  ;;  %v1662_v48 = vsel %vm1028_vm4, %v4568_v44, 0.0  ;;  %v3929_v12 = vpack.c.bf16 %v4330_v17, %v4329_v13 }
 0x4e3   : >> { %v4572_v20 = vpop.eup %4571  ;;  %1851 = vmatmul.mubr.f32.gmra.mrb[34].mxu0 %v4566_v14  ;;  %v4333_v6 = vpop.permute.xlu1 %4332  ;;  %v5671_v32 = vadd.f32 %v4566_v14, %v1662_v48 }
 0x4e4   : >> { %3441 = vmatprep.mubr.msk.f32.mxu0 %vm1028_vm4, %v4572_v20  ;;  %v1666_v26 = vsel %vm1028_vm4, %v4572_v20, 0.0  ;;  %v4335_v0 = vunpack.i.h.bf16 %v4333_v6  ;;  %v4334_v23 = vunpack.i.l.bf16 %v4333_v6 }
 0x4e5   : >> { %v5675_v15 = vadd.f32 %v4570_v1, %v1666_v26  ;;  %v4363_v20 = vpop.permute.xlu0 %4362  ;;  %v4355_v26 = vunpack.i.h.bf16 %v4353_v9 }
 0x4e6   : >> { %v4574_v58 = vpop.eup %4573  ;;  %v3933_v14 = vpack.c.bf16 %v4335_v0, %v4334_v23  ;;  %v4364_v0 = vunpack.i.l.bf16 %v4363_v20 }
 0x4e7   : >> { %v4576_v8 = vpop.eup %4575  ;;  %1856 = vmatmul.mubr.f32.gmra.mrb[36].mxu0 %v4570_v1  ;;  %v4338_v40 = vpop.permute.xlu1 %4337 }
 0x4e8   : >> { %3442 = vmatprep.mubr.msk.f32.mxu0 %vm1028_vm4, %v4576_v8  ;;  %v1670_v22 = vsel %vm1028_vm4, %v4576_v8, 0.0 }
 0x4e9   : >> { %3927 = vmatpush1.bf16.xpose.msk.msra.mxu0 %vm4974_vm3, %v3925_v19  ;;  %v5682_v54 = vadd.f32 %v4574_v58, %v1670_v22 }
 0x4ea   : >> { %3928 = vmatprep.subr.bf16.mxu0 %v6321_v55 }
 0x4eb   : >> { %1861 = vmatmul.mubr.f32.gmra.mrb[38].mxu0 %v4574_v58  ;;  %v1901_v11 = vpop.permute.xlu1 %1900  ;;  %v4354_v58 = vunpack.i.l.bf16 %v4353_v9 }
 0x4ec   : >> { %3443 = vmatprep.mubr.msk.f32.mxu0 %vm1028_vm4, %v4564_v4  ;;  %v4340_v4 = vunpack.i.h.bf16 %v4338_v40 }
 0x4ed   : >> { %v3947_v22 = vpack.c.bf16 %v4355_v26, %v4354_v58 }
 0x4ef   : >> { %1866 = vmatmul.mubr.f32.gmra.mrb[40].mxu0 %v4562_v61  ;;  %v1905_v37 = vpop.permute.xlu1 %1904  ;;  %v4339_v61 = vunpack.i.l.bf16 %v4338_v40  ;;  %v4373_v40 = vpop.permute.xlu0 %4372 }
 0x4f0   : >> { %2088 = vmatprep.mubr.f32.mxu0 %v6322_v34 }
 0x4f1   : >> { %3931 = vmatpush1.bf16.xpose.msk.msra.mxu0 %vm4974_vm3, %v3929_v12  ;;  %v3937_v1 = vpack.c.bf16 %v4340_v4, %v4339_v61  ;;  %v4365_v12 = vunpack.i.h.bf16 %v4363_v20  ;;  %v4374_v20 = vunpack.i.l.bf16 %v4373_v40 }
 0x4f2   : >> { %3932 = vmatprep.subr.bf16.mxu0 %v6321_v55 }
 0x4f3   : >> { %v1907_v46 = vpop.permute.xlu1 %1906  ;;  %v4378_v23 = vpop.permute.xlu0 %4377  ;;  %v3953_v4 = vpack.c.bf16 %v4365_v12, %v4364_v0 }
 0x4f7   : >> { %v1909_v44 = vpop.permute.xlu1 %1908  ;;  %v4383_v9 = vpop.permute.xlu0 %4382 }
 0x4f8   : >> { %v4385_v58 = vunpack.i.h.bf16 %v4383_v9 }
 0x4f9   : >> { %3935 = vmatpush1.bf16.xpose.msk.msra.mxu0 %vm4974_vm3, %v3933_v14 }
 0x4fa   : >> { %3936 = vmatprep.subr.bf16.mxu0 %v6321_v55 }
 0x4fb   : >> { %v1911_v36 = vpop.permute.xlu1 %1910 }
 0x4ff   : >> { %v1913_v48 = vpop.permute.xlu1 %1912 }
 0x501   : >> { %3939 = vmatpush1.bf16.xpose.msk.msra.mxu0 %vm4974_vm3, %v3937_v1  ;;  %v4375_v1 = vunpack.i.h.bf16 %v4373_v40 }
 0x502   : >> { %4024 = vmatprep.subr.bf16.mxu0 %v6321_v55 }
 0x503   : >> { %v4348_v47 = vpop.permute.xlu1 %4347 }
 0x504   : >> { %v4350_v53 = vunpack.i.h.bf16 %v4348_v47  ;;  %v4349_v6 = vunpack.i.l.bf16 %v4348_v47 }
 0x506   : >> { %v3944_v8 = vpack.c.bf16 %v4350_v53, %v4349_v6  ;;  %v4380_v53 = vunpack.i.h.bf16 %v4378_v23  ;;  %v4379_v6 = vunpack.i.l.bf16 %v4378_v23 }
 0x507   : >> { %v4358_v19 = vpop.permute.xlu1 %4357 }
 0x508   : >> { %3482 = vmatmul.mubr.msk.f32.vlgmr.msra.gmra.mrb[42].mxu0 %vm827_vm2, %v1901_v11  ;;  %3945 = vmatpush1.bf16.msra.mxu1 %v3944_v8  ;;  %v4360_v17 = vunpack.i.h.bf16 %v4358_v19  ;;  %v4359_v13 = vunpack.i.l.bf16 %v4358_v19  ;;  %v3962_v26 = vpack.c.bf16 %v4380_v53, %v4379_v6  ;;  %v4384_v8 = vunpack.i.l.bf16 %v4383_v9 }
 0x509   : >> { %2094 = vmatprep.mubr.f32.mxu0 %v6322_v34  ;;  %3946 = vmatprep.subr.bf16.mxu1 %v6321_v55 }
 0x50a   : >> { %v3950_v11 = vpack.c.bf16 %v4360_v17, %v4359_v13  ;;  %v3965_v19 = vpack.c.bf16 %v4385_v58, %v4384_v8  ;;  %v3445_v8 = vld [vmem:[%s6283_s6 + $0xe8] sm:$0xff] }
 0x50b   : >> { %v4368_v14 = vpop.permute.xlu1 %4367 }
 0x50c   : >> { %3483 = vmatmul.mubr.msk.f32.gmra.mrb[44].mxu0 %vm827_vm2, %v5647_v31  ;;  %3948 = vmatpush1.bf16.msra.mxu1 %v3947_v22  ;;  %v4370_v61 = vunpack.i.h.bf16 %v4368_v14  ;;  %v4369_v31 = vunpack.i.l.bf16 %v4368_v14 }
 0x50d   : >> { %2100 = vmatprep.mubr.f32.mxu0 %v6322_v34  ;;  %3949 = vmatprep.subr.bf16.mxu1 %v6321_v55 }
 0x50e   : >> { %v3956_v47 = vpack.c.bf16 %v4370_v61, %v4369_v31 }
 0x510   : >> { %3484 = vmatmul.mubr.msk.f32.gmra.mrb[46].mxu0 %vm827_vm2, %v1905_v37  ;;  %3951 = vmatpush1.bf16.msra.mxu1 %v3950_v11  ;;  %v3959_v37 = vpack.c.bf16 %v4375_v1, %v4374_v20 }
 0x511   : >> { %2106 = vmatprep.mubr.f32.mxu0 %v6322_v34  ;;  %3952 = vmatprep.subr.bf16.mxu1 %v6321_v55 }
 0x514   : >> { %3485 = vmatmul.mubr.msk.f32.gmra.mrb[48].mxu0 %vm827_vm2, %v1907_v46  ;;  %3954 = vmatpush1.bf16.msra.mxu1 %v3953_v4  ;;  %v4388_v46 = vpop.permute.xlu0 %4387 }
 0x515   : >> { %2112 = vmatprep.mubr.f32.mxu0 %v6322_v34  ;;  %3955 = vmatprep.subr.bf16.mxu1 %v6321_v55  ;;  %v4390_v40 = vunpack.i.h.bf16 %v4388_v46  ;;  %v4389_v22 = vunpack.i.l.bf16 %v4388_v46 }
 0x518   : >> { %3486 = vmatmul.mubr.msk.f32.gmra.mrb[50].mxu0 %vm827_vm2, %v1909_v44  ;;  %3957 = vmatpush1.bf16.msra.mxu1 %v3956_v47  ;;  %v4393_v44 = vpop.permute.xlu0 %4392 }
 0x519   : >> { %2118 = vmatprep.mubr.f32.mxu0 %v6322_v34  ;;  %3958 = vmatprep.subr.bf16.mxu1 %v6321_v55  ;;  %v4395_v17 = vunpack.i.h.bf16 %v4393_v44  ;;  %v4394_v13 = vunpack.i.l.bf16 %v4393_v44  ;;  %v3444_v44 = vld [vmem:[%s6283_s6 + $0xe0] sm:$0xff] }
 0x51b   : >> { %v3971_v0 = vpack.c.bf16 %v4395_v17, %v4394_v13  ;;  %v3447_v17 = vld [vmem:[%s6283_s6 + $0xf8] sm:$0xff]  ;;  %v3446_v13 = vld [vmem:[%s6283_s6 + $0xf0] sm:$0xff] }
 0x51c   : >> { %3487 = vmatmul.mubr.msk.f32.gmra.mrb[52].mxu0 %vm827_vm2, %v1911_v36  ;;  %3960 = vmatpush1.bf16.msra.mxu1 %v3959_v37  ;;  %v3968_v36 = vpack.c.bf16 %v4390_v40, %v4389_v22  ;;  %v4398_v12 = vpop.permute.xlu0 %4397 }
 0x51d   : >> { %2124 = vmatprep.mubr.f32.mxu0 %v6322_v34  ;;  %3961 = vmatprep.subr.bf16.mxu1 %v6321_v55  ;;  %v4400_v11 = vunpack.i.h.bf16 %v4398_v12 }
 0x520   : >> { %3488 = vmatmul.mubr.msk.f32.gmra.mrb[54].mxu0 %vm827_vm2, %v1913_v48  ;;  %3963 = vmatpush1.bf16.msra.mxu1 %v3962_v26  ;;  %v4399_v48 = vunpack.i.l.bf16 %v4398_v12 }
 0x521   : >> { %3964 = vmatprep.subr.bf16.mxu1 %v6321_v55 }
 0x522   : >> { %v3974_v23 = vpack.c.bf16 %v4400_v11, %v4399_v48 }
 0x524   : >> { %3966 = vmatpush1.bf16.msra.mxu1 %v3965_v19 }
 0x525   : >> { %3967 = vmatprep.subr.bf16.mxu1 %v6321_v55 }
 0x528   : >> { %3969 = vmatpush1.bf16.msra.mxu1 %v3968_v36 }
 0x529   : >> { %3970 = vmatprep.subr.bf16.mxu1 %v6321_v55 }
 0x52c   : >> { %3972 = vmatpush1.bf16.msra.mxu1 %v3971_v0 }
 0x52d   : >> { %3973 = vmatprep.subr.bf16.mxu1 %v6321_v55 }
 0x530   : >> { %3975 = vmatpush1.bf16.msra.mxu1 %v3974_v23 }
 0x531   : >> { %3976 = vmatprep.subr.bf16.mxu1 %v6321_v55 }
 0x57b   : >> { %v5720_v14 = vpop.f32.mrb[28].mxu0 }
 0x57c   : >> { %v1839_v4 = vpop.f32.mrb[29].mxu0 }
 0x57f   : >> { %v5722_v61 = vpop.f32.mrb[30].mxu0 }
 0x580   : >> { %6330 = vst [vmem:[#allocation24_spill] sm:$0xff] %v5722_v61  ;;  %v1844_v31 = vpop.f32.mrb[31].mxu0 }
 0x5b0   : >> { %v5724_v9 = vpop.f32.mrb[32].mxu0 }
 0x5b1   : >> { %6331 = vst [vmem:[#allocation25_spill] sm:$0xff] %v5724_v9  ;;  %v1849_v1 = vpop.f32.mrb[33].mxu0  ;;  %v3455_v9 = vld [vmem:[%s6283_s6 + $0x138] sm:$0xff] }
 0x5b6   : >> { %v5726_v20 = vpop.f32.mrb[34].mxu0 }
 0x5b7   : >> { %6332 = vst [vmem:[#allocation26_spill] sm:$0xff] %v5726_v20  ;;  %v1854_v47 = vpop.f32.mrb[35].mxu0  ;;  %v3453_v20 = vld [vmem:[%s6283_s6 + $0x128] sm:$0xff] }
 0x5ba   : >> { %v5728_v37 = vpop.f32.mrb[36].mxu0 }
 0x5bb   : >> { %v1859_v53 = vpop.f32.mrb[37].mxu0 }
 0x5be   : >> { %v5730_v6 = vpop.f32.mrb[38].mxu0 }
 0x5bf   : >> { %6333 = vst [vmem:[#allocation27_spill] sm:$0xff] %v5730_v6  ;;  %v1864_v46 = vpop.f32.mrb[39].mxu0 }
 0x5c2   : >> { %v5732_v26 = vpop.f32.mrb[40].mxu0 }
 0x5c3   : >> { %6334 = vst [vmem:[#allocation28_spill] sm:$0xff] %v5732_v26  ;;  %v1869_v58 = vpop.f32.mrb[41].mxu0  ;;  %v3450_v26 = vld [vmem:[%s6283_s6 + $0x110] sm:$0xff] }
 0x5db   : >> { %v2090_v19 = vpop.f32.mrb[42].mxu0 }
 0x5dc   : >> { %v2092_v40 = vpop.f32.mrb[43].mxu0  ;;  %v5742_v36 = vadd.f32 %v3444_v44, %v2090_v19 }
 0x5dd   : >> { %v5740_v22 = vadd.f32 %v3445_v8, %v2092_v40 }
 0x5df   : >> { %v2096_v12 = vpop.f32.mrb[44].mxu0  ;;  %v2131_v0 = vsel %vm1028_vm4, %v5740_v22, -inf }
 0x5e0   : >> { %v2098_v11 = vpop.f32.mrb[45].mxu0  ;;  %v2132_v48 = vmax.f32 %v5742_v36, %v2131_v0  ;;  %v5755_v4 = vadd.f32 %v3446_v13, %v2096_v12  ;;  %v3449_v13 = vld [vmem:[%s6283_s6 + $0x108] sm:$0xff] }
 0x5e1   : >> { %v5753_v23 = vadd.f32 %v3447_v17, %v2098_v11  ;;  %v3451_v11 = vld [vmem:[%s6283_s6 + $0x118] sm:$0xff] }
 0x5e2   : >> { %2133 = vmax.xlane.f32.xlu1 %v2132_v48  ;;  %v3457_v48 = vld [vmem:[%s6283_s6 + $0x148] sm:$0xff] }
 0x5e3   : >> { %v2135_v31 = vsel %vm1028_vm4, %v5753_v23, -inf  ;;  %v2102_v1 = vpop.f32.mrb[46].mxu0 }
 0x5e4   : >> { %v2136_v47 = vmax.f32 %v5755_v4, %v2135_v31  ;;  %v2104_v53 = vpop.f32.mrb[47].mxu0  ;;  %v3448_v31 = vld [vmem:[%s6283_s6 + $0x100] sm:$0xff] }
 0x5e5   : >> { %v5767_v12 = vadd.f32 %v3449_v13, %v2104_v53  ;;  %v5784_v13 = vadd.f32 %v3448_v31, %v2102_v1 }
 0x5e6   : >> { %2137 = vmax.xlane.f32.xlu0 %v2136_v47 }
 0x5e7   : >> { %v2108_v46 = vpop.f32.mrb[48].mxu0  ;;  %v2139_v53 = vsel %vm1028_vm4, %v5767_v12, -inf }
 0x5e8   : >> { %v2110_v58 = vpop.f32.mrb[49].mxu0  ;;  %v5802_v31 = vadd.f32 %v3450_v26, %v2108_v46 }
 0x5e9   : >> { %v5778_v47 = vadd.f32 %v3451_v11, %v2110_v58  ;;  %v3456_v58 = vld [vmem:[%s6283_s6 + $0x140] sm:$0xff] }
 0x5eb   : >> { %v2114_v8 = vpop.f32.mrb[50].mxu0 }
 0x5ec   : >> { %v2116_v44 = vpop.f32.mrb[51].mxu0 }
 0x5ed   : >> { %v5796_v11 = vadd.f32 %v3453_v20, %v2116_v44  ;;  %v3452_v20 = vld [vmem:[%s6283_s6 + $0x120] sm:$0xff] }
 0x5ee   : >> { %v5818_v46 = vadd.f32 %v3452_v20, %v2114_v8 }
 0x5ef   : >> { %v2120_v19 = vpop.f32.mrb[52].mxu0  ;;  %v2147_v26 = vsel %vm1028_vm4, %v5796_v11, -inf }
 0x5f0   : >> { %v2122_v40 = vpop.f32.mrb[53].mxu0 }
 0x5f1   : >> { %v5814_v61 = vadd.f32 %v3455_v9, %v2122_v40 }
 0x5f3   : >> { %v2126_v0 = vpop.f32.mrb[54].mxu0  ;;  %4422 = vrot.lane.b32.xlu1 %v5020_v43, %s4713_s23 }
 0x5f4   : >> { %v2128_v17 = vpop.f32.mrb[55].mxu0  ;;  %v5807_v6 = vadd.f32 %v3456_v58, %v2126_v0  ;;  %v3454_v0 = vld [vmem:[%s6283_s6 + $0x130] sm:$0xff]  ;;  %v2148_v58 = vmax.f32 %v5818_v46, %v2147_v26 }
 0x5f5   : >> { %v5780_v10 = vadd.f32 %v3457_v48, %v2128_v17  ;;  %v2140_v17 = vmax.f32 %v5784_v13, %v2139_v53  ;;  %v2143_v48 = vsel %vm1028_vm4, %v5778_v47, -inf }
 0x5f6   : >> { %v2144_v53 = vmax.f32 %v5802_v31, %v2143_v48 }
 0x5f7   : >> { %v2155_v1 = vsel %vm1028_vm4, %v5780_v10, -inf }
 0x5f8   : >> { %v2156_v44 = vmax.f32 %v5807_v6, %v2155_v1  ;;  %v5826_v1 = vadd.f32 %v3454_v0, %v2120_v19 }
 0x5fc   : >> { %4437 = vrot.lane.b32.xlu0 %v5052_v25, %s4713_s23 }
 0x617   : >> { %2141 = vmax.xlane.f32.xlu1 %v2140_v17  ;;  %v2151_v17 = vsel %vm1028_vm4, %v5814_v61, -inf }
 0x618   : >> { %v2152_v9 = vmax.f32 %v5826_v1, %v2151_v17 }
 0x61b   : >> { %2157 = vmax.xlane.f32.xlu0 %v2156_v44  ;;  %2145 = vmax.xlane.f32.xlu1 %v2144_v53 }
 0x61f   : >> { %2149 = vmax.xlane.f32.xlu1 %v2148_v58 }
 0x623   : >> { %2153 = vmax.xlane.f32.xlu1 %v2152_v9 }
 0x631   : >> { %2453 = vrot.lane.b32.xlu0 %v5118_v63, %s4713_s23 }
 0x634   : >> { %4442 = vrot.lane.b32.xlu1 %v5058_v33, %s4713_s23 }
 0x635   : >> { %4462 = vrot.lane.b32.xlu0 %v4978_v57, %s4714_s22  ;;  %v4403_v57 = vpop.permute.xlu0 %4402 }
 0x636   : >> { %v4405_v8 = vunpack.i.h.bf16 %v4403_v57  ;;  %v4404_v19 = vunpack.i.l.bf16 %v4403_v57 }
 0x638   : >> { %4447 = vrot.lane.b32.xlu1 %v5067_v41, %s4713_s23 }
 0x639   : >> { %4472 = vrot.lane.b32.xlu0 %v4997_v27, %s4714_s22  ;;  %v4408_v27 = vpop.permute.xlu0 %4407 }
 0x63a   : >> { %v4410_v44 = vunpack.i.h.bf16 %v4408_v27  ;;  %v4409_v53 = vunpack.i.l.bf16 %v4408_v27 }
 0x63c   : >> { %4452 = vrot.lane.b32.xlu1 %v5073_v50, %s4713_s23  ;;  %v3981_v58 = vpack.c.bf16 %v4410_v44, %v4409_v53 }
 0x63d   : >> { %4482 = vrot.lane.b32.xlu0 %v5020_v43, %s4714_s22  ;;  %v4413_v43 = vpop.permute.xlu0 %4412 }
 0x63e   : >> { %v4415_v17 = vunpack.i.h.bf16 %v4413_v43  ;;  %v4414_v9 = vunpack.i.l.bf16 %v4413_v43 }
 0x640   : >> { %4457 = vrot.lane.b32.xlu1 %v5082_v59, %s4713_s23  ;;  %v3985_v57 = vpack.c.bf16 %v4415_v17, %v4414_v9 }
 0x641   : >> { %4487 = vrot.lane.b32.xlu0 %v5031_v51, %s4714_s22  ;;  %v4418_v51 = vpop.permute.xlu0 %4417 }
 0x642   : >> { %v4420_v27 = vunpack.i.h.bf16 %v4418_v51 }
 0x644   : >> { %2451 = vrot.lane.b32.xlu1 %v5112_v52, %s4713_s23 }
 0x645   : >> { %4497 = vrot.lane.b32.xlu0 %v5052_v25, %s4714_s22  ;;  %v5869_v25 = vpop.permute.xlu0 %4427 }
 0x646   : >> { %v4430_v43 = vunpack.i.h.bf16 %v5869_v25 }
 0x648   : >> { %2455 = vrot.lane.b32.xlu1 %v5125_v18, %s4713_s23 }
 0x649   : >> { %4502 = vrot.lane.b32.xlu0 %v5058_v33, %s4714_s22  ;;  %v5871_v33 = vpop.permute.xlu0 %4432 }
 0x64a   : >> { %v4435_v53 = vunpack.i.h.bf16 %v5871_v33 }
 0x64c   : >> { %2457 = vrot.lane.b32.xlu1 %v5132_v60, %s4713_s23 }
 0x650   : >> { %2459 = vrot.lane.b32.xlu1 %v5139_v21, %s4713_s23 }
 0x654   : >> { %2461 = vrot.lane.b32.xlu1 %v5146_v29, %s4713_s23 }
 0x658   : >> { %2463 = vrot.lane.b32.xlu1 %v5153_v45, %s4713_s23  ;;  %s4716_s23 = smov 8  }
 0x65c   : >> { %4467 = vrot.lane.b32.xlu1 %v4989_v16, %s4714_s22 }
 0x660   : >> { %4477 = vrot.lane.b32.xlu1 %v5010_v35, %s4714_s22 }
 0x664   : >> { %4492 = vrot.lane.b32.xlu1 %v5041_v62, %s4714_s22 }
 0x66f   : >> { %v2134_v52 = vpop.xlane.xlu1 %2133 }
 0x670   : >> { %v2159_v63 = vsub.f32 %v5742_v36, %v2134_v52  ;;  %v2160_v18 = vsub.f32 %v5740_v22, %v2134_v52  ;;  %v3977_v36 = vpack.c.bf16 %v4405_v8, %v4404_v19  ;;  %v4419_v52 = vunpack.i.l.bf16 %v4418_v51 }
 0x672   : >> { %v2173_v60 = vmul.f32 1.442695, %v2159_v63  ;;  %v2175_v21 = vmul.f32 1.442695, %v2160_v18  ;;  %v3989_v63 = vpack.c.bf16 %v4420_v27, %v4419_v52 }
 0x673   : >> { %v2138_v16 = vpop.xlane.xlu0 %2137  ;;  %v4423_v18 = vpop.permute.xlu1 %4422 }
 0x674   : >> { %4577 = vpow2.f32 %v2173_v60  ;;  %v2161_v29 = vsub.f32 %v5755_v4, %v2138_v16  ;;  %v2162_v35 = vsub.f32 %v5753_v23, %v2138_v16  ;;  %v4425_v60 = vunpack.i.h.bf16 %v4423_v18 }
 0x675   : >> { %4579 = vpow2.f32 %v2175_v21  ;;  %v4424_v21 = vunpack.i.l.bf16 %v4423_v18 }
 0x676   : >> { %v2177_v45 = vmul.f32 1.442695, %v2161_v29  ;;  %v2179_v62 = vmul.f32 1.442695, %v2162_v35  ;;  %v4429_v29 = vunpack.i.l.bf16 %v5869_v25 }
 0x677   : >> { %v3993_v16 = vpack.c.bf16 %v4425_v60, %v4424_v21  ;;  %v5902_v51 = vpop.permute.xlu0 %4437 }
 0x678   : >> { %4581 = vpow2.f32 %v2177_v45 }
 0x679   : >> { %4583 = vpow2.f32 %v2179_v62 }
 0x67e   : >> { %v4578_v40 = vpop.eup %4577 }
 0x67f   : >> { %v4580_v48 = vpop.eup %4579 }
 0x680   : >> { %3489 = vmatprep.mubr.msk.f32.mxu1 %vm1028_vm4, %v4580_v48  ;;  %v2201_v22 = vsel %vm1028_vm4, %v4580_v48, 0.0 }
 0x681   : >> { %2387 = vmatmul.mubr.f32.vlgmr.msra.gmra.mrb[52].mxu1 %v4578_v40  ;;  %v5879_v20 = vadd.f32 %v4578_v40, %v2201_v22  ;;  %v3997_v40 = vpack.c.bf16 %v4430_v43, %v4429_v29  ;;  %v4440_v43 = vunpack.i.h.bf16 %v5902_v51  ;;  %v4439_v29 = vunpack.i.l.bf16 %v5902_v51 }
 0x682   : >> { %v4582_v4 = vpop.eup %4581  ;;  %3979 = vmatpush1.bf16.xpose.msk.msra.mxu1 %vm4974_vm3, %v3977_v36 }
 0x683   : >> { %v4584_v23 = vpop.eup %4583  ;;  %3980 = vmatprep.subr.bf16.mxu1 %v6321_v55 }
 0x684   : >> { %3490 = vmatprep.mubr.msk.f32.mxu1 %vm1028_vm4, %v4584_v23  ;;  %v2205_v26 = vsel %vm1028_vm4, %v4584_v23, 0.0 }
 0x685   : >> { %2392 = vmatmul.mubr.f32.gmra.mrb[54].mxu1 %v4582_v4  ;;  %v5886_v0 = vadd.f32 %v4582_v4, %v2205_v26  ;;  %v4434_v26 = vunpack.i.l.bf16 %v5871_v33 }
 0x68a   : >> { %3983 = vmatpush1.bf16.xpose.msk.msra.mxu1 %vm4974_vm3, %v3981_v58 }
 0x68b   : >> { %3984 = vmatprep.subr.bf16.mxu1 %v6321_v55 }
 0x692   : >> { %3987 = vmatpush1.bf16.xpose.msk.msra.mxu1 %vm4974_vm3, %v3985_v57  ;;  %v4001_v57 = vpack.c.bf16 %v4435_v53, %v4434_v26 }
 0x693   : >> { %3988 = vmatprep.subr.bf16.mxu1 %v6321_v55 }
 0x69a   : >> { %3991 = vmatpush1.bf16.xpose.msk.msra.mxu1 %vm4974_vm3, %v3989_v63 }
 0x69b   : >> { %3992 = vmatprep.subr.bf16.mxu1 %v6321_v55 }
 0x6a2   : >> { %3995 = vmatpush1.bf16.xpose.msk.msra.mxu1 %vm4974_vm3, %v3993_v16 }
 0x6a3   : >> { %3996 = vmatprep.subr.bf16.mxu1 %v6321_v55 }
 0x6a4   : >> { %v2142_v35 = vpop.xlane.xlu1 %2141 }
 0x6a5   : >> { %v2163_v45 = vsub.f32 %v5784_v13, %v2142_v35  ;;  %v2164_v62 = vsub.f32 %v5767_v12, %v2142_v35 }
 0x6a7   : >> { %v2181_v8 = vmul.f32 1.442695, %v2163_v45  ;;  %v2183_v19 = vmul.f32 1.442695, %v2164_v62 }
 0x6a8   : >> { %v2158_v48 = vpop.xlane.xlu0 %2157  ;;  %v2146_v36 = vpop.xlane.xlu1 %2145 }
 0x6a9   : >> { %4585 = vpow2.f32 %v2181_v8  ;;  %v2171_v22 = vsub.f32 %v5807_v6, %v2158_v48  ;;  %v2172_v4 = vsub.f32 %v5780_v10, %v2158_v48  ;;  %v2165_v23 = vsub.f32 %v5802_v31, %v2146_v36 }
 0x6aa   : >> { %4587 = vpow2.f32 %v2183_v19  ;;  %v2166_v25 = vsub.f32 %v5778_v47, %v2146_v36  ;;  %3999 = vmatpush1.bf16.xpose.msk.msra.mxu1 %vm4974_vm3, %v3997_v40  ;;  %v4005_v19 = vpack.c.bf16 %v4440_v43, %v4439_v29 }
 0x6ab   : >> { %v2197_v13 = vmul.f32 1.442695, %v2171_v22  ;;  %v2199_v12 = vmul.f32 1.442695, %v2172_v4  ;;  %v2185_v44 = vmul.f32 1.442695, %v2165_v23  ;;  %4000 = vmatprep.subr.bf16.mxu1 %v6321_v55 }
 0x6ac   : >> { %v2187_v6 = vmul.f32 1.442695, %v2166_v25  ;;  %v5915_v58 = vpop.permute.xlu0 %2453  ;;  %v2150_v10 = vpop.xlane.xlu1 %2149 }
 0x6ad   : >> { %4589 = vpow2.f32 %v2197_v13  ;;  %v2167_v31 = vsub.f32 %v5818_v46, %v2150_v10  ;;  %v2168_v47 = vsub.f32 %v5796_v11, %v2150_v10 }
 0x6ae   : >> { %4591 = vpow2.f32 %v2199_v12 }
 0x6af   : >> { %4593 = vpow2.f32 %v2185_v44  ;;  %v2189_v17 = vmul.f32 1.442695, %v2167_v31  ;;  %v2191_v9 = vmul.f32 1.442695, %v2168_v47 }
 0x6b0   : >> { %4595 = vpow2.f32 %v2187_v6  ;;  %v4463_v27 = vpop.permute.xlu0 %4462  ;;  %v2154_v52 = vpop.xlane.xlu1 %2153 }
 0x6b1   : >> { %4597 = vpow2.f32 %v2189_v17  ;;  %v4465_v63 = vunpack.i.h.bf16 %v4463_v27  ;;  %v4464_v33 = vunpack.i.l.bf16 %v4463_v27  ;;  %v2169_v18 = vsub.f32 %v5826_v1, %v2154_v52 }
 0x6b2   : >> { %4599 = vpow2.f32 %v2191_v9  ;;  %v2170_v60 = vsub.f32 %v5814_v61, %v2154_v52  ;;  %4003 = vmatpush1.bf16.xpose.msk.msra.mxu1 %vm4974_vm3, %v4001_v57 }
 0x6b3   : >> { %v4586_v11 = vpop.eup %4585  ;;  %v4025_v46 = vpack.c.bf16 %v4465_v63, %v4464_v33  ;;  %v2193_v21 = vmul.f32 1.442695, %v2169_v18  ;;  %4004 = vmatprep.subr.bf16.mxu1 %v6321_v55 }
 0x6b4   : >> { %v4588_v16 = vpop.eup %4587  ;;  %v2195_v35 = vmul.f32 1.442695, %v2170_v60  ;;  %v4443_v45 = vpop.permute.xlu1 %4442 }
 0x6b5   : >> { %4601 = vpow2.f32 %v2193_v21  ;;  %3491 = vmatprep.mubr.msk.f32.mxu1 %vm1028_vm4, %v4588_v16  ;;  %4026 = vmatpush1.bf16.msra.mxu0 %v4025_v46  ;;  %v2209_v61 = vsel %vm1028_vm4, %v4588_v16, 0.0  ;;  %v4445_v13 = vunpack.i.h.bf16 %v4443_v45  ;;  %v4444_v12 = vunpack.i.l.bf16 %v4443_v45 }
 0x6b6   : >> { %4603 = vpow2.f32 %v2195_v35  ;;  %2397 = vmatmul.mubr.f32.gmra.mrb[56].mxu1 %v4586_v11  ;;  %4027 = vmatprep.subr.bf16.mxu0 %v6321_v55  ;;  %v5929_v62 = vadd.f32 %v4586_v11, %v2209_v61 }
 0x6b7   : >> { %v4590_v1 = vpop.eup %4589  ;;  %v4009_v47 = vpack.c.bf16 %v4445_v13, %v4444_v12 }
 0x6b8   : >> { %v4592_v8 = vpop.eup %4591  ;;  %v4448_v40 = vpop.permute.xlu1 %4447 }
 0x6b9   : >> { %v4594_v48 = vpop.eup %4593  ;;  %v2225_v36 = vsel %vm1028_vm4, %v4592_v8, 0.0  ;;  %v4450_v27 = vunpack.i.h.bf16 %v4448_v40  ;;  %v4449_v52 = vunpack.i.l.bf16 %v4448_v40 }
 0x6ba   : >> { %v4596_v51 = vpop.eup %4595  ;;  %4007 = vmatpush1.bf16.xpose.msk.msra.mxu1 %vm4974_vm3, %v4005_v19  ;;  %v5937_v23 = vadd.f32 %v4590_v1, %v2225_v36 }
 0x6bb   : >> { %v4598_v22 = vpop.eup %4597  ;;  %3492 = vmatprep.mubr.msk.f32.mxu1 %vm1028_vm4, %v4596_v51  ;;  %4008 = vmatprep.subr.bf16.mxu1 %v6321_v55  ;;  %v2213_v4 = vsel %vm1028_vm4, %v4596_v51, 0.0  ;;  %v4013_v33 = vpack.c.bf16 %v4450_v27, %v4449_v52 }
 0x6bc   : >> { %v4600_v25 = vpop.eup %4599  ;;  %2402 = vmatmul.mubr.f32.gmra.mrb[58].mxu1 %v4594_v48  ;;  %v4453_v44 = vpop.permute.xlu1 %4452  ;;  %v5939_v53 = vadd.f32 %v4594_v48, %v2213_v4 }
 0x6bd   : >> { %3493 = vmatprep.mubr.msk.f32.mxu1 %vm1028_vm4, %v4600_v25  ;;  %v2217_v26 = vsel %vm1028_vm4, %v4600_v25, 0.0  ;;  %v4455_v60 = vunpack.i.h.bf16 %v4453_v44  ;;  %v4454_v11 = vunpack.i.l.bf16 %v4453_v44 }
 0x6be   : >> { %v5943_v10 = vadd.f32 %v4598_v22, %v2217_v26 }
 0x6bf   : >> { %v4602_v6 = vpop.eup %4601  ;;  %v4017_v21 = vpack.c.bf16 %v4455_v60, %v4454_v11 }
 0x6c0   : >> { %v4604_v31 = vpop.eup %4603  ;;  %2407 = vmatmul.mubr.f32.gmra.mrb[60].mxu1 %v4598_v22  ;;  %v4458_v17 = vpop.permute.xlu1 %4457 }
 0x6c1   : >> { %3494 = vmatprep.mubr.msk.f32.mxu1 %vm1028_vm4, %v4604_v31  ;;  %v2221_v9 = vsel %vm1028_vm4, %v4604_v31, 0.0  ;;  %v4460_v43 = vunpack.i.h.bf16 %v4458_v17  ;;  %v4459_v29 = vunpack.i.l.bf16 %v4458_v17 }
 0x6c2   : >> { %4011 = vmatpush1.bf16.xpose.msk.msra.mxu1 %vm4974_vm3, %v4009_v47  ;;  %v5950_v57 = vadd.f32 %v4602_v6, %v2221_v9 }
 0x6c3   : >> { %4012 = vmatprep.subr.bf16.mxu1 %v6321_v55  ;;  %v4021_v45 = vpack.c.bf16 %v4460_v43, %v4459_v29 }
 0x6c4   : >> { %2412 = vmatmul.mubr.f32.gmra.mrb[62].mxu1 %v4602_v6  ;;  %v2452_v63 = vpop.permute.xlu1 %2451 }
 0x6c5   : >> { %3495 = vmatprep.mubr.msk.f32.mxu1 %vm1028_vm4, %v4592_v8 }
 0x6c8   : >> { %2417 = vmatmul.mubr.f32.gmra.mrb[64].mxu1 %v4590_v1  ;;  %v2456_v18 = vpop.permute.xlu1 %2455  ;;  %v4473_v1 = vpop.permute.xlu0 %4472 }
 0x6c9   : >> { %2639 = vmatprep.mubr.f32.mxu1 %v6322_v34  ;;  %v4475_v48 = vunpack.i.h.bf16 %v4473_v1  ;;  %v4474_v51 = vunpack.i.l.bf16 %v4473_v1 }
 0x6ca   : >> { %4015 = vmatpush1.bf16.xpose.msk.msra.mxu1 %vm4974_vm3, %v4013_v33 }
 0x6cb   : >> { %4016 = vmatprep.subr.bf16.mxu1 %v6321_v55  ;;  %v4031_v56 = vpack.c.bf16 %v4475_v48, %v4474_v51 }
 0x6cc   : >> { %v2458_v46 = vpop.permute.xlu1 %2457  ;;  %v4483_v4 = vpop.permute.xlu0 %4482 }
 0x6cd   : >> { %v4485_v12 = vunpack.i.h.bf16 %v4483_v4  ;;  %v4484_v44 = vunpack.i.l.bf16 %v4483_v4 }
 0x6cf   : >> { %v4037_v31 = vpack.c.bf16 %v4485_v12, %v4484_v44 }
 0x6d0   : >> { %v2460_v16 = vpop.permute.xlu1 %2459  ;;  %v4488_v6 = vpop.permute.xlu0 %4487 }
 0x6d1   : >> { %v4490_v47 = vunpack.i.h.bf16 %v4488_v6  ;;  %v4489_v17 = vunpack.i.l.bf16 %v4488_v6 }
 0x6d2   : >> { %4019 = vmatpush1.bf16.xpose.msk.msra.mxu1 %vm4974_vm3, %v4017_v21 }
 0x6d3   : >> { %4020 = vmatprep.subr.bf16.mxu1 %v6321_v55  ;;  %v4040_v27 = vpack.c.bf16 %v4490_v47, %v4489_v17  ;;  %v3498_v17 = vld [vmem:[%s6283_s6 + $0x160] sm:$0xff] }
 0x6d4   : >> { %v2462_v35 = vpop.permute.xlu1 %2461  ;;  %v4498_v9 = vpop.permute.xlu0 %4497 }
 0x6d5   : >> { %v4500_v33 = vunpack.i.h.bf16 %v4498_v9 }
 0x6d8   : >> { %v2464_v61 = vpop.permute.xlu1 %2463  ;;  %v4503_v11 = vpop.permute.xlu0 %4502 }
 0x6d9   : >> { %v4505_v21 = vunpack.i.h.bf16 %v4503_v11  ;;  %v4504_v43 = vunpack.i.l.bf16 %v4503_v11 }
 0x6da   : >> { %4023 = vmatpush1.bf16.xpose.msk.msra.mxu1 %vm4974_vm3, %v4021_v45 }
 0x6db   : >> { %4066 = vmatprep.subr.bf16.mxu1 %v6321_v55 }
 0x6dc   : >> { %v4468_v8 = vpop.permute.xlu1 %4467 }
 0x6dd   : >> { %v4470_v19 = vunpack.i.h.bf16 %v4468_v8  ;;  %v4469_v40 = vunpack.i.l.bf16 %v4468_v8 }
 0x6df   : >> { %v4028_v36 = vpack.c.bf16 %v4470_v19, %v4469_v40 }
 0x6e0   : >> { %v4478_v22 = vpop.permute.xlu1 %4477 }
 0x6e1   : >> { %3534 = vmatmul.mubr.msk.f32.vlgmr.msra.gmra.mrb[66].mxu1 %vm827_vm2, %v2452_v63  ;;  %4029 = vmatpush1.bf16.msra.mxu0 %v4028_v36  ;;  %v4480_v25 = vunpack.i.h.bf16 %v4478_v22  ;;  %v4479_v13 = vunpack.i.l.bf16 %v4478_v22 }
 0x6e2   : >> { %2645 = vmatprep.mubr.f32.mxu1 %v6322_v34  ;;  %4030 = vmatprep.subr.bf16.mxu0 %v6321_v55 }
 0x6e3   : >> { %v4034_v26 = vpack.c.bf16 %v4480_v25, %v4479_v13  ;;  %v3497_v25 = vld [vmem:[%s6283_s6 + $0x158] sm:$0xff]  ;;  %v3496_v13 = vld [vmem:[%s6283_s6 + $0x150] sm:$0xff] }
 0x6e5   : >> { %3535 = vmatmul.mubr.msk.f32.gmra.mrb[68].mxu1 %vm827_vm2, %v5915_v58  ;;  %4032 = vmatpush1.bf16.msra.mxu0 %v4031_v56  ;;  %v4493_v58 = vpop.permute.xlu1 %4492 }
 0x6e6   : >> { %2651 = vmatprep.mubr.f32.mxu1 %v6322_v34  ;;  %4033 = vmatprep.subr.bf16.mxu0 %v6321_v55  ;;  %v4495_v52 = vunpack.i.h.bf16 %v4493_v58  ;;  %v4494_v63 = vunpack.i.l.bf16 %v4493_v58 }
 0x6e8   : >> { %v4043_v60 = vpack.c.bf16 %v4495_v52, %v4494_v63 }
 0x6e9   : >> { %3536 = vmatmul.mubr.msk.f32.gmra.mrb[70].mxu1 %vm827_vm2, %v2456_v18  ;;  %4035 = vmatpush1.bf16.msra.mxu0 %v4034_v26  ;;  %v4499_v18 = vunpack.i.l.bf16 %v4498_v9 }
 0x6ea   : >> { %2657 = vmatprep.mubr.f32.mxu1 %v6322_v34  ;;  %4036 = vmatprep.subr.bf16.mxu0 %v6321_v55 }
 0x6ed   : >> { %3537 = vmatmul.mubr.msk.f32.gmra.mrb[72].mxu1 %vm827_vm2, %v2458_v46  ;;  %4038 = vmatpush1.bf16.msra.mxu0 %v4037_v31  ;;  %v4046_v46 = vpack.c.bf16 %v4500_v33, %v4499_v18  ;;  %v3499_v31 = vld [vmem:[%s6283_s6 + $0x168] sm:$0xff]  ;;  %v3501_v33 = vld [vmem:[%s6283_s6 + $0x178] sm:$0xff] }
 0x6ee   : >> { %2663 = vmatprep.mubr.f32.mxu1 %v6322_v34  ;;  %4039 = vmatprep.subr.bf16.mxu0 %v6321_v55 }
 0x6f1   : >> { %3538 = vmatmul.mubr.msk.f32.gmra.mrb[74].mxu1 %vm827_vm2, %v2460_v16  ;;  %4041 = vmatpush1.bf16.msra.mxu0 %v4040_v27  ;;  %v4049_v16 = vpack.c.bf16 %v4505_v21, %v4504_v43 }
 0x6f2   : >> { %2669 = vmatprep.mubr.f32.mxu1 %v6322_v34  ;;  %4042 = vmatprep.subr.bf16.mxu0 %v6321_v55 }
 0x6f5   : >> { %3539 = vmatmul.mubr.msk.f32.gmra.mrb[76].mxu1 %vm827_vm2, %v2462_v35  ;;  %4044 = vmatpush1.bf16.msra.mxu0 %v4043_v60  ;;  %v3500_v60 = vld [vmem:[%s6283_s6 + $0x170] sm:$0xff] }
 0x6f6   : >> { %2675 = vmatprep.mubr.f32.mxu1 %v6322_v34  ;;  %4045 = vmatprep.subr.bf16.mxu0 %v6321_v55 }
 0x6f9   : >> { %3540 = vmatmul.mubr.msk.f32.gmra.mrb[78].mxu1 %vm827_vm2, %v2464_v61  ;;  %4047 = vmatpush1.bf16.msra.mxu0 %v4046_v46 }
 0x6fa   : >> { %4048 = vmatprep.subr.bf16.mxu0 %v6321_v55  ;;  %3701 = vmatprep.mubr.msk.f32.mxu1 %vm4706_vm0, %v6322_v34 }
 0x6fd   : >> { %4050 = vmatpush1.bf16.msra.mxu0 %v4049_v16 }
 0x6fe   : >> { %4051 = vmatprep.subr.bf16.mxu0 %v6321_v55 }
 0x754   : >> { %v5987_v29 = vpop.f32.mrb[52].mxu1 }
 0x755   : >> { %v2390_v35 = vpop.f32.mrb[53].mxu1 }
 0x756   : >> { %v3503_v35 = vld [vmem:[%s6283_s6 + $0x188] sm:$0xff] }
 0x758   : >> { %v5989_v45 = vpop.f32.mrb[54].mxu1 }
 0x759   : >> { %v2395_v1 = vpop.f32.mrb[55].mxu1 }
 0x789   : >> { %v5991_v8 = vpop.f32.mrb[56].mxu1 }
 0x78a   : >> { %v2400_v19 = vpop.f32.mrb[57].mxu1 }
 0x78b   : >> { %v3502_v19 = vld [vmem:[%s6283_s6 + $0x180] sm:$0xff] }
 0x78f   : >> { %v5993_v61 = vpop.f32.mrb[58].mxu1 }
 0x790   : >> { %v2405_v40 = vpop.f32.mrb[59].mxu1 }
 0x793   : >> { %v5995_v48 = vpop.f32.mrb[60].mxu1 }
 0x794   : >> { %v2410_v51 = vpop.f32.mrb[61].mxu1 }
 0x797   : >> { %v5997_v36 = vpop.f32.mrb[62].mxu1 }
 0x798   : >> { %v2415_v22 = vpop.f32.mrb[63].mxu1 }
 0x79b   : >> { %v5999_v4 = vpop.f32.mrb[64].mxu1 }
 0x79c   : >> { %v2420_v56 = vpop.f32.mrb[65].mxu1 }
 0x7b4   : >> { %v2641_v12 = vpop.f32.mrb[66].mxu1 }
 0x7b5   : >> { %v2643_v44 = vpop.f32.mrb[67].mxu1  ;;  %v6009_v6 = vadd.f32 %v3496_v13, %v2641_v12 }
 0x7b6   : >> { %v6007_v26 = vadd.f32 %v3497_v25, %v2643_v44 }
 0x7b8   : >> { %v2682_v47 = vsel %vm1028_vm4, %v6007_v26, -inf  ;;  %v2647_v58 = vpop.f32.mrb[68].mxu1 }
 0x7b9   : >> { %v2683_v9 = vmax.f32 %v6009_v6, %v2682_v47  ;;  %v2649_v27 = vpop.f32.mrb[69].mxu1  ;;  %v6022_v63 = vadd.f32 %v3498_v17, %v2647_v58 }
 0x7ba   : >> { %v6020_v52 = vadd.f32 %v3499_v31, %v2649_v27  ;;  %v3505_v27 = vld [vmem:[%s6283_s6 + $0x198] sm:$0xff] }
 0x7bb   : >> { %2684 = vmax.xlane.f32.xlu1 %v2683_v9 }
 0x7bc   : >> { %v2686_v18 = vsel %vm1028_vm4, %v6020_v52, -inf  ;;  %v2653_v11 = vpop.f32.mrb[70].mxu1 }
 0x7bd   : >> { %v2687_v46 = vmax.f32 %v6022_v63, %v2686_v18  ;;  %v2655_v21 = vpop.f32.mrb[71].mxu1  ;;  %v6035_v16 = vadd.f32 %v3500_v60, %v2653_v11  ;;  %v3507_v18 = vld [vmem:[%s6283_s6 + $0x1a8] sm:$0xff]  ;;  %v3509_v60 = vld [vmem:[%s6283_s6 + $0x1b8] sm:$0xff] }
 0x7be   : >> { %v6033_v43 = vadd.f32 %v3501_v33, %v2655_v21 }
 0x7bf   : >> { %2688 = vmax.xlane.f32.xlu0 %v2687_v46 }
 0x7c0   : >> { %v2690_v1 = vsel %vm1028_vm4, %v6033_v43, -inf  ;;  %v2659_v40 = vpop.f32.mrb[72].mxu1 }
 0x7c1   : >> { %v2691_v51 = vmax.f32 %v6035_v16, %v2690_v1  ;;  %v2661_v22 = vpop.f32.mrb[73].mxu1  ;;  %v6048_v25 = vadd.f32 %v3502_v19, %v2659_v40  ;;  %v3508_v1 = vld [vmem:[%s6283_s6 + $0x1b0] sm:$0xff] }
 0x7c2   : >> { %v6046_v56 = vadd.f32 %v3503_v35, %v2661_v22  ;;  %v3506_v35 = vld [vmem:[%s6283_s6 + $0x1a0] sm:$0xff] }
 0x7c3   : >> { %2692 = vmax.xlane.f32.xlu0 %v2691_v51 }
 0x7c4   : >> { %v2694_v13 = vsel %vm1028_vm4, %v6046_v56, -inf  ;;  %v2665_v12 = vpop.f32.mrb[74].mxu1 }
 0x7c5   : >> { %v2695_v44 = vmax.f32 %v6048_v25, %v2694_v13  ;;  %v2667_v31 = vpop.f32.mrb[75].mxu1 }
 0x7c6   : >> { %v6060_v33 = vadd.f32 %v3505_v27, %v2667_v31 }
 0x7c7   : >> { %2696 = vmax.xlane.f32.xlu1 %v2695_v44 }
 0x7c8   : >> { %v2671_v47 = vpop.f32.mrb[76].mxu1 }
 0x7c9   : >> { %v2673_v17 = vpop.f32.mrb[77].mxu1  ;;  %v6090_v22 = vadd.f32 %v3506_v35, %v2671_v47 }
 0x7ca   : >> { %v6073_v11 = vadd.f32 %v3507_v18, %v2673_v17 }
 0x7cc   : >> { %v2677_v58 = vpop.f32.mrb[78].mxu1  ;;  %v2702_v40 = vsel %vm1028_vm4, %v6073_v11, -inf }
 0x7cd   : >> { %v2679_v9 = vpop.f32.mrb[79].mxu1  ;;  %v6092_v13 = vadd.f32 %v3508_v1, %v2677_v58 }
 0x7ce   : >> { %v6075_v46 = vadd.f32 %v3509_v60, %v2679_v9 }
 0x7d0   : >> { %v2706_v51 = vsel %vm1028_vm4, %v6075_v46, -inf }
 0x7d1   : >> { %v2707_v44 = vmax.f32 %v6092_v13, %v2706_v51 }
 0x7d8   : >> { %4507 = vrot.lane.b32.xlu1 %v5067_v41, %s4714_s22  ;;  %v3504_v41 = vld [vmem:[%s6283_s6 + $0x190] sm:$0xff] }
 0x7d9   : >> { %4512 = vrot.lane.b32.xlu0 %v5073_v50, %s4714_s22  ;;  %v2698_v50 = vsel %vm1028_vm4, %v6060_v33, -inf  ;;  %v6077_v21 = vadd.f32 %v3504_v41, %v2665_v12  ;;  %v2703_v12 = vmax.f32 %v6090_v22, %v2702_v40 }
 0x7db   : >> { %v2699_v19 = vmax.f32 %v6077_v21, %v2698_v50 }
 0x7f8   : >> { %2700 = vmax.xlane.f32.xlu0 %v2699_v19 }
 0x7fc   : >> { %2704 = vmax.xlane.f32.xlu0 %v2703_v12  ;;  %2708 = vmax.xlane.f32.xlu1 %v2707_v44 }
 0x800   : >> { %2203 = vadd.xlane.f32.xlu1 %v5879_v20 }
 0x804   : >> { %1656 = vadd.xlane.f32.xlu1 %v5618_v42 }
 0x808   : >> { %1668 = vadd.xlane.f32.xlu1 %v5675_v15 }
 0x80c   : >> { %2207 = vadd.xlane.f32.xlu1 %v5886_v0 }
 0x810   : >> { %1660 = vadd.xlane.f32.xlu1 %v5661_v5 }
 0x812   : >> { %4517 = vrot.lane.b32.xlu0 %v5082_v59, %s4714_s22  ;;  %s4715_s22 = smov 16  }
 0x814   : >> { %2211 = vadd.xlane.f32.xlu1 %v5929_v62 }
 0x818   : >> { %1664 = vadd.xlane.f32.xlu1 %v5671_v32 }
 0x81c   : >> { %2215 = vadd.xlane.f32.xlu1 %v5939_v53 }
 0x831   : >> { %1652 = vadd.xlane.f32.xlu0 %v5611_v28 }
 0x835   : >> { %2219 = vadd.xlane.f32.xlu0 %v5943_v10 }
 0x839   : >> { %1672 = vadd.xlane.f32.xlu0 %v5682_v54 }
 0x83d   : >> { %2223 = vadd.xlane.f32.xlu0 %v5950_v57 }
 0x841   : >> { %1676 = vadd.xlane.f32.xlu0 %v5669_v7 }
 0x845   : >> { %2227 = vadd.xlane.f32.xlu0 %v5937_v23 }
 0x848   : >> { %v2685_v42 = vpop.xlane.xlu1 %2684 }
 0x849   : >> { %v2710_v59 = vsub.f32 %v6009_v6, %v2685_v42  ;;  %v2711_v5 = vsub.f32 %v6007_v26, %v2685_v42 }
 0x84b   : >> { %v2724_v32 = vmul.f32 1.442695, %v2710_v59  ;;  %v2726_v15 = vmul.f32 1.442695, %v2711_v5 }
 0x84c   : >> { %v2689_v20 = vpop.xlane.xlu0 %2688 }
 0x84d   : >> { %4605 = vpow2.f32 %v2724_v32  ;;  %v2712_v28 = vsub.f32 %v6022_v63, %v2689_v20  ;;  %v2713_v0 = vsub.f32 %v6020_v52, %v2689_v20 }
 0x84e   : >> { %4607 = vpow2.f32 %v2726_v15 }
 0x84f   : >> { %v2728_v54 = vmul.f32 1.442695, %v2712_v28  ;;  %v2730_v62 = vmul.f32 1.442695, %v2713_v0 }
 0x850   : >> { %v2693_v53 = vpop.xlane.xlu0 %2692 }
 0x851   : >> { %4609 = vpow2.f32 %v2728_v54  ;;  %v2714_v7 = vsub.f32 %v6035_v16, %v2693_v53  ;;  %v2715_v23 = vsub.f32 %v6033_v43, %v2693_v53 }
 0x852   : >> { %4611 = vpow2.f32 %v2730_v62 }
 0x853   : >> { %v2732_v10 = vmul.f32 1.442695, %v2714_v7  ;;  %v2734_v57 = vmul.f32 1.442695, %v2715_v23 }
 0x854   : >> { %v2697_v26 = vpop.xlane.xlu1 %2696  ;;  %v4513_v17 = vpop.permute.xlu0 %4512 }
 0x855   : >> { %4613 = vpow2.f32 %v2732_v10  ;;  %v2716_v6 = vsub.f32 %v6048_v25, %v2697_v26  ;;  %v2717_v63 = vsub.f32 %v6046_v56, %v2697_v26  ;;  %v4515_v56 = vunpack.i.h.bf16 %v4513_v17 }
 0x856   : >> { %4615 = vpow2.f32 %v2734_v57  ;;  %v4514_v60 = vunpack.i.l.bf16 %v4513_v17 }
 0x857   : >> { %v6120_v52 = vpop.eup %4605  ;;  %v2736_v31 = vmul.f32 1.442695, %v2716_v6  ;;  %v2738_v58 = vmul.f32 1.442695, %v2717_v63 }
 0x858   : >> { %v4608_v47 = vpop.eup %4607  ;;  %v4508_v9 = vpop.permute.xlu1 %4507  ;;  %v4055_v40 = vpack.c.bf16 %v4515_v56, %v4514_v60 }
 0x859   : >> { %4617 = vpow2.f32 %v2736_v31  ;;  %3541 = vmatprep.mubr.msk.f32.mxu0 %vm1028_vm4, %v4608_v47  ;;  %v4510_v43 = vunpack.i.h.bf16 %v4508_v9  ;;  %v4509_v16 = vunpack.i.l.bf16 %v4508_v9  ;;  %v2752_v27 = vsel %vm1028_vm4, %v4608_v47, 0.0 }
 0x85a   : >> { %4619 = vpow2.f32 %v2738_v58  ;;  %v2753_v25 = vadd.f32 %v6120_v52, %v2752_v27 }
 0x85b   : >> { %v6125_v18 = vpop.eup %4609  ;;  %v4052_v41 = vpack.c.bf16 %v4510_v43, %v4509_v16 }
 0x85c   : >> { %v4612_v50 = vpop.eup %4611  ;;  %2754 = vadd.xlane.f32.xlu1 %v2753_v25 }
 0x85d   : >> { %4053 = vmatpush1.bf16.msra.mxu0 %v4052_v41  ;;  %v2756_v35 = vsel %vm1028_vm4, %v4612_v50, 0.0 }
 0x85e   : >> { %v2757_v1 = vadd.f32 %v6125_v18, %v2756_v35  ;;  %4054 = vmatprep.subr.bf16.mxu0 %v6321_v55 }
 0x85f   : >> { %v6130_v19 = vpop.eup %4613 }
 0x860   : >> { %v4616_v51 = vpop.eup %4615  ;;  %2758 = vadd.xlane.f32.xlu1 %v2757_v1 }
 0x861   : >> { %4056 = vmatpush1.bf16.msra.mxu0 %v4055_v40  ;;  %v2760_v12 = vsel %vm1028_vm4, %v4616_v51, 0.0 }
 0x862   : >> { %v2761_v44 = vadd.f32 %v6130_v19, %v2760_v12  ;;  %4057 = vmatprep.subr.bf16.mxu0 %v6321_v55 }
 0x863   : >> { %v6135_v42 = vpop.eup %4617 }
 0x864   : >> { %v4620_v59 = vpop.eup %4619  ;;  %2762 = vadd.xlane.f32.xlu1 %v2761_v44 }
 0x865   : >> { %v2764_v5 = vsel %vm1028_vm4, %v4620_v59, 0.0 }
 0x866   : >> { %v2765_v32 = vadd.f32 %v6135_v42, %v2764_v5 }
 0x868   : >> { %2766 = vadd.xlane.f32.xlu1 %v2765_v32 }
 0x86c   : >> { %1101 = vadd.xlane.f32.xlu1 %v5331_v38 }
 0x870   : >> { %1117 = vadd.xlane.f32.xlu1 %v5401_v3 }
 0x874   : >> { %1121 = vadd.xlane.f32.xlu1 %v5408_v49 }
 0x878   : >> { %1125 = vadd.xlane.f32.xlu1 %v5394_v30 }
 0x885   : >> { %v2701_v15 = vpop.xlane.xlu0 %2700 }
 0x886   : >> { %v2718_v20 = vsub.f32 %v6077_v21, %v2701_v15  ;;  %v2719_v28 = vsub.f32 %v6060_v33, %v2701_v15 }
 0x888   : >> { %v2740_v0 = vmul.f32 1.442695, %v2718_v20  ;;  %v2742_v54 = vmul.f32 1.442695, %v2719_v28  ;;  %v6336_v28 = vld [vmem:[#allocation27_spill] sm:$0xff] }
 0x889   : >> { %v2705_v62 = vpop.xlane.xlu0 %2704  ;;  %v2709_v53 = vpop.xlane.xlu1 %2708 }
 0x88a   : >> { %4621 = vpow2.f32 %v2740_v0  ;;  %v2720_v7 = vsub.f32 %v6090_v22, %v2705_v62  ;;  %v2721_v38 = vsub.f32 %v6073_v11, %v2705_v62  ;;  %v2722_v3 = vsub.f32 %v6092_v13, %v2709_v53 }
 0x88b   : >> { %4623 = vpow2.f32 %v2742_v54  ;;  %v2723_v49 = vsub.f32 %v6075_v46, %v2709_v53 }
 0x88c   : >> { %v2744_v30 = vmul.f32 1.442695, %v2720_v7  ;;  %v2746_v23 = vmul.f32 1.442695, %v2721_v38  ;;  %v2748_v10 = vmul.f32 1.442695, %v2722_v3 }
 0x88d   : >> { %v2750_v21 = vmul.f32 1.442695, %v2723_v49  ;;  %v4518_v57 = vpop.permute.xlu0 %4517  ;;  %v2204_v33 = vpop.xlane.xlu1 %2203  ;;  %v6337_v7 = vld [vmem:[#allocation25_spill] sm:$0xff] }
 0x88e   : >> { %4625 = vpow2.f32 %v2744_v30  ;;  %v4520_v26 = vunpack.i.h.bf16 %v4518_v57  ;;  %v4519_v6 = vunpack.i.l.bf16 %v4518_v57  ;;  %v6338_v30 = vld [vmem:[#allocation28_spill] sm:$0xff]  ;;  %v6339_v57 = vld [vmem:[#allocation26_spill] sm:$0xff] }
 0x88f   : >> { %4627 = vpow2.f32 %v2746_v23 }
 0x890   : >> { %4629 = vpow2.f32 %v2748_v10  ;;  %v4058_v63 = vpack.c.bf16 %v4520_v26, %v4519_v6 }
 0x891   : >> { %4631 = vpow2.f32 %v2750_v21  ;;  %v1657_v22 = vpop.xlane.xlu1 %1656 }
 0x892   : >> { %4633 = vrcp.f32 %v2204_v33  ;;  %4059 = vmatpush1.bf16.msra.mxu0 %v4058_v63  ;;  %v6341_v63 = vld [vmem:[#allocation13_spill] sm:$0xff] }
 0x893   : >> { %4060 = vmatprep.subr.bf16.mxu0 %v6321_v55 }
 0x894   : >> { %v4622_v11 = vpop.eup %4621 }
 0x895   : >> { %v4624_v46 = vpop.eup %4623  ;;  %v1669_v13 = vpop.xlane.xlu1 %1668  ;;  %2938 = vmatmul.mubr.f32.vlgmr.msra.gmra.mrb[56].mxu0 %v6120_v52 }
 0x896   : >> { %4635 = vrcp.f32 %v1669_v13  ;;  %3542 = vmatprep.mubr.msk.f32.mxu0 %vm1028_vm4, %v4612_v50  ;;  %v2768_v31 = vsel %vm1028_vm4, %v4624_v46, 0.0 }
 0x897   : >> { %v2769_v47 = vadd.f32 %v4622_v11, %v2768_v31 }
 0x898   : >> { %v4626_v17 = vpop.eup %4625 }
 0x899   : >> { %v4628_v58 = vpop.eup %4627  ;;  %2770 = vadd.xlane.f32.xlu0 %v2769_v47  ;;  %2943 = vmatmul.mubr.f32.gmra.mrb[58].mxu0 %v6125_v18 }
 0x89a   : >> { %v4630_v9 = vpop.eup %4629  ;;  %3543 = vmatprep.mubr.msk.f32.mxu0 %vm1028_vm4, %v4616_v51  ;;  %v2772_v43 = vsel %vm1028_vm4, %v4628_v58, 0.0 }
 0x89b   : >> { %v4632_v16 = vpop.eup %4631  ;;  %v2773_v27 = vadd.f32 %v4626_v17, %v2772_v43 }
 0x89c   : >> { %v4634_v25 = vpop.eup %4633  ;;  %v2776_v52 = vsel %vm1028_vm4, %v4632_v16, 0.0 }
 0x89d   : >> { %v2429_v56 = vmul.f32 %v4634_v25, %v5987_v29  ;;  %2774 = vadd.xlane.f32.xlu0 %v2773_v27  ;;  %2948 = vmatmul.mubr.f32.gmra.mrb[60].mxu0 %v6130_v19  ;;  %v2777_v18 = vadd.f32 %v4630_v9, %v2776_v52 }
 0x89e   : >> { %3544 = vmatprep.mubr.msk.f32.mxu0 %vm1028_vm4, %v4620_v59 }
 0x89f   : >> { %3022 = vrot.lane.b32.xlu1 %v2429_v56, %s4715_s22 }
 0x8a0   : >> { %v4636_v60 = vpop.eup %4635 }
 0x8a1   : >> { %2778 = vadd.xlane.f32.xlu0 %v2777_v18  ;;  %2953 = vmatmul.mubr.f32.gmra.mrb[62].mxu0 %v6135_v42  ;;  %v1882_v41 = vmul.f32 %v4636_v60, %v5728_v37  ;;  %v2208_v37 = vpop.xlane.xlu1 %2207  ;;  %v6335_v42 = vld [vmem:[#allocation24_spill] sm:$0xff] }
 0x8a2   : >> { %3545 = vmatprep.mubr.msk.f32.mxu0 %vm1028_vm4, %v4624_v46  ;;  %v6343_v46 = vld [vmem:[#allocation15_spill] sm:$0xff] }
 0x8a3   : >> { %3002 = vrot.lane.b32.xlu1 %v1882_v41, %s4716_s23 }
 0x8a5   : >> { %1105 = vadd.xlane.f32.xlu0 %v5340_v2  ;;  %2958 = vmatmul.mubr.f32.gmra.mrb[64].mxu0 %v4622_v11  ;;  %v1661_v50 = vpop.xlane.xlu1 %1660  ;;  %v6342_v11 = vld [vmem:[#allocation14_spill] sm:$0xff] }
 0x8a6   : >> { %3546 = vmatprep.mubr.msk.f32.mxu0 %vm1028_vm4, %v4628_v58  ;;  %v4064_v13 = vpack.c.bf16 %v6343_v46, %v6342_v11 }
 0x8a9   : >> { %1109 = vadd.xlane.f32.xlu0 %v5387_v39  ;;  %2963 = vmatmul.mubr.f32.gmra.mrb[66].mxu0 %v4626_v17  ;;  %v2212_v35 = vpop.xlane.xlu1 %2211 }
 0x8aa   : >> { %3547 = vmatprep.mubr.msk.f32.mxu0 %vm1028_vm4, %v4632_v16 }
 0x8ad   : >> { %1113 = vadd.xlane.f32.xlu0 %v5397_v24  ;;  %2968 = vmatmul.mubr.f32.gmra.mrb[68].mxu0 %v4630_v9  ;;  %v1665_v51 = vpop.xlane.xlu1 %1664 }
 0x8ae   : >> { %3689 = vmatprep.mubr.msk.f32.mxu0 %vm4706_vm0, %v6322_v34 }
 0x8be   : >> { %v1653_v29 = vpop.xlane.xlu0 %1652 }
 0x8bf   : >> { %4637 = vrcp.f32 %v1653_v29 }
 0x8c0   : >> { %4639 = vrcp.f32 %v1657_v22 }
 0x8c2   : >> { %v2220_v2 = vpop.xlane.xlu0 %2219 }
 0x8c3   : >> { %4641 = vrcp.f32 %v2220_v2 }
 0x8c4   : >> { %4643 = vrcp.f32 %v2208_v37 }
 0x8c6   : >> { %v1673_v1 = vpop.xlane.xlu0 %1672 }
 0x8c7   : >> { %4645 = vrcp.f32 %v1673_v1 }
 0x8c8   : >> { %4647 = vrcp.f32 %v1661_v50 }
 0x8c9   : >> { %v4638_v39 = vpop.eup %4637 }
 0x8ca   : >> { %v2224_v19 = vpop.xlane.xlu0 %2223  ;;  %v1878_v24 = vmul.f32 %v4638_v39, %v5720_v14  ;;  %v4640_v40 = vpop.eup %4639 }
 0x8cb   : >> { %4649 = vrcp.f32 %v2224_v19  ;;  %v1879_v59 = vmul.f32 %v4640_v40, %v6335_v42  ;;  %v2216_v14 = vpop.xlane.xlu1 %2215 }
 0x8cc   : >> { %2994 = vrot.lane.b32.xlu0 %v1878_v24, %s4716_s23  ;;  %4651 = vrcp.f32 %v2212_v35 }
 0x8cd   : >> { %v4642_v12 = vpop.eup %4641 }
 0x8ce   : >> { %v1677_v44 = vpop.xlane.xlu0 %1676  ;;  %v2433_v5 = vmul.f32 %v4642_v12, %v5995_v48  ;;  %v4644_v32 = vpop.eup %4643 }
 0x8cf   : >> { %4653 = vrcp.f32 %v1677_v44  ;;  %v2430_v54 = vmul.f32 %v4644_v32, %v5989_v45 }
 0x8d0   : >> { %2996 = vrot.lane.b32.xlu0 %v1879_v59, %s4716_s23  ;;  %3030 = vrot.lane.b32.xlu1 %v2433_v5, %s4715_s22  ;;  %4655 = vrcp.f32 %v1665_v51 }
 0x8d1   : >> { %v4646_v15 = vpop.eup %4645 }
 0x8d2   : >> { %v2228_v20 = vpop.xlane.xlu0 %2227  ;;  %v1883_v0 = vmul.f32 %v4646_v15, %v6336_v28  ;;  %v4648_v62 = vpop.eup %4647 }
 0x8d3   : >> { %4657 = vrcp.f32 %v2228_v20  ;;  %v1880_v38 = vmul.f32 %v4648_v62, %v6337_v7 }
 0x8d4   : >> { %3004 = vrot.lane.b32.xlu1 %v1883_v0, %s4716_s23  ;;  %3024 = vrot.lane.b32.xlu0 %v2430_v54, %s4715_s22  ;;  %4659 = vrcp.f32 %v2216_v14 }
 0x8d5   : >> { %v4650_v48 = vpop.eup %4649 }
 0x8d6   : >> { %v2434_v53 = vmul.f32 %v4650_v48, %v5997_v36  ;;  %v4652_v3 = vpop.eup %4651 }
 0x8d7   : >> { %v2431_v23 = vmul.f32 %v4652_v3, %v5991_v8  ;;  %v6340_v8 = vld [vmem:[#allocation12_spill] sm:$0xff] }
 0x8d8   : >> { %3032 = vrot.lane.b32.xlu1 %v2434_v53, %s4715_s22  ;;  %2998 = vrot.lane.b32.xlu0 %v1880_v38, %s4716_s23  ;;  %v4061_v22 = vpack.c.bf16 %v6341_v63, %v6340_v8 }
 0x8d9   : >> { %v4654_v49 = vpop.eup %4653 }
 0x8da   : >> { %v1884_v45 = vmul.f32 %v4654_v49, %v6338_v30  ;;  %v4656_v10 = vpop.eup %4655  ;;  %4062 = vmatpush3.bf16.msra.mxu0 %v4061_v22  ;;  %4068 = vmatpush3.bf16.msra.mxu1 %v4061_v22 }
 0x8db   : >> { %v1881_v33 = vmul.f32 %v4656_v10, %v6339_v57  ;;  %4063 = vmatprep.subr.bf16.mxu0 %v6321_v55  ;;  %4067 = vmatprep.subr.bf16.mxu1 %v6321_v55 }
 0x8dc   : >> { %3006 = vrot.lane.b32.xlu1 %v1884_v45, %s4716_s23  ;;  %3026 = vrot.lane.b32.xlu0 %v2431_v23, %s4715_s22 }
 0x8dd   : >> { %v4658_v21 = vpop.eup %4657 }
 0x8de   : >> { %v2435_v36 = vmul.f32 %v4658_v21, %v5999_v4  ;;  %v4660_v26 = vpop.eup %4659  ;;  %4065 = vmatpush3.bf16.msra.mxu0 %v4064_v13  ;;  %4069 = vmatpush3.bf16.msra.mxu1 %v4064_v13 }
 0x8df   : >> { %v2432_v6 = vmul.f32 %v4660_v26, %v5993_v61  ;;  %v6344_v26 = vld [vmem:[#allocation17_spill] sm:$0xff] }
 0x8e0   : >> { %3034 = vrot.lane.b32.xlu1 %v2435_v36, %s4715_s22  ;;  %3000 = vrot.lane.b32.xlu0 %v1881_v33, %s4716_s23 }
 0x8e4   : >> { %3028 = vrot.lane.b32.xlu0 %v2432_v6, %s4715_s22 }
 0x8e9   : >> { %v2755_v4 = vpop.xlane.xlu1 %2754 }
 0x8ea   : >> { %4661 = vrcp.f32 %v2755_v4  ;;  %v6345_v4 = vld [vmem:[#allocation18_spill] sm:$0xff] }
 0x8ed   : >> { %v2759_v31 = vpop.xlane.xlu1 %2758 }
 0x8ee   : >> { %4663 = vrcp.f32 %v2759_v31 }
 0x8f1   : >> { %v2763_v61 = vpop.xlane.xlu1 %2762 }
 0x8f2   : >> { %4665 = vrcp.f32 %v2763_v61 }
 0x8f4   : >> { %v4662_v58 = vpop.eup %4661 }
 0x8f5   : >> { %v2767_v47 = vpop.xlane.xlu1 %2766 }
 0x8f6   : >> { %4667 = vrcp.f32 %v2767_v47 }
 0x8f8   : >> { %v4664_v27 = vpop.eup %4663 }
 0x8f9   : >> { %v1102_v14 = vpop.xlane.xlu1 %1101 }
 0x8fc   : >> { %v4666_v18 = vpop.eup %4665 }
 0x8fd   : >> { %v1118_v28 = vpop.xlane.xlu1 %1117 }
 0x900   : >> { %v4668_v50 = vpop.eup %4667 }
 0x901   : >> { %v1122_v54 = vpop.xlane.xlu1 %1121 }
 0x905   : >> { %v1126_v48 = vpop.xlane.xlu1 %1125 }
 0x911   : >> { %v3023_v53 = vpop.permute.xlu1 %3022 }
 0x915   : >> { %v3003_v38 = vpop.permute.xlu1 %3002 }
 0x926   : >> { %v2771_v17 = vpop.xlane.xlu0 %2770 }
 0x927   : >> { %4669 = vrcp.f32 %v2771_v17 }
 0x92a   : >> { %v2775_v25 = vpop.xlane.xlu0 %2774 }
 0x92b   : >> { %4671 = vrcp.f32 %v2775_v25 }
 0x92e   : >> { %v2779_v29 = vpop.xlane.xlu0 %2778 }
 0x92f   : >> { %4673 = vrcp.f32 %v2779_v29 }
 0x930   : >> { %4675 = vrcp.f32 %v1102_v14  ;;  %v6350_v14 = vld [vmem:[#allocation23_spill] sm:$0xff] }
 0x931   : >> { %v4670_v39 = vpop.eup %4669 }
 0x932   : >> { %v1106_v20 = vpop.xlane.xlu0 %1105 }
 0x933   : >> { %4677 = vrcp.f32 %v1106_v20 }
 0x935   : >> { %v4672_v51 = vpop.eup %4671 }
 0x936   : >> { %v1110_v0 = vpop.xlane.xlu0 %1109 }
 0x937   : >> { %4679 = vrcp.f32 %v1110_v0 }
 0x939   : >> { %v4674_v59 = vpop.eup %4673 }
 0x93a   : >> { %v1114_v62 = vpop.xlane.xlu0 %1113  ;;  %v4676_v57 = vpop.eup %4675 }
 0x93b   : >> { %v1327_v6 = vmul.f32 %v4676_v57, %v6344_v26  ;;  %4681 = vrcp.f32 %v1114_v62 }
 0x93c   : >> { %4683 = vrcp.f32 %v1118_v28 }
 0x93d   : >> { %v4678_v22 = vpop.eup %4677  ;;  %4685 = vrcp.f32 %v1122_v54 }
 0x93e   : >> { %v2995_v7 = vpop.permute.xlu0 %2994  ;;  %v1328_v31 = vmul.f32 %v4678_v22, %v6345_v4  ;;  %4687 = vrcp.f32 %v1126_v48 }
 0x93f   : >> { %v3071_v63 = vsel %vm827_vm2, %v1327_v6, %v2995_v7  ;;  %v6351_v7 = vld [vmem:[#allocation16_spill] sm:$0xff] }
 0x940   : >> { %v3079_v46 = vsel %vm3078_vm5, %v3071_v63, %v3023_v53 }
 0x941   : >> { %v4680_v47 = vpop.eup %4679 }
 0x942   : >> { %v2997_v3 = vpop.permute.xlu0 %2996  ;;  %v3031_v49 = vpop.permute.xlu1 %3030 }
 0x943   : >> { %v3072_v17 = vsel %vm827_vm2, %v1328_v31, %v2997_v3 }
 0x946   : >> { %v3025_v30 = vpop.permute.xlu0 %3024  ;;  %v3005_v45 = vpop.permute.xlu1 %3004 }
 0x94a   : >> { %v2999_v23 = vpop.permute.xlu0 %2998  ;;  %v3033_v10 = vpop.permute.xlu1 %3032 }
 0x94e   : >> { %v3027_v21 = vpop.permute.xlu0 %3026  ;;  %v3007_v36 = vpop.permute.xlu1 %3006 }
 0x952   : >> { %v3001_v33 = vpop.permute.xlu0 %3000  ;;  %v3035_v8 = vpop.permute.xlu1 %3034 }
 0x956   : >> { %v3029_v11 = vpop.permute.xlu0 %3028 }
 0x968   : >> { %v2939_v9 = vpop.f32.mrb[56].mxu0 }
 0x969   : >> { %v2980_v43 = vmul.f32 %v4662_v58, %v2939_v9  ;;  %v2941_v16 = vpop.f32.mrb[57].mxu0  ;;  %v3080_v58 = vsel %vm3078_vm5, %v3072_v17, %v3025_v30 }
 0x96b   : >> { %3050 = vrot.lane.b32.xlu1 %v2980_v43, %s4717_s24  ;;  %v6346_v43 = vld [vmem:[#allocation19_spill] sm:$0xff] }
 0x96c   : >> { %v2944_v55 = vpop.f32.mrb[58].mxu0  ;;  %v1329_v16 = vmul.f32 %v4680_v47, %v6346_v43 }
 0x96d   : >> { %v2981_v52 = vmul.f32 %v4664_v27, %v2944_v55  ;;  %v2946_v56 = vpop.f32.mrb[59].mxu0  ;;  %v4682_v55 = vpop.eup %4681 }
 0x96e   : >> { %v3073_v25 = vsel %vm827_vm2, %v1329_v16, %v2999_v23 }
 0x96f   : >> { %3052 = vrot.lane.b32.xlu0 %v2981_v52, %s4717_s24  ;;  %v3081_v52 = vsel %vm3078_vm5, %v3073_v25, %v3027_v21 }
 0x970   : >> { %v2949_v60 = vpop.f32.mrb[60].mxu0 }
 0x971   : >> { %v2982_v41 = vmul.f32 %v4666_v18, %v2949_v60  ;;  %v2951_v37 = vpop.f32.mrb[61].mxu0  ;;  %v6347_v18 = vld [vmem:[#allocation20_spill] sm:$0xff] }
 0x972   : >> { %v1330_v60 = vmul.f32 %v4682_v55, %v6347_v18  ;;  %v4684_v37 = vpop.eup %4683 }
 0x973   : >> { %3054 = vrot.lane.b32.xlu0 %v2982_v41, %s4717_s24 }
 0x974   : >> { %v2954_v2 = vpop.f32.mrb[62].mxu0  ;;  %v3074_v29 = vsel %vm827_vm2, %v1330_v60, %v3001_v33 }
 0x975   : >> { %v2983_v35 = vmul.f32 %v4668_v50, %v2954_v2  ;;  %v2956_v1 = vpop.f32.mrb[63].mxu0  ;;  %v3082_v50 = vsel %vm3078_vm5, %v3074_v29, %v3029_v11 }
 0x977   : >> { %3056 = vrot.lane.b32.xlu0 %v2983_v35, %s4717_s24  ;;  %v6348_v35 = vld [vmem:[#allocation21_spill] sm:$0xff] }
 0x978   : >> { %v2959_v19 = vpop.f32.mrb[64].mxu0  ;;  %v1331_v1 = vmul.f32 %v4684_v37, %v6348_v35 }
 0x979   : >> { %v2984_v24 = vmul.f32 %v4670_v39, %v2959_v19  ;;  %v2961_v40 = vpop.f32.mrb[65].mxu0  ;;  %v4686_v19 = vpop.eup %4685 }
 0x97b   : >> { %3058 = vrot.lane.b32.xlu1 %v2984_v24, %s4717_s24  ;;  %v3075_v24 = vsel %vm827_vm2, %v1331_v1, %v3003_v38 }
 0x97c   : >> { %v2964_v12 = vpop.f32.mrb[66].mxu0  ;;  %v3083_v40 = vsel %vm3078_vm5, %v3075_v24, %v3031_v49 }
 0x97d   : >> { %v2985_v44 = vmul.f32 %v4672_v51, %v2964_v12  ;;  %v2966_v42 = vpop.f32.mrb[67].mxu0  ;;  %v6349_v12 = vld [vmem:[#allocation22_spill] sm:$0xff] }
 0x97f   : >> { %3060 = vrot.lane.b32.xlu1 %v2985_v44, %s4717_s24  ;;  %v1332_v44 = vmul.f32 %v4686_v19, %v6349_v12 }
 0x980   : >> { %v2969_v5 = vpop.f32.mrb[68].mxu0 }
 0x981   : >> { %v2986_v32 = vmul.f32 %v4674_v59, %v2969_v5  ;;  %v2971_v15 = vpop.f32.mrb[69].mxu0  ;;  %v4688_v59 = vpop.eup %4687  ;;  %v3076_v5 = vsel %vm827_vm2, %v1332_v44, %v3005_v45 }
 0x982   : >> { %v1333_v20 = vmul.f32 %v4688_v59, %v6350_v14 }
 0x983   : >> { %3062 = vrot.lane.b32.xlu1 %v2986_v32, %s4717_s24  ;;  %v3084_v32 = vsel %vm3078_vm5, %v3076_v5, %v3033_v10 }
 0x984   : >> { %v3077_v0 = vsel %vm827_vm2, %v1333_v20, %v3007_v36 }
 0x985   : >> { %v3085_v54 = vsel %vm3078_vm5, %v3077_v0, %v3035_v8 }
 0x9dd   : >> { %v3051_v13 = vpop.permute.xlu1 %3050 }
 0x9de   : >> { %v3087_v61 = vsel %vm3086_vm6, %v3079_v46, %v3051_v13 }
 0x9df   : >> { %3690 = vmatmul.mubr.msk.f32.vlgmr.msra.gmra.mrb[70].mxu0 %vm428_vm1, %v3087_v61 }
 0x9e0   : >> { %3692 = vmatprep.mubr.msk.f32.mxu0 %vm4706_vm0, %v6322_v34 }
 0x9e1   : >> { %v3053_v9 = vpop.permute.xlu0 %3052 }
 0x9e2   : >> { %v3088_v27 = vsel %vm3086_vm6, %v3080_v58, %v3053_v9 }
 0x9e3   : >> { %3693 = vmatmul.mubr.msk.f32.gmra.mrb[72].mxu0 %vm428_vm1, %v3088_v27 }
 0x9e4   : >> { %3695 = vmatprep.mubr.msk.f32.mxu0 %vm4706_vm0, %v6322_v34 }
 0x9e5   : >> { %v3055_v56 = vpop.permute.xlu0 %3054 }
 0x9e6   : >> { %v3089_v41 = vsel %vm3086_vm6, %v3081_v52, %v3055_v56 }
 0x9e7   : >> { %3696 = vmatmul.mubr.msk.f32.gmra.mrb[74].mxu0 %vm428_vm1, %v3089_v41 }
 0x9e8   : >> { %3698 = vmatprep.mubr.msk.f32.mxu0 %vm4706_vm0, %v6322_v34 }
 0x9e9   : >> { %v3057_v2 = vpop.permute.xlu0 %3056 }
 0x9ea   : >> { %v3090_v39 = vsel %vm3086_vm6, %v3082_v50, %v3057_v2 }
 0x9eb   : >> { %3699 = vmatmul.mubr.msk.f32.gmra.mrb[76].mxu0 %vm428_vm1, %v3090_v39 }
 0x9ed   : >> { %v3059_v51 = vpop.permute.xlu1 %3058 }
 0x9ee   : >> { %v3091_v42 = vsel %vm3086_vm6, %v3083_v40, %v3059_v51 }
 0x9ef   : >> { %3702 = vmatmul.mubr.msk.f32.vlgmr.msra.gmra.mrb[80].mxu1 %vm428_vm1, %v3091_v42 }
 0x9f0   : >> { %3704 = vmatprep.mubr.msk.f32.mxu1 %vm4706_vm0, %v6322_v34 }
 0x9f1   : >> { %v3061_v15 = vpop.permute.xlu1 %3060 }
 0x9f2   : >> { %v3092_v28 = vsel %vm3086_vm6, %v3084_v32, %v3061_v15 }
 0x9f3   : >> { %3705 = vmatmul.mubr.msk.f32.gmra.mrb[82].mxu1 %vm428_vm1, %v3092_v28 }
 0x9f4   : >> { %3707 = vmatprep.mubr.msk.f32.mxu1 %vm4706_vm0, %v6322_v34 }
 0x9f5   : >> { %v3063_v62 = vpop.permute.xlu1 %3062 }
 0x9f6   : >> { %v3093_v48 = vsel %vm3086_vm6, %v3085_v54, %v3063_v62 }
 0x9f7   : >> { %3708 = vmatmul.mubr.msk.f32.gmra.mrb[84].mxu1 %vm428_vm1, %v3093_v48 }
 0xab2   : >> { %v3187_v53 = vpop.f32.mrb[70].mxu0 }
 0xab3   : >> { %v3188_v38 = vadd.f32 %v6351_v7, %v3187_v53  ;;  %v3691_v3 = vpop.f32.mrb[71].mxu0 }
 0xab5   : >> { %3222 = vst.msk [vmem:[%s3221_s25] sm:$0xff] %vm428_vm1, %v3188_v38 }
 0xab6   : >> { %v3192_v49 = vpop.f32.mrb[72].mxu0 }
 0xab7   : >> { %v3193_v30 = vadd.f32 %v6351_v7, %v3192_v49  ;;  %v3694_v45 = vpop.f32.mrb[73].mxu0 }
 0xab9   : >> { %3223 = vst.msk [vmem:[%s3221_s25 + $0x8] sm:$0xff] %vm428_vm1, %v3193_v30 }
 0xaba   : >> { %v3197_v34 = vpop.f32.mrb[74].mxu0 }
 0xabb   : >> { %v3198_v23 = vadd.f32 %v6351_v7, %v3197_v34  ;;  %v3697_v10 = vpop.f32.mrb[75].mxu0 }
 0xabd   : >> { %3224 = vst.msk [vmem:[%s3221_s25 + $0x10] sm:$0xff] %vm428_vm1, %v3198_v23 }
 0xabe   : >> { %v3202_v21 = vpop.f32.mrb[76].mxu0 }
 0xabf   : >> { %v3203_v36 = vadd.f32 %v6351_v7, %v3202_v21  ;;  %v3700_v57 = vpop.f32.mrb[77].mxu0 }
 0xac1   : >> { %3225 = vst.msk [vmem:[%s3221_s25 + $0x18] sm:$0xff] %vm428_vm1, %v3203_v36 }
 0xac2   : >> { %v3207_v33 = vpop.f32.mrb[80].mxu1 }
 0xac3   : >> { %v3208_v26 = vadd.f32 %v6351_v7, %v3207_v33  ;;  %v3703_v6 = vpop.f32.mrb[81].mxu1 }
 0xac5   : >> { %3226 = vst.msk [vmem:[%s3221_s25 + $0x20] sm:$0xff] %vm428_vm1, %v3208_v26 }
 0xac6   : >> { %v3212_v8 = vpop.f32.mrb[82].mxu1 }
 0xac7   : >> { %v3213_v63 = vadd.f32 %v6351_v7, %v3212_v8  ;;  %v3706_v22 = vpop.f32.mrb[83].mxu1  ;;  %385 = sbr.rel (!%p383_p4) target bundleno = 18 (0x12), region = 102 }
 0xac9   : >> { %3227 = vst.msk [vmem:[%s3221_s25 + $0x28] sm:$0xff] %vm428_vm1, %v3213_v63 }
 0xaca   : >> { %v3217_v11 = vpop.f32.mrb[84].mxu1 }
 0xacb   : >> { %v3218_v46 = vadd.f32 %v6351_v7, %v3217_v11  ;;  %v3709_v13 = vpop.f32.mrb[85].mxu1 }
 0xacd   : >> { %3228 = vst.msk [vmem:[%s3221_s25 + $0x30] sm:$0xff] %vm428_vm1, %v3218_v46 }
 0xace PF: > { %s19_s30 = sadd.s32 1, %s4699_s30  }
 0xacf   : > { %p16_p5 = scmp.ge.s32.totalorder %s19_s30, 4  }
 0xad1   :  { %18 = sbr.rel (!%p16_p5) target bundleno = 1 (0x1), region = 113 }

</bundles_post_ra>
